<compile_context>
chip_gen: v6e
topology: v6e:2x2x1
jax: 0.10.0
libtpu: 0.0.40
codegen_flags: <defaults>
</compile_context>

<pallas_src>
import jax
import jax.numpy as jnp
from jax.experimental import pallas as pl
from jax.experimental.pallas import tpu as pltpu

_KW = 4                       # conv kernel size of every layer
_SLOPE = 0.2                  # LeakyReLU negative slope
_EPS = 1e-5                   # BatchNorm2d eps
_LANE = 128
_VMEM_LIMIT = 64 * 1024 * 1024


def _round_up(x, m):
    return (x + m - 1) // m * m


def _pick_row_tile(Ho, Wo, Cpad, budget_bytes=6 * 1024 * 1024):
    """Largest divisor of Ho whose tile (x3 for double-buffering) fits."""
    best = 1
    for d in range(1, Ho + 1):
        if Ho % d:
            continue
        if 3 * d * Wo * Cpad * 4 <= budget_bytes:
            best = d
    return best


# ---------------------------------------------------------------------------
# Pass 1: fused conv (sum of 16 shifted MXU matmuls) [+bias] [+LeakyReLU]
#         [+ per-tile BN partial sums]
# ---------------------------------------------------------------------------
def _make_conv_kernel(*, stride, Wo, Cin, Cpad, use_bias, use_act,
                      emit_stats, out_dtype):
    s = stride

    def kernel(*refs):
        idx = 0
        x_ref = refs[idx]; idx += 1           # (1, s*s, Hq, Wq, Cin)  bf16
        w_ref = refs[idx]; idx += 1           # (16, Cin, Cpad)        bf16
        b_ref = None
        if use_bias:
            b_ref = refs[idx]; idx += 1       # (1, Cpad)              f32
        o_ref = refs[idx]; idx += 1           # (1, 1, Wo, Cpad)
        st_ref = refs[idx] if emit_stats else None   # (1, 1, 2, Cpad) f32

        ho = pl.program_id(1)                 # output row of this grid step

        acc = jnp.zeros((Wo, Cpad), jnp.float32)
        for ki in range(_KW):
            for kj in range(_KW):
                ph = (ki % s) * s + (kj % s)  # phase index (0 for stride 1)
                di, dj = ki // s, kj // s     # phase-local row / col shift
                xs = x_ref[0, ph, ho + di, pl.ds(dj, Wo), :]   # (Wo, Cin)
                acc = acc + jnp.dot(xs, w_ref[ki * _KW + kj],
                                    preferred_element_type=jnp.float32)
        if use_bias:
            acc = acc + b_ref[...]
        if emit_stats:
            # Per-tile partial sums only; the full-M reduction happens in
            # JAX, so tiling over M stays legal and exact (no padded rows).
            ssum = jnp.sum(acc, axis=0, keepdims=True)
            ssq = jnp.sum(acc * acc, axis=0, keepdims=True)
            st_ref[0, 0] = jnp.concatenate([ssum, ssq], axis=0)
        if use_act:                           # f32 epilogue (v5e-friendly)
            acc = jnp.where(acc > 0, acc, _SLOPE * acc)
        o_ref[0, 0] = acc.astype(out_dtype)

    return kernel


# ---------------------------------------------------------------------------
# Pass 2: fused BatchNorm apply (scale/shift) + LeakyReLU, gridded, lane-dense
# ---------------------------------------------------------------------------
def _bn_act_apply(y, scale, shift):
    N, Ho, Wo, Cpad = y.shape
    TH = _pick_row_tile(Ho, Wo, Cpad)
    T = Ho // TH

    def kernel(y_ref, sc_ref, sh_ref, o_ref):
        z = y_ref[...].astype(jnp.float32) * sc_ref[...] + sh_ref[...]
        o_ref[...] = jnp.where(z > 0, z, _SLOPE * z).astype(o_ref.dtype)

    blk = pl.BlockSpec((1, TH, Wo, Cpad), lambda n, t: (n, t, 0, 0))
    par = pl.BlockSpec((1, 1, 1, Cpad), lambda n, t: (0, 0, 0, 0))
    return pl.pallas_call(
        kernel,
        grid=(N, T),
        in_specs=[blk, par, par],
        out_specs=blk,
        out_shape=jax.ShapeDtypeStruct((N, Ho, Wo, Cpad), jnp.bfloat16),
        compiler_params=pltpu.CompilerParams(
            dimension_semantics=("parallel", "parallel"),
            vmem_limit_bytes=_VMEM_LIMIT),
        cost_estimate=pl.CostEstimate(
            flops=int(3 * y.size), transcendentals=0,
            bytes_accessed=int(4 * y.size + 2 * y.size + 8 * Cpad)),
    )(y, scale, shift)


# ---------------------------------------------------------------------------
# JAX glue: input preparation (pad + phase split), one layer, full forward
# ---------------------------------------------------------------------------
def _prep_input(x_nhwc, stride):
    """Zero-pad spatially by 1 and (for stride 2) split into 2x2 phases.

    Returns (N, stride*stride, Hq, Wq, C) so every in-kernel tap read is a
    contiguous slice.  Pure reshape/transpose -> ~1x HBM traffic (no im2col).
    """
    xp = jnp.pad(x_nhwc, ((0, 0), (1, 1), (1, 1), (0, 0)))
    N, Hp, Wp, C = xp.shape
    if stride == 1:
        return xp.reshape(N, 1, Hp, Wp, C)
    assert Hp % 2 == 0 and Wp % 2 == 0
    xp = xp.reshape(N, Hp // 2, 2, Wp // 2, 2, C)
    xp = jnp.transpose(xp, (0, 2, 4, 1, 3, 5))        # (N, 2, 2, Hq, Wq, C)
    return xp.reshape(N, 4, Hp // 2, Wp // 2, C)


def _conv_layer(x, cfg, arr):
    """One Conv2d(k=4, pad=1) [+bias] [+BN] [+LeakyReLU] block. x: NHWC."""
    N, H, W, Cin = x.shape
    s = cfg["stride"]
    Cout = cfg["cout"]
    Cpad = _round_up(Cout, _LANE)
    Ho = (H + 2 - _KW) // s + 1
    Wo = (W + 2 - _KW) // s + 1
    use_bias, use_bn, act = cfg["use_bias"], cfg["use_bn"], cfg["act"]
    out_dtype = jnp.float32 if (use_bn or not act) else jnp.bfloat16

    # Weights: (4,4,Cin,Cout) -> (16, Cin, Cpad) bf16, zero-padded channels.
    w = arr["w"].reshape(_KW * _KW, Cin, Cout)
    w = jnp.pad(w, ((0, 0), (0, 0), (0, Cpad - Cout))).astype(jnp.bfloat16)

    x_prep = _prep_input(x.astype(jnp.bfloat16), s)
    PP, Hq, Wq = x_prep.shape[1:4]

    grid = (N, Ho)
    # Whole prepared image + full weights have constant block indices per n,
    # so they are DMA'd once and stay VMEM resident across the row grid.
    in_specs = [
        pl.BlockSpec((1, PP, Hq, Wq, Cin), lambda n, t: (n, 0, 0, 0, 0)),
        pl.BlockSpec((_KW * _KW, Cin, Cpad), lambda n, t: (0, 0, 0)),
    ]
    args = [x_prep, w]
    if use_bias:
        in_specs.append(pl.BlockSpec((1, Cpad), lambda n, t: (0, 0)))
        args.append(jnp.pad(arr["bias"], (0, Cpad - Cout))
                    .astype(jnp.float32).reshape(1, Cpad))

    act_shape = jax.ShapeDtypeStruct((N, Ho, Wo, Cpad), out_dtype)
    act_spec = pl.BlockSpec((1, 1, Wo, Cpad), lambda n, t: (n, t, 0, 0))
    if use_bn:
        out_shape = (act_shape,
                     jax.ShapeDtypeStruct((N, Ho, 2, Cpad), jnp.float32))
        out_specs = (act_spec,
                     pl.BlockSpec((1, 1, 2, Cpad), lambda n, t: (n, t, 0, 0)))
    else:
        out_shape = act_shape
        out_specs = act_spec

    flops = int(2 * N * Ho * Wo * (_KW * _KW * Cin) * Cpad)
    out_bytes = N * Ho * Wo * Cpad * (4 if out_dtype == jnp.float32 else 2)
    kernel = _make_conv_kernel(stride=s, Wo=Wo, Cin=Cin, Cpad=Cpad,
                               use_bias=use_bias,
                               use_act=(act and not use_bn),
                               emit_stats=use_bn, out_dtype=out_dtype)
    res = pl.pallas_call(
        kernel,
        grid=grid,
        in_specs=in_specs,
        out_specs=out_specs,
        out_shape=out_shape,
        compiler_params=pltpu.CompilerParams(
            dimension_semantics=("parallel", "parallel"),
            vmem_limit_bytes=_VMEM_LIMIT),
        cost_estimate=pl.CostEstimate(
            flops=flops, transcendentals=0,
            bytes_accessed=int(2 * x_prep.size + 2 * w.size + out_bytes)),
    )(*args)

    if not use_bn:
        y = res
    else:
        y, stats = res
        Mrows = N * Ho * Wo                    # true row count (no padding)
        tot = jnp.sum(stats, axis=(0, 1))      # (2, Cpad)
        mean = tot[0] / Mrows
        var = jnp.maximum(tot[1] / Mrows - mean * mean, 0.0)
        rstd = jax.lax.rsqrt(var + _EPS)
        gamma = jnp.pad(arr["gamma"], (0, Cpad - Cout))   # padded ch -> 0
        beta = jnp.pad(arr["beta"], (0, Cpad - Cout))
        scale = (gamma * rstd).astype(jnp.float32).reshape(1, 1, 1, Cpad)
        shift = (beta - mean * gamma * rstd).astype(jnp.float32) \
            .reshape(1, 1, 1, Cpad)
        y = _bn_act_apply(y, scale, shift)

    return y[..., :Cout]


def init_nlayer_discriminator_params(key, input_nc, ndf=64, n_layers=3):
    """Static per-layer config (Python scalars) + arrays, mirroring
    NLayerDiscriminator.__init__ (use_bias=False for norm layers,
    use_sigmoid=False)."""
    keys = jax.random.split(key, n_layers + 2)

    def conv_w(k, cin, cout):
        # (KH, KW, Cin, Cout); flattening to (16, Cin, Cout) matches the
        # in-kernel tap ordering.
        return 0.02 * jax.random.normal(k, (_KW, _KW, cin, cout), jnp.float32)

    cfgs, arrays = [], []
    # layer 0: conv(bias) + LeakyReLU
    cfgs.append(dict(stride=2, act=True, use_bias=True, use_bn=False, cout=ndf))
    arrays.append(dict(w=conv_w(keys[0], input_nc, ndf),
                       bias=jnp.zeros((ndf,), jnp.float32),
                       gamma=None, beta=None))
    nf = 1
    for n in range(1, n_layers):
        nf_prev, nf = nf, min(2 ** n, 8)
        cin, cout = ndf * nf_prev, ndf * nf
        cfgs.append(dict(stride=2, act=True, use_bias=False, use_bn=True,
                         cout=cout))
        arrays.append(dict(w=conv_w(keys[n], cin, cout), bias=None,
                           gamma=jnp.ones((cout,), jnp.float32),
                           beta=jnp.zeros((cout,), jnp.float32)))
    nf_prev, nf = nf, min(2 ** n_layers, 8)
    cin, cout = ndf * nf_prev, ndf * nf
    cfgs.append(dict(stride=1, act=True, use_bias=False, use_bn=True,
                     cout=cout))
    arrays.append(dict(w=conv_w(keys[n_layers], cin, cout), bias=None,
                       gamma=jnp.ones((cout,), jnp.float32),
                       beta=jnp.zeros((cout,), jnp.float32)))
    # final 1-channel conv (bias, no norm, no activation; use_sigmoid=False)
    cfgs.append(dict(stride=1, act=False, use_bias=True, use_bn=False, cout=1))
    arrays.append(dict(w=conv_w(keys[n_layers + 1], ndf * nf, 1),
                       bias=jnp.zeros((1,), jnp.float32),
                       gamma=None, beta=None))
    return tuple(cfgs), arrays


def make_forward(cfgs):
    """cfgs are static (closed over) so strides stay Python ints under jit."""
    @jax.jit
    def forward(x_nchw, arrays):
        x = jnp.transpose(x_nchw, (0, 2, 3, 1)).astype(jnp.bfloat16)   # NHWC
        for cfg, arr in zip(cfgs, arrays):
            x = _conv_layer(x, cfg, arr)
        return jnp.transpose(x.astype(jnp.float32), (0, 3, 1, 2))      # NCHW
    return forward


# ---------------------------------------------------------------------------
if __name__ == "__main__":
    key = jax.random.PRNGKey(0)
    kx, kp = jax.random.split(key)

    # Spatial must survive 3 stride-2 convs plus two k=4/s=1/p=1 convs -> 32.
    batch, input_nc, ndf, spatial = 2, 4, 8, 32
    x = jax.random.normal(kx, (batch, input_nc, spatial, spatial), jnp.float32)

    cfgs, arrays = init_nlayer_discriminator_params(kp, input_nc, ndf=ndf,
                                                    n_layers=3)
    forward = make_forward(cfgs)
    out = jax.block_until_ready(forward(x, arrays))

    # Expected PatchGAN output shape for 32x32 input: (2, 1, 2, 2).
    assert out.shape == (batch, 1, 2, 2), out.shape
    assert bool(jnp.all(jnp.isfinite(out))), "non-finite output"
    print("KERNEL_OK")
</pallas_src>

<mosaic_0001>
module attributes {stable_mosaic.version = 11 : i64} {
  func.func @kernel(%arg0: i32, %arg1: i32, %arg2: memref<1x4x17x17x4xbf16, #tpu.memory_space<vmem>>, %arg3: memref<16x4x128xbf16, #tpu.memory_space<vmem>>, %arg4: memref<1x128xf32, #tpu.memory_space<vmem>>, %arg5: memref<1x1x16x128xbf16, #tpu.memory_space<vmem>>) attributes {dimension_semantics = [#tpu.dimension_semantics<parallel>, #tpu.dimension_semantics<parallel>], iteration_bounds = array<i64: 2, 16>, scalar_prefetch = 0 : i64, scratch_operands = 0 : i64, tpu.core_type = #tpu.core_type<tc>, window_params = [{transform_indices = @transform_0, window_bounds = array<i64: 1, 4, 17, 17, 4>}, {pipeline_mode = #tpu.pipeline_mode<synchronous>, transform_indices = @transform_1, window_bounds = array<i64: 16, 4, 128>}, {pipeline_mode = #tpu.pipeline_mode<synchronous>, transform_indices = @transform_2, window_bounds = array<i64: 1, 128>}, {transform_indices = @transform_3, window_bounds = array<i64: 1, 1, 16, 128>}]} {
    %cst = arith.constant 0.000000e+00 : f32
    %0 = vector.broadcast %cst : f32 to vector<16x128xf32>
    %c0_i32 = arith.constant 0 : i32
    %1 = arith.addi %arg1, %c0_i32 : i32
    %c0 = arith.constant 0 : index
    %c0_0 = arith.constant 0 : index
    %2 = arith.index_cast %1 : i32 to index
    %c0_1 = arith.constant 0 : index
    %c0_2 = arith.constant 0 : index
    %3 = vector.load %arg2[%c0, %c0_0, %2, %c0_1, %c0_2] : memref<1x4x17x17x4xbf16, #tpu.memory_space<vmem>>, vector<1x1x1x16x4xbf16>
    %4 = vector.shape_cast %3 : vector<1x1x1x16x4xbf16> to vector<16x4xbf16>
    %c0_3 = arith.constant 0 : index
    %c0_4 = arith.constant 0 : index
    %c0_5 = arith.constant 0 : index
    %5 = vector.load %arg3[%c0_3, %c0_4, %c0_5] : memref<16x4x128xbf16, #tpu.memory_space<vmem>>, vector<1x4x128xbf16>
    %6 = vector.shape_cast %5 : vector<1x4x128xbf16> to vector<4x128xbf16>
    %cst_6 = arith.constant dense<0.000000e+00> : vector<16x128xf32>
    %7 = tpu.matmul %4, %6, %cst_6 {dimension_numbers = #tpu.dot_dimension_numbers<[1], [0], [0], [1], [0, 0, 1, 1], [], []>} : vector<16x4xbf16>, vector<4x128xbf16>, vector<16x128xf32> -> vector<16x128xf32>
    %8 = arith.addf %0, %7 : vector<16x128xf32>
    %c0_i32_7 = arith.constant 0 : i32
    %9 = arith.addi %arg1, %c0_i32_7 : i32
    %c0_8 = arith.constant 0 : index
    %c1 = arith.constant 1 : index
    %10 = arith.index_cast %9 : i32 to index
    %c0_9 = arith.constant 0 : index
    %c0_10 = arith.constant 0 : index
    %11 = vector.load %arg2[%c0_8, %c1, %10, %c0_9, %c0_10] : memref<1x4x17x17x4xbf16, #tpu.memory_space<vmem>>, vector<1x1x1x16x4xbf16>
    %12 = vector.shape_cast %11 : vector<1x1x1x16x4xbf16> to vector<16x4xbf16>
    %c1_11 = arith.constant 1 : index
    %c0_12 = arith.constant 0 : index
    %c0_13 = arith.constant 0 : index
    %13 = vector.load %arg3[%c1_11, %c0_12, %c0_13] : memref<16x4x128xbf16, #tpu.memory_space<vmem>>, vector<1x4x128xbf16>
    %14 = vector.shape_cast %13 : vector<1x4x128xbf16> to vector<4x128xbf16>
    %cst_14 = arith.constant dense<0.000000e+00> : vector<16x128xf32>
    %15 = tpu.matmul %12, %14, %cst_14 {dimension_numbers = #tpu.dot_dimension_numbers<[1], [0], [0], [1], [0, 0, 1, 1], [], []>} : vector<16x4xbf16>, vector<4x128xbf16>, vector<16x128xf32> -> vector<16x128xf32>
    %16 = arith.addf %8, %15 : vector<16x128xf32>
    %c0_i32_15 = arith.constant 0 : i32
    %17 = arith.addi %arg1, %c0_i32_15 : i32
    %c0_16 = arith.constant 0 : index
    %c0_17 = arith.constant 0 : index
    %18 = arith.index_cast %17 : i32 to index
    %c1_18 = arith.constant 1 : index
    %c0_19 = arith.constant 0 : index
    %19 = vector.load %arg2[%c0_16, %c0_17, %18, %c1_18, %c0_19] : memref<1x4x17x17x4xbf16, #tpu.memory_space<vmem>>, vector<1x1x1x16x4xbf16>
    %20 = vector.shape_cast %19 : vector<1x1x1x16x4xbf16> to vector<16x4xbf16>
    %c2 = arith.constant 2 : index
    %c0_20 = arith.constant 0 : index
    %c0_21 = arith.constant 0 : index
    %21 = vector.load %arg3[%c2, %c0_20, %c0_21] : memref<16x4x128xbf16, #tpu.memory_space<vmem>>, vector<1x4x128xbf16>
    %22 = vector.shape_cast %21 : vector<1x4x128xbf16> to vector<4x128xbf16>
    %cst_22 = arith.constant dense<0.000000e+00> : vector<16x128xf32>
    %23 = tpu.matmul %20, %22, %cst_22 {dimension_numbers = #tpu.dot_dimension_numbers<[1], [0], [0], [1], [0, 0, 1, 1], [], []>} : vector<16x4xbf16>, vector<4x128xbf16>, vector<16x128xf32> -> vector<16x128xf32>
    %24 = arith.addf %16, %23 : vector<16x128xf32>
    %c0_i32_23 = arith.constant 0 : i32
    %25 = arith.addi %arg1, %c0_i32_23 : i32
    %c0_24 = arith.constant 0 : index
    %c1_25 = arith.constant 1 : index
    %26 = arith.index_cast %25 : i32 to index
    %c1_26 = arith.constant 1 : index
    %c0_27 = arith.constant 0 : index
    %27 = vector.load %arg2[%c0_24, %c1_25, %26, %c1_26, %c0_27] : memref<1x4x17x17x4xbf16, #tpu.memory_space<vmem>>, vector<1x1x1x16x4xbf16>
    %28 = vector.shape_cast %27 : vector<1x1x1x16x4xbf16> to vector<16x4xbf16>
    %c3 = arith.constant 3 : index
    %c0_28 = arith.constant 0 : index
    %c0_29 = arith.constant 0 : index
    %29 = vector.load %arg3[%c3, %c0_28, %c0_29] : memref<16x4x128xbf16, #tpu.memory_space<vmem>>, vector<1x4x128xbf16>
    %30 = vector.shape_cast %29 : vector<1x4x128xbf16> to vector<4x128xbf16>
    %cst_30 = arith.constant dense<0.000000e+00> : vector<16x128xf32>
    %31 = tpu.matmul %28, %30, %cst_30 {dimension_numbers = #tpu.dot_dimension_numbers<[1], [0], [0], [1], [0, 0, 1, 1], [], []>} : vector<16x4xbf16>, vector<4x128xbf16>, vector<16x128xf32> -> vector<16x128xf32>
    %32 = arith.addf %24, %31 : vector<16x128xf32>
    %c0_i32_31 = arith.constant 0 : i32
    %33 = arith.addi %arg1, %c0_i32_31 : i32
    %c0_32 = arith.constant 0 : index
    %c2_33 = arith.constant 2 : index
    %34 = arith.index_cast %33 : i32 to index
    %c0_34 = arith.constant 0 : index
    %c0_35 = arith.constant 0 : index
    %35 = vector.load %arg2[%c0_32, %c2_33, %34, %c0_34, %c0_35] : memref<1x4x17x17x4xbf16, #tpu.memory_space<vmem>>, vector<1x1x1x16x4xbf16>
    %36 = vector.shape_cast %35 : vector<1x1x1x16x4xbf16> to vector<16x4xbf16>
    %c4 = arith.constant 4 : index
    %c0_36 = arith.constant 0 : index
    %c0_37 = arith.constant 0 : index
    %37 = vector.load %arg3[%c4, %c0_36, %c0_37] : memref<16x4x128xbf16, #tpu.memory_space<vmem>>, vector<1x4x128xbf16>
    %38 = vector.shape_cast %37 : vector<1x4x128xbf16> to vector<4x128xbf16>
    %cst_38 = arith.constant dense<0.000000e+00> : vector<16x128xf32>
    %39 = tpu.matmul %36, %38, %cst_38 {dimension_numbers = #tpu.dot_dimension_numbers<[1], [0], [0], [1], [0, 0, 1, 1], [], []>} : vector<16x4xbf16>, vector<4x128xbf16>, vector<16x128xf32> -> vector<16x128xf32>
    %40 = arith.addf %32, %39 : vector<16x128xf32>
    %c0_i32_39 = arith.constant 0 : i32
    %41 = arith.addi %arg1, %c0_i32_39 : i32
    %c0_40 = arith.constant 0 : index
    %c3_41 = arith.constant 3 : index
    %42 = arith.index_cast %41 : i32 to index
    %c0_42 = arith.constant 0 : index
    %c0_43 = arith.constant 0 : index
    %43 = vector.load %arg2[%c0_40, %c3_41, %42, %c0_42, %c0_43] : memref<1x4x17x17x4xbf16, #tpu.memory_space<vmem>>, vector<1x1x1x16x4xbf16>
    %44 = vector.shape_cast %43 : vector<1x1x1x16x4xbf16> to vector<16x4xbf16>
    %c5 = arith.constant 5 : index
    %c0_44 = arith.constant 0 : index
    %c0_45 = arith.constant 0 : index
    %45 = vector.load %arg3[%c5, %c0_44, %c0_45] : memref<16x4x128xbf16, #tpu.memory_space<vmem>>, vector<1x4x128xbf16>
    %46 = vector.shape_cast %45 : vector<1x4x128xbf16> to vector<4x128xbf16>
    %cst_46 = arith.constant dense<0.000000e+00> : vector<16x128xf32>
    %47 = tpu.matmul %44, %46, %cst_46 {dimension_numbers = #tpu.dot_dimension_numbers<[1], [0], [0], [1], [0, 0, 1, 1], [], []>} : vector<16x4xbf16>, vector<4x128xbf16>, vector<16x128xf32> -> vector<16x128xf32>
    %48 = arith.addf %40, %47 : vector<16x128xf32>
    %c0_i32_47 = arith.constant 0 : i32
    %49 = arith.addi %arg1, %c0_i32_47 : i32
    %c0_48 = arith.constant 0 : index
    %c2_49 = arith.constant 2 : index
    %50 = arith.index_cast %49 : i32 to index
    %c1_50 = arith.constant 1 : index
    %c0_51 = arith.constant 0 : index
    %51 = vector.load %arg2[%c0_48, %c2_49, %50, %c1_50, %c0_51] : memref<1x4x17x17x4xbf16, #tpu.memory_space<vmem>>, vector<1x1x1x16x4xbf16>
    %52 = vector.shape_cast %51 : vector<1x1x1x16x4xbf16> to vector<16x4xbf16>
    %c6 = arith.constant 6 : index
    %c0_52 = arith.constant 0 : index
    %c0_53 = arith.constant 0 : index
    %53 = vector.load %arg3[%c6, %c0_52, %c0_53] : memref<16x4x128xbf16, #tpu.memory_space<vmem>>, vector<1x4x128xbf16>
    %54 = vector.shape_cast %53 : vector<1x4x128xbf16> to vector<4x128xbf16>
    %cst_54 = arith.constant dense<0.000000e+00> : vector<16x128xf32>
    %55 = tpu.matmul %52, %54, %cst_54 {dimension_numbers = #tpu.dot_dimension_numbers<[1], [0], [0], [1], [0, 0, 1, 1], [], []>} : vector<16x4xbf16>, vector<4x128xbf16>, vector<16x128xf32> -> vector<16x128xf32>
    %56 = arith.addf %48, %55 : vector<16x128xf32>
    %c0_i32_55 = arith.constant 0 : i32
    %57 = arith.addi %arg1, %c0_i32_55 : i32
    %c0_56 = arith.constant 0 : index
    %c3_57 = arith.constant 3 : index
    %58 = arith.index_cast %57 : i32 to index
    %c1_58 = arith.constant 1 : index
    %c0_59 = arith.constant 0 : index
    %59 = vector.load %arg2[%c0_56, %c3_57, %58, %c1_58, %c0_59] : memref<1x4x17x17x4xbf16, #tpu.memory_space<vmem>>, vector<1x1x1x16x4xbf16>
    %60 = vector.shape_cast %59 : vector<1x1x1x16x4xbf16> to vector<16x4xbf16>
    %c7 = arith.constant 7 : index
    %c0_60 = arith.constant 0 : index
    %c0_61 = arith.constant 0 : index
    %61 = vector.load %arg3[%c7, %c0_60, %c0_61] : memref<16x4x128xbf16, #tpu.memory_space<vmem>>, vector<1x4x128xbf16>
    %62 = vector.shape_cast %61 : vector<1x4x128xbf16> to vector<4x128xbf16>
    %cst_62 = arith.constant dense<0.000000e+00> : vector<16x128xf32>
    %63 = tpu.matmul %60, %62, %cst_62 {dimension_numbers = #tpu.dot_dimension_numbers<[1], [0], [0], [1], [0, 0, 1, 1], [], []>} : vector<16x4xbf16>, vector<4x128xbf16>, vector<16x128xf32> -> vector<16x128xf32>
    %64 = arith.addf %56, %63 : vector<16x128xf32>
    %c1_i32 = arith.constant 1 : i32
    %65 = arith.addi %arg1, %c1_i32 : i32
    %c0_63 = arith.constant 0 : index
    %c0_64 = arith.constant 0 : index
    %66 = arith.index_cast %65 : i32 to index
    %c0_65 = arith.constant 0 : index
    %c0_66 = arith.constant 0 : index
    %67 = vector.load %arg2[%c0_63, %c0_64, %66, %c0_65, %c0_66] : memref<1x4x17x17x4xbf16, #tpu.memory_space<vmem>>, vector<1x1x1x16x4xbf16>
    %68 = vector.shape_cast %67 : vector<1x1x1x16x4xbf16> to vector<16x4xbf16>
    %c8 = arith.constant 8 : index
    %c0_67 = arith.constant 0 : index
    %c0_68 = arith.constant 0 : index
    %69 = vector.load %arg3[%c8, %c0_67, %c0_68] : memref<16x4x128xbf16, #tpu.memory_space<vmem>>, vector<1x4x128xbf16>
    %70 = vector.shape_cast %69 : vector<1x4x128xbf16> to vector<4x128xbf16>
    %cst_69 = arith.constant dense<0.000000e+00> : vector<16x128xf32>
    %71 = tpu.matmul %68, %70, %cst_69 {dimension_numbers = #tpu.dot_dimension_numbers<[1], [0], [0], [1], [0, 0, 1, 1], [], []>} : vector<16x4xbf16>, vector<4x128xbf16>, vector<16x128xf32> -> vector<16x128xf32>
    %72 = arith.addf %64, %71 : vector<16x128xf32>
    %c1_i32_70 = arith.constant 1 : i32
    %73 = arith.addi %arg1, %c1_i32_70 : i32
    %c0_71 = arith.constant 0 : index
    %c1_72 = arith.constant 1 : index
    %74 = arith.index_cast %73 : i32 to index
    %c0_73 = arith.constant 0 : index
    %c0_74 = arith.constant 0 : index
    %75 = vector.load %arg2[%c0_71, %c1_72, %74, %c0_73, %c0_74] : memref<1x4x17x17x4xbf16, #tpu.memory_space<vmem>>, vector<1x1x1x16x4xbf16>
    %76 = vector.shape_cast %75 : vector<1x1x1x16x4xbf16> to vector<16x4xbf16>
    %c9 = arith.constant 9 : index
    %c0_75 = arith.constant 0 : index
    %c0_76 = arith.constant 0 : index
    %77 = vector.load %arg3[%c9, %c0_75, %c0_76] : memref<16x4x128xbf16, #tpu.memory_space<vmem>>, vector<1x4x128xbf16>
    %78 = vector.shape_cast %77 : vector<1x4x128xbf16> to vector<4x128xbf16>
    %cst_77 = arith.constant dense<0.000000e+00> : vector<16x128xf32>
    %79 = tpu.matmul %76, %78, %cst_77 {dimension_numbers = #tpu.dot_dimension_numbers<[1], [0], [0], [1], [0, 0, 1, 1], [], []>} : vector<16x4xbf16>, vector<4x128xbf16>, vector<16x128xf32> -> vector<16x128xf32>
    %80 = arith.addf %72, %79 : vector<16x128xf32>
    %c1_i32_78 = arith.constant 1 : i32
    %81 = arith.addi %arg1, %c1_i32_78 : i32
    %c0_79 = arith.constant 0 : index
    %c0_80 = arith.constant 0 : index
    %82 = arith.index_cast %81 : i32 to index
    %c1_81 = arith.constant 1 : index
    %c0_82 = arith.constant 0 : index
    %83 = vector.load %arg2[%c0_79, %c0_80, %82, %c1_81, %c0_82] : memref<1x4x17x17x4xbf16, #tpu.memory_space<vmem>>, vector<1x1x1x16x4xbf16>
    %84 = vector.shape_cast %83 : vector<1x1x1x16x4xbf16> to vector<16x4xbf16>
    %c10 = arith.constant 10 : index
    %c0_83 = arith.constant 0 : index
    %c0_84 = arith.constant 0 : index
    %85 = vector.load %arg3[%c10, %c0_83, %c0_84] : memref<16x4x128xbf16, #tpu.memory_space<vmem>>, vector<1x4x128xbf16>
    %86 = vector.shape_cast %85 : vector<1x4x128xbf16> to vector<4x128xbf16>
    %cst_85 = arith.constant dense<0.000000e+00> : vector<16x128xf32>
    %87 = tpu.matmul %84, %86, %cst_85 {dimension_numbers = #tpu.dot_dimension_numbers<[1], [0], [0], [1], [0, 0, 1, 1], [], []>} : vector<16x4xbf16>, vector<4x128xbf16>, vector<16x128xf32> -> vector<16x128xf32>
    %88 = arith.addf %80, %87 : vector<16x128xf32>
    %c1_i32_86 = arith.constant 1 : i32
    %89 = arith.addi %arg1, %c1_i32_86 : i32
    %c0_87 = arith.constant 0 : index
    %c1_88 = arith.constant 1 : index
    %90 = arith.index_cast %89 : i32 to index
    %c1_89 = arith.constant 1 : index
    %c0_90 = arith.constant 0 : index
    %91 = vector.load %arg2[%c0_87, %c1_88, %90, %c1_89, %c0_90] : memref<1x4x17x17x4xbf16, #tpu.memory_space<vmem>>, vector<1x1x1x16x4xbf16>
    %92 = vector.shape_cast %91 : vector<1x1x1x16x4xbf16> to vector<16x4xbf16>
    %c11 = arith.constant 11 : index
    %c0_91 = arith.constant 0 : index
    %c0_92 = arith.constant 0 : index
    %93 = vector.load %arg3[%c11, %c0_91, %c0_92] : memref<16x4x128xbf16, #tpu.memory_space<vmem>>, vector<1x4x128xbf16>
    %94 = vector.shape_cast %93 : vector<1x4x128xbf16> to vector<4x128xbf16>
    %cst_93 = arith.constant dense<0.000000e+00> : vector<16x128xf32>
    %95 = tpu.matmul %92, %94, %cst_93 {dimension_numbers = #tpu.dot_dimension_numbers<[1], [0], [0], [1], [0, 0, 1, 1], [], []>} : vector<16x4xbf16>, vector<4x128xbf16>, vector<16x128xf32> -> vector<16x128xf32>
    %96 = arith.addf %88, %95 : vector<16x128xf32>
    %c1_i32_94 = arith.constant 1 : i32
    %97 = arith.addi %arg1, %c1_i32_94 : i32
    %c0_95 = arith.constant 0 : index
    %c2_96 = arith.constant 2 : index
    %98 = arith.index_cast %97 : i32 to index
    %c0_97 = arith.constant 0 : index
    %c0_98 = arith.constant 0 : index
    %99 = vector.load %arg2[%c0_95, %c2_96, %98, %c0_97, %c0_98] : memref<1x4x17x17x4xbf16, #tpu.memory_space<vmem>>, vector<1x1x1x16x4xbf16>
    %100 = vector.shape_cast %99 : vector<1x1x1x16x4xbf16> to vector<16x4xbf16>
    %c12 = arith.constant 12 : index
    %c0_99 = arith.constant 0 : index
    %c0_100 = arith.constant 0 : index
    %101 = vector.load %arg3[%c12, %c0_99, %c0_100] : memref<16x4x128xbf16, #tpu.memory_space<vmem>>, vector<1x4x128xbf16>
    %102 = vector.shape_cast %101 : vector<1x4x128xbf16> to vector<4x128xbf16>
    %cst_101 = arith.constant dense<0.000000e+00> : vector<16x128xf32>
    %103 = tpu.matmul %100, %102, %cst_101 {dimension_numbers = #tpu.dot_dimension_numbers<[1], [0], [0], [1], [0, 0, 1, 1], [], []>} : vector<16x4xbf16>, vector<4x128xbf16>, vector<16x128xf32> -> vector<16x128xf32>
    %104 = arith.addf %96, %103 : vector<16x128xf32>
    %c1_i32_102 = arith.constant 1 : i32
    %105 = arith.addi %arg1, %c1_i32_102 : i32
    %c0_103 = arith.constant 0 : index
    %c3_104 = arith.constant 3 : index
    %106 = arith.index_cast %105 : i32 to index
    %c0_105 = arith.constant 0 : index
    %c0_106 = arith.constant 0 : index
    %107 = vector.load %arg2[%c0_103, %c3_104, %106, %c0_105, %c0_106] : memref<1x4x17x17x4xbf16, #tpu.memory_space<vmem>>, vector<1x1x1x16x4xbf16>
    %108 = vector.shape_cast %107 : vector<1x1x1x16x4xbf16> to vector<16x4xbf16>
    %c13 = arith.constant 13 : index
    %c0_107 = arith.constant 0 : index
    %c0_108 = arith.constant 0 : index
    %109 = vector.load %arg3[%c13, %c0_107, %c0_108] : memref<16x4x128xbf16, #tpu.memory_space<vmem>>, vector<1x4x128xbf16>
    %110 = vector.shape_cast %109 : vector<1x4x128xbf16> to vector<4x128xbf16>
    %cst_109 = arith.constant dense<0.000000e+00> : vector<16x128xf32>
    %111 = tpu.matmul %108, %110, %cst_109 {dimension_numbers = #tpu.dot_dimension_numbers<[1], [0], [0], [1], [0, 0, 1, 1], [], []>} : vector<16x4xbf16>, vector<4x128xbf16>, vector<16x128xf32> -> vector<16x128xf32>
    %112 = arith.addf %104, %111 : vector<16x128xf32>
    %c1_i32_110 = arith.constant 1 : i32
    %113 = arith.addi %arg1, %c1_i32_110 : i32
    %c0_111 = arith.constant 0 : index
    %c2_112 = arith.constant 2 : index
    %114 = arith.index_cast %113 : i32 to index
    %c1_113 = arith.constant 1 : index
    %c0_114 = arith.constant 0 : index
    %115 = vector.load %arg2[%c0_111, %c2_112, %114, %c1_113, %c0_114] : memref<1x4x17x17x4xbf16, #tpu.memory_space<vmem>>, vector<1x1x1x16x4xbf16>
    %116 = vector.shape_cast %115 : vector<1x1x1x16x4xbf16> to vector<16x4xbf16>
    %c14 = arith.constant 14 : index
    %c0_115 = arith.constant 0 : index
    %c0_116 = arith.constant 0 : index
    %117 = vector.load %arg3[%c14, %c0_115, %c0_116] : memref<16x4x128xbf16, #tpu.memory_space<vmem>>, vector<1x4x128xbf16>
    %118 = vector.shape_cast %117 : vector<1x4x128xbf16> to vector<4x128xbf16>
    %cst_117 = arith.constant dense<0.000000e+00> : vector<16x128xf32>
    %119 = tpu.matmul %116, %118, %cst_117 {dimension_numbers = #tpu.dot_dimension_numbers<[1], [0], [0], [1], [0, 0, 1, 1], [], []>} : vector<16x4xbf16>, vector<4x128xbf16>, vector<16x128xf32> -> vector<16x128xf32>
    %120 = arith.addf %112, %119 : vector<16x128xf32>
    %c1_i32_118 = arith.constant 1 : i32
    %121 = arith.addi %arg1, %c1_i32_118 : i32
    %c0_119 = arith.constant 0 : index
    %c3_120 = arith.constant 3 : index
    %122 = arith.index_cast %121 : i32 to index
    %c1_121 = arith.constant 1 : index
    %c0_122 = arith.constant 0 : index
    %123 = vector.load %arg2[%c0_119, %c3_120, %122, %c1_121, %c0_122] : memref<1x4x17x17x4xbf16, #tpu.memory_space<vmem>>, vector<1x1x1x16x4xbf16>
    %124 = vector.shape_cast %123 : vector<1x1x1x16x4xbf16> to vector<16x4xbf16>
    %c15 = arith.constant 15 : index
    %c0_123 = arith.constant 0 : index
    %c0_124 = arith.constant 0 : index
    %125 = vector.load %arg3[%c15, %c0_123, %c0_124] : memref<16x4x128xbf16, #tpu.memory_space<vmem>>, vector<1x4x128xbf16>
    %126 = vector.shape_cast %125 : vector<1x4x128xbf16> to vector<4x128xbf16>
    %cst_125 = arith.constant dense<0.000000e+00> : vector<16x128xf32>
    %127 = tpu.matmul %124, %126, %cst_125 {dimension_numbers = #tpu.dot_dimension_numbers<[1], [0], [0], [1], [0, 0, 1, 1], [], []>} : vector<16x4xbf16>, vector<4x128xbf16>, vector<16x128xf32> -> vector<16x128xf32>
    %128 = arith.addf %120, %127 : vector<16x128xf32>
    %c0_126 = arith.constant 0 : index
    %c0_127 = arith.constant 0 : index
    %129 = vector.load %arg4[%c0_126, %c0_127] : memref<1x128xf32, #tpu.memory_space<vmem>>, vector<1x128xf32>
    %130 = vector.broadcast %129 : vector<1x128xf32> to vector<16x128xf32>
    %131 = arith.addf %128, %130 : vector<16x128xf32>
    %cst_128 = arith.constant 0.000000e+00 : f32
    %132 = vector.broadcast %cst_128 : f32 to vector<16x128xf32>
    %133 = arith.cmpf ogt, %131, %132 : vector<16x128xf32>
    %cst_129 = arith.constant 2.000000e-01 : f32
    %134 = vector.broadcast %cst_129 : f32 to vector<16x128xf32>
    %135 = arith.mulf %134, %131 : vector<16x128xf32>
    %136 = arith.select %133, %131, %135 : vector<16x128xi1>, vector<16x128xf32>
    %137 = arith.truncf %136 : vector<16x128xf32> to vector<16x128xbf16>
    %c0_130 = arith.constant 0 : index
    %c0_131 = arith.constant 0 : index
    %c0_132 = arith.constant 0 : index
    %c0_133 = arith.constant 0 : index
    %138 = vector.load %arg5[%c0_130, %c0_131, %c0_132, %c0_133] : memref<1x1x16x128xbf16, #tpu.memory_space<vmem>>, vector<1x1x16x128xbf16>
    %139 = vector.shape_cast %138 : vector<1x1x16x128xbf16> to vector<16x128xbf16>
    %140 = vector.shape_cast %137 : vector<16x128xbf16> to vector<1x1x16x128xbf16>
    tpu.vector_store %arg5[%c0_130, %c0_131, %c0_132, %c0_133], %140 {strides = array<i32>} : memref<1x1x16x128xbf16, #tpu.memory_space<vmem>>, vector<1x1x16x128xbf16>,
    return
  }
  func.func @transform_0(%arg0: i32, %arg1: i32) -> (i32, i32, i32, i32, i32) {
    %c0_i32 = arith.constant 0 : i32
    %c0_i32_0 = arith.constant 0 : i32
    %c0_i32_1 = arith.constant 0 : i32
    %c0_i32_2 = arith.constant 0 : i32
    %c0_i32_3 = arith.constant 0 : i32
    return %arg0, %c0_i32, %c0_i32_0, %c0_i32_1, %c0_i32_2 : i32, i32, i32, i32, i32
  }
  func.func @transform_1(%arg0: i32, %arg1: i32) -> (i32, i32, i32) {
    %c0_i32 = arith.constant 0 : i32
    %c0_i32_0 = arith.constant 0 : i32
    %c0_i32_1 = arith.constant 0 : i32
    %c0_i32_2 = arith.constant 0 : i32
    return %c0_i32, %c0_i32_0, %c0_i32_1 : i32, i32, i32
  }
  func.func @transform_2(%arg0: i32, %arg1: i32) -> (i32, i32) {
    %c0_i32 = arith.constant 0 : i32
    %c0_i32_0 = arith.constant 0 : i32
    %c0_i32_1 = arith.constant 0 : i32
    return %c0_i32, %c0_i32_0 : i32, i32
  }
  func.func @transform_3(%arg0: i32, %arg1: i32) -> (i32, i32, i32, i32) {
    %c0_i32 = arith.constant 0 : i32
    %c0_i32_0 = arith.constant 0 : i32
    %c0_i32_1 = arith.constant 0 : i32
    return %arg0, %arg1, %c0_i32, %c0_i32_0 : i32, i32, i32, i32
  }
}

module attributes {stable_mosaic.version = 11 : i64} {
  func.func @kernel(%arg0: i32, %arg1: i32, %arg2: memref<1x4x9x9x8xbf16, #tpu.memory_space<vmem>>, %arg3: memref<16x8x128xbf16, #tpu.memory_space<vmem>>, %arg4: memref<1x1x8x128xf32, #tpu.memory_space<vmem>>, %arg5: memref<1x1x2x128xf32, #tpu.memory_space<vmem>>) attributes {dimension_semantics = [#tpu.dimension_semantics<parallel>, #tpu.dimension_semantics<parallel>], iteration_bounds = array<i64: 2, 8>, scalar_prefetch = 0 : i64, scratch_operands = 0 : i64, tpu.core_type = #tpu.core_type<tc>, window_params = [{transform_indices = @transform_0, window_bounds = array<i64: 1, 4, 9, 9, 8>}, {pipeline_mode = #tpu.pipeline_mode<synchronous>, transform_indices = @transform_1, window_bounds = array<i64: 16, 8, 128>}, {transform_indices = @transform_2, window_bounds = array<i64: 1, 1, 8, 128>}, {transform_indices = @transform_3, window_bounds = array<i64: 1, 1, 2, 128>}]} {
    %cst = arith.constant 0.000000e+00 : f32
    %0 = vector.broadcast %cst : f32 to vector<8x128xf32>
    %c0_i32 = arith.constant 0 : i32
    %1 = arith.addi %arg1, %c0_i32 : i32
    %c0 = arith.constant 0 : index
    %c0_0 = arith.constant 0 : index
    %2 = arith.index_cast %1 : i32 to index
    %c0_1 = arith.constant 0 : index
    %c0_2 = arith.constant 0 : index
    %3 = vector.load %arg2[%c0, %c0_0, %2, %c0_1, %c0_2] : memref<1x4x9x9x8xbf16, #tpu.memory_space<vmem>>, vector<1x1x1x8x8xbf16>
    %4 = vector.shape_cast %3 : vector<1x1x1x8x8xbf16> to vector<8x8xbf16>
    %c0_3 = arith.constant 0 : index
    %c0_4 = arith.constant 0 : index
    %c0_5 = arith.constant 0 : index
    %5 = vector.load %arg3[%c0_3, %c0_4, %c0_5] : memref<16x8x128xbf16, #tpu.memory_space<vmem>>, vector<1x8x128xbf16>
    %6 = vector.shape_cast %5 : vector<1x8x128xbf16> to vector<8x128xbf16>
    %cst_6 = arith.constant dense<0.000000e+00> : vector<8x128xf32>
    %7 = tpu.matmul %4, %6, %cst_6 {dimension_numbers = #tpu.dot_dimension_numbers<[1], [0], [0], [1], [0, 0, 1, 1], [], []>} : vector<8x8xbf16>, vector<8x128xbf16>, vector<8x128xf32> -> vector<8x128xf32>
    %8 = arith.addf %0, %7 : vector<8x128xf32>
    %c0_i32_7 = arith.constant 0 : i32
    %9 = arith.addi %arg1, %c0_i32_7 : i32
    %c0_8 = arith.constant 0 : index
    %c1 = arith.constant 1 : index
    %10 = arith.index_cast %9 : i32 to index
    %c0_9 = arith.constant 0 : index
    %c0_10 = arith.constant 0 : index
    %11 = vector.load %arg2[%c0_8, %c1, %10, %c0_9, %c0_10] : memref<1x4x9x9x8xbf16, #tpu.memory_space<vmem>>, vector<1x1x1x8x8xbf16>
    %12 = vector.shape_cast %11 : vector<1x1x1x8x8xbf16> to vector<8x8xbf16>
    %c1_11 = arith.constant 1 : index
    %c0_12 = arith.constant 0 : index
    %c0_13 = arith.constant 0 : index
    %13 = vector.load %arg3[%c1_11, %c0_12, %c0_13] : memref<16x8x128xbf16, #tpu.memory_space<vmem>>, vector<1x8x128xbf16>
    %14 = vector.shape_cast %13 : vector<1x8x128xbf16> to vector<8x128xbf16>
    %cst_14 = arith.constant dense<0.000000e+00> : vector<8x128xf32>
    %15 = tpu.matmul %12, %14, %cst_14 {dimension_numbers = #tpu.dot_dimension_numbers<[1], [0], [0], [1], [0, 0, 1, 1], [], []>} : vector<8x8xbf16>, vector<8x128xbf16>, vector<8x128xf32> -> vector<8x128xf32>
    %16 = arith.addf %8, %15 : vector<8x128xf32>
    %c0_i32_15 = arith.constant 0 : i32
    %17 = arith.addi %arg1, %c0_i32_15 : i32
    %c0_16 = arith.constant 0 : index
    %c0_17 = arith.constant 0 : index
    %18 = arith.index_cast %17 : i32 to index
    %c1_18 = arith.constant 1 : index
    %c0_19 = arith.constant 0 : index
    %19 = vector.load %arg2[%c0_16, %c0_17, %18, %c1_18, %c0_19] : memref<1x4x9x9x8xbf16, #tpu.memory_space<vmem>>, vector<1x1x1x8x8xbf16>
    %20 = vector.shape_cast %19 : vector<1x1x1x8x8xbf16> to vector<8x8xbf16>
    %c2 = arith.constant 2 : index
    %c0_20 = arith.constant 0 : index
    %c0_21 = arith.constant 0 : index
    %21 = vector.load %arg3[%c2, %c0_20, %c0_21] : memref<16x8x128xbf16, #tpu.memory_space<vmem>>, vector<1x8x128xbf16>
    %22 = vector.shape_cast %21 : vector<1x8x128xbf16> to vector<8x128xbf16>
    %cst_22 = arith.constant dense<0.000000e+00> : vector<8x128xf32>
    %23 = tpu.matmul %20, %22, %cst_22 {dimension_numbers = #tpu.dot_dimension_numbers<[1], [0], [0], [1], [0, 0, 1, 1], [], []>} : vector<8x8xbf16>, vector<8x128xbf16>, vector<8x128xf32> -> vector<8x128xf32>
    %24 = arith.addf %16, %23 : vector<8x128xf32>
    %c0_i32_23 = arith.constant 0 : i32
    %25 = arith.addi %arg1, %c0_i32_23 : i32
    %c0_24 = arith.constant 0 : index
    %c1_25 = arith.constant 1 : index
    %26 = arith.index_cast %25 : i32 to index
    %c1_26 = arith.constant 1 : index
    %c0_27 = arith.constant 0 : index
    %27 = vector.load %arg2[%c0_24, %c1_25, %26, %c1_26, %c0_27] : memref<1x4x9x9x8xbf16, #tpu.memory_space<vmem>>, vector<1x1x1x8x8xbf16>
    %28 = vector.shape_cast %27 : vector<1x1x1x8x8xbf16> to vector<8x8xbf16>
    %c3 = arith.constant 3 : index
    %c0_28 = arith.constant 0 : index
    %c0_29 = arith.constant 0 : index
    %29 = vector.load %arg3[%c3, %c0_28, %c0_29] : memref<16x8x128xbf16, #tpu.memory_space<vmem>>, vector<1x8x128xbf16>
    %30 = vector.shape_cast %29 : vector<1x8x128xbf16> to vector<8x128xbf16>
    %cst_30 = arith.constant dense<0.000000e+00> : vector<8x128xf32>
    %31 = tpu.matmul %28, %30, %cst_30 {dimension_numbers = #tpu.dot_dimension_numbers<[1], [0], [0], [1], [0, 0, 1, 1], [], []>} : vector<8x8xbf16>, vector<8x128xbf16>, vector<8x128xf32> -> vector<8x128xf32>
    %32 = arith.addf %24, %31 : vector<8x128xf32>
    %c0_i32_31 = arith.constant 0 : i32
    %33 = arith.addi %arg1, %c0_i32_31 : i32
    %c0_32 = arith.constant 0 : index
    %c2_33 = arith.constant 2 : index
    %34 = arith.index_cast %33 : i32 to index
    %c0_34 = arith.constant 0 : index
    %c0_35 = arith.constant 0 : index
    %35 = vector.load %arg2[%c0_32, %c2_33, %34, %c0_34, %c0_35] : memref<1x4x9x9x8xbf16, #tpu.memory_space<vmem>>, vector<1x1x1x8x8xbf16>
    %36 = vector.shape_cast %35 : vector<1x1x1x8x8xbf16> to vector<8x8xbf16>
    %c4 = arith.constant 4 : index
    %c0_36 = arith.constant 0 : index
    %c0_37 = arith.constant 0 : index
    %37 = vector.load %arg3[%c4, %c0_36, %c0_37] : memref<16x8x128xbf16, #tpu.memory_space<vmem>>, vector<1x8x128xbf16>
    %38 = vector.shape_cast %37 : vector<1x8x128xbf16> to vector<8x128xbf16>
    %cst_38 = arith.constant dense<0.000000e+00> : vector<8x128xf32>
    %39 = tpu.matmul %36, %38, %cst_38 {dimension_numbers = #tpu.dot_dimension_numbers<[1], [0], [0], [1], [0, 0, 1, 1], [], []>} : vector<8x8xbf16>, vector<8x128xbf16>, vector<8x128xf32> -> vector<8x128xf32>
    %40 = arith.addf %32, %39 : vector<8x128xf32>
    %c0_i32_39 = arith.constant 0 : i32
    %41 = arith.addi %arg1, %c0_i32_39 : i32
    %c0_40 = arith.constant 0 : index
    %c3_41 = arith.constant 3 : index
    %42 = arith.index_cast %41 : i32 to index
    %c0_42 = arith.constant 0 : index
    %c0_43 = arith.constant 0 : index
    %43 = vector.load %arg2[%c0_40, %c3_41, %42, %c0_42, %c0_43] : memref<1x4x9x9x8xbf16, #tpu.memory_space<vmem>>, vector<1x1x1x8x8xbf16>
    %44 = vector.shape_cast %43 : vector<1x1x1x8x8xbf16> to vector<8x8xbf16>
    %c5 = arith.constant 5 : index
    %c0_44 = arith.constant 0 : index
    %c0_45 = arith.constant 0 : index
    %45 = vector.load %arg3[%c5, %c0_44, %c0_45] : memref<16x8x128xbf16, #tpu.memory_space<vmem>>, vector<1x8x128xbf16>
    %46 = vector.shape_cast %45 : vector<1x8x128xbf16> to vector<8x128xbf16>
    %cst_46 = arith.constant dense<0.000000e+00> : vector<8x128xf32>
    %47 = tpu.matmul %44, %46, %cst_46 {dimension_numbers = #tpu.dot_dimension_numbers<[1], [0], [0], [1], [0, 0, 1, 1], [], []>} : vector<8x8xbf16>, vector<8x128xbf16>, vector<8x128xf32> -> vector<8x128xf32>
    %48 = arith.addf %40, %47 : vector<8x128xf32>
    %c0_i32_47 = arith.constant 0 : i32
    %49 = arith.addi %arg1, %c0_i32_47 : i32
    %c0_48 = arith.constant 0 : index
    %c2_49 = arith.constant 2 : index
    %50 = arith.index_cast %49 : i32 to index
    %c1_50 = arith.constant 1 : index
    %c0_51 = arith.constant 0 : index
    %51 = vector.load %arg2[%c0_48, %c2_49, %50, %c1_50, %c0_51] : memref<1x4x9x9x8xbf16, #tpu.memory_space<vmem>>, vector<1x1x1x8x8xbf16>
    %52 = vector.shape_cast %51 : vector<1x1x1x8x8xbf16> to vector<8x8xbf16>
    %c6 = arith.constant 6 : index
    %c0_52 = arith.constant 0 : index
    %c0_53 = arith.constant 0 : index
    %53 = vector.load %arg3[%c6, %c0_52, %c0_53] : memref<16x8x128xbf16, #tpu.memory_space<vmem>>, vector<1x8x128xbf16>
    %54 = vector.shape_cast %53 : vector<1x8x128xbf16> to vector<8x128xbf16>
    %cst_54 = arith.constant dense<0.000000e+00> : vector<8x128xf32>
    %55 = tpu.matmul %52, %54, %cst_54 {dimension_numbers = #tpu.dot_dimension_numbers<[1], [0], [0], [1], [0, 0, 1, 1], [], []>} : vector<8x8xbf16>, vector<8x128xbf16>, vector<8x128xf32> -> vector<8x128xf32>
    %56 = arith.addf %48, %55 : vector<8x128xf32>
    %c0_i32_55 = arith.constant 0 : i32
    %57 = arith.addi %arg1, %c0_i32_55 : i32
    %c0_56 = arith.constant 0 : index
    %c3_57 = arith.constant 3 : index
    %58 = arith.index_cast %57 : i32 to index
    %c1_58 = arith.constant 1 : index
    %c0_59 = arith.constant 0 : index
    %59 = vector.load %arg2[%c0_56, %c3_57, %58, %c1_58, %c0_59] : memref<1x4x9x9x8xbf16, #tpu.memory_space<vmem>>, vector<1x1x1x8x8xbf16>
    %60 = vector.shape_cast %59 : vector<1x1x1x8x8xbf16> to vector<8x8xbf16>
    %c7 = arith.constant 7 : index
    %c0_60 = arith.constant 0 : index
    %c0_61 = arith.constant 0 : index
    %61 = vector.load %arg3[%c7, %c0_60, %c0_61] : memref<16x8x128xbf16, #tpu.memory_space<vmem>>, vector<1x8x128xbf16>
    %62 = vector.shape_cast %61 : vector<1x8x128xbf16> to vector<8x128xbf16>
    %cst_62 = arith.constant dense<0.000000e+00> : vector<8x128xf32>
    %63 = tpu.matmul %60, %62, %cst_62 {dimension_numbers = #tpu.dot_dimension_numbers<[1], [0], [0], [1], [0, 0, 1, 1], [], []>} : vector<8x8xbf16>, vector<8x128xbf16>, vector<8x128xf32> -> vector<8x128xf32>
    %64 = arith.addf %56, %63 : vector<8x128xf32>
    %c1_i32 = arith.constant 1 : i32
    %65 = arith.addi %arg1, %c1_i32 : i32
    %c0_63 = arith.constant 0 : index
    %c0_64 = arith.constant 0 : index
    %66 = arith.index_cast %65 : i32 to index
    %c0_65 = arith.constant 0 : index
    %c0_66 = arith.constant 0 : index
    %67 = vector.load %arg2[%c0_63, %c0_64, %66, %c0_65, %c0_66] : memref<1x4x9x9x8xbf16, #tpu.memory_space<vmem>>, vector<1x1x1x8x8xbf16>
    %68 = vector.shape_cast %67 : vector<1x1x1x8x8xbf16> to vector<8x8xbf16>
    %c8 = arith.constant 8 : index
    %c0_67 = arith.constant 0 : index
    %c0_68 = arith.constant 0 : index
    %69 = vector.load %arg3[%c8, %c0_67, %c0_68] : memref<16x8x128xbf16, #tpu.memory_space<vmem>>, vector<1x8x128xbf16>
    %70 = vector.shape_cast %69 : vector<1x8x128xbf16> to vector<8x128xbf16>
    %cst_69 = arith.constant dense<0.000000e+00> : vector<8x128xf32>
    %71 = tpu.matmul %68, %70, %cst_69 {dimension_numbers = #tpu.dot_dimension_numbers<[1], [0], [0], [1], [0, 0, 1, 1], [], []>} : vector<8x8xbf16>, vector<8x128xbf16>, vector<8x128xf32> -> vector<8x128xf32>
    %72 = arith.addf %64, %71 : vector<8x128xf32>
    %c1_i32_70 = arith.constant 1 : i32
    %73 = arith.addi %arg1, %c1_i32_70 : i32
    %c0_71 = arith.constant 0 : index
    %c1_72 = arith.constant 1 : index
    %74 = arith.index_cast %73 : i32 to index
    %c0_73 = arith.constant 0 : index
    %c0_74 = arith.constant 0 : index
    %75 = vector.load %arg2[%c0_71, %c1_72, %74, %c0_73, %c0_74] : memref<1x4x9x9x8xbf16, #tpu.memory_space<vmem>>, vector<1x1x1x8x8xbf16>
    %76 = vector.shape_cast %75 : vector<1x1x1x8x8xbf16> to vector<8x8xbf16>
    %c9 = arith.constant 9 : index
    %c0_75 = arith.constant 0 : index
    %c0_76 = arith.constant 0 : index
    %77 = vector.load %arg3[%c9, %c0_75, %c0_76] : memref<16x8x128xbf16, #tpu.memory_space<vmem>>, vector<1x8x128xbf16>
    %78 = vector.shape_cast %77 : vector<1x8x128xbf16> to vector<8x128xbf16>
    %cst_77 = arith.constant dense<0.000000e+00> : vector<8x128xf32>
    %79 = tpu.matmul %76, %78, %cst_77 {dimension_numbers = #tpu.dot_dimension_numbers<[1], [0], [0], [1], [0, 0, 1, 1], [], []>} : vector<8x8xbf16>, vector<8x128xbf16>, vector<8x128xf32> -> vector<8x128xf32>
    %80 = arith.addf %72, %79 : vector<8x128xf32>
    %c1_i32_78 = arith.constant 1 : i32
    %81 = arith.addi %arg1, %c1_i32_78 : i32
    %c0_79 = arith.constant 0 : index
    %c0_80 = arith.constant 0 : index
    %82 = arith.index_cast %81 : i32 to index
    %c1_81 = arith.constant 1 : index
    %c0_82 = arith.constant 0 : index
    %83 = vector.load %arg2[%c0_79, %c0_80, %82, %c1_81, %c0_82] : memref<1x4x9x9x8xbf16, #tpu.memory_space<vmem>>, vector<1x1x1x8x8xbf16>
    %84 = vector.shape_cast %83 : vector<1x1x1x8x8xbf16> to vector<8x8xbf16>
    %c10 = arith.constant 10 : index
    %c0_83 = arith.constant 0 : index
    %c0_84 = arith.constant 0 : index
    %85 = vector.load %arg3[%c10, %c0_83, %c0_84] : memref<16x8x128xbf16, #tpu.memory_space<vmem>>, vector<1x8x128xbf16>
    %86 = vector.shape_cast %85 : vector<1x8x128xbf16> to vector<8x128xbf16>
    %cst_85 = arith.constant dense<0.000000e+00> : vector<8x128xf32>
    %87 = tpu.matmul %84, %86, %cst_85 {dimension_numbers = #tpu.dot_dimension_numbers<[1], [0], [0], [1], [0, 0, 1, 1], [], []>} : vector<8x8xbf16>, vector<8x128xbf16>, vector<8x128xf32> -> vector<8x128xf32>
    %88 = arith.addf %80, %87 : vector<8x128xf32>
    %c1_i32_86 = arith.constant 1 : i32
    %89 = arith.addi %arg1, %c1_i32_86 : i32
    %c0_87 = arith.constant 0 : index
    %c1_88 = arith.constant 1 : index
    %90 = arith.index_cast %89 : i32 to index
    %c1_89 = arith.constant 1 : index
    %c0_90 = arith.constant 0 : index
    %91 = vector.load %arg2[%c0_87, %c1_88, %90, %c1_89, %c0_90] : memref<1x4x9x9x8xbf16, #tpu.memory_space<vmem>>, vector<1x1x1x8x8xbf16>
    %92 = vector.shape_cast %91 : vector<1x1x1x8x8xbf16> to vector<8x8xbf16>
    %c11 = arith.constant 11 : index
    %c0_91 = arith.constant 0 : index
    %c0_92 = arith.constant 0 : index
    %93 = vector.load %arg3[%c11, %c0_91, %c0_92] : memref<16x8x128xbf16, #tpu.memory_space<vmem>>, vector<1x8x128xbf16>
    %94 = vector.shape_cast %93 : vector<1x8x128xbf16> to vector<8x128xbf16>
    %cst_93 = arith.constant dense<0.000000e+00> : vector<8x128xf32>
    %95 = tpu.matmul %92, %94, %cst_93 {dimension_numbers = #tpu.dot_dimension_numbers<[1], [0], [0], [1], [0, 0, 1, 1], [], []>} : vector<8x8xbf16>, vector<8x128xbf16>, vector<8x128xf32> -> vector<8x128xf32>
    %96 = arith.addf %88, %95 : vector<8x128xf32>
    %c1_i32_94 = arith.constant 1 : i32
    %97 = arith.addi %arg1, %c1_i32_94 : i32
    %c0_95 = arith.constant 0 : index
    %c2_96 = arith.constant 2 : index
    %98 = arith.index_cast %97 : i32 to index
    %c0_97 = arith.constant 0 : index
    %c0_98 = arith.constant 0 : index
    %99 = vector.load %arg2[%c0_95, %c2_96, %98, %c0_97, %c0_98] : memref<1x4x9x9x8xbf16, #tpu.memory_space<vmem>>, vector<1x1x1x8x8xbf16>
    %100 = vector.shape_cast %99 : vector<1x1x1x8x8xbf16> to vector<8x8xbf16>
    %c12 = arith.constant 12 : index
    %c0_99 = arith.constant 0 : index
    %c0_100 = arith.constant 0 : index
    %101 = vector.load %arg3[%c12, %c0_99, %c0_100] : memref<16x8x128xbf16, #tpu.memory_space<vmem>>, vector<1x8x128xbf16>
    %102 = vector.shape_cast %101 : vector<1x8x128xbf16> to vector<8x128xbf16>
    %cst_101 = arith.constant dense<0.000000e+00> : vector<8x128xf32>
    %103 = tpu.matmul %100, %102, %cst_101 {dimension_numbers = #tpu.dot_dimension_numbers<[1], [0], [0], [1], [0, 0, 1, 1], [], []>} : vector<8x8xbf16>, vector<8x128xbf16>, vector<8x128xf32> -> vector<8x128xf32>
    %104 = arith.addf %96, %103 : vector<8x128xf32>
    %c1_i32_102 = arith.constant 1 : i32
    %105 = arith.addi %arg1, %c1_i32_102 : i32
    %c0_103 = arith.constant 0 : index
    %c3_104 = arith.constant 3 : index
    %106 = arith.index_cast %105 : i32 to index
    %c0_105 = arith.constant 0 : index
    %c0_106 = arith.constant 0 : index
    %107 = vector.load %arg2[%c0_103, %c3_104, %106, %c0_105, %c0_106] : memref<1x4x9x9x8xbf16, #tpu.memory_space<vmem>>, vector<1x1x1x8x8xbf16>
    %108 = vector.shape_cast %107 : vector<1x1x1x8x8xbf16> to vector<8x8xbf16>
    %c13 = arith.constant 13 : index
    %c0_107 = arith.constant 0 : index
    %c0_108 = arith.constant 0 : index
    %109 = vector.load %arg3[%c13, %c0_107, %c0_108] : memref<16x8x128xbf16, #tpu.memory_space<vmem>>, vector<1x8x128xbf16>
    %110 = vector.shape_cast %109 : vector<1x8x128xbf16> to vector<8x128xbf16>
    %cst_109 = arith.constant dense<0.000000e+00> : vector<8x128xf32>
    %111 = tpu.matmul %108, %110, %cst_109 {dimension_numbers = #tpu.dot_dimension_numbers<[1], [0], [0], [1], [0, 0, 1, 1], [], []>} : vector<8x8xbf16>, vector<8x128xbf16>, vector<8x128xf32> -> vector<8x128xf32>
    %112 = arith.addf %104, %111 : vector<8x128xf32>
    %c1_i32_110 = arith.constant 1 : i32
    %113 = arith.addi %arg1, %c1_i32_110 : i32
    %c0_111 = arith.constant 0 : index
    %c2_112 = arith.constant 2 : index
    %114 = arith.index_cast %113 : i32 to index
    %c1_113 = arith.constant 1 : index
    %c0_114 = arith.constant 0 : index
    %115 = vector.load %arg2[%c0_111, %c2_112, %114, %c1_113, %c0_114] : memref<1x4x9x9x8xbf16, #tpu.memory_space<vmem>>, vector<1x1x1x8x8xbf16>
    %116 = vector.shape_cast %115 : vector<1x1x1x8x8xbf16> to vector<8x8xbf16>
    %c14 = arith.constant 14 : index
    %c0_115 = arith.constant 0 : index
    %c0_116 = arith.constant 0 : index
    %117 = vector.load %arg3[%c14, %c0_115, %c0_116] : memref<16x8x128xbf16, #tpu.memory_space<vmem>>, vector<1x8x128xbf16>
    %118 = vector.shape_cast %117 : vector<1x8x128xbf16> to vector<8x128xbf16>
    %cst_117 = arith.constant dense<0.000000e+00> : vector<8x128xf32>
    %119 = tpu.matmul %116, %118, %cst_117 {dimension_numbers = #tpu.dot_dimension_numbers<[1], [0], [0], [1], [0, 0, 1, 1], [], []>} : vector<8x8xbf16>, vector<8x128xbf16>, vector<8x128xf32> -> vector<8x128xf32>
    %120 = arith.addf %112, %119 : vector<8x128xf32>
    %c1_i32_118 = arith.constant 1 : i32
    %121 = arith.addi %arg1, %c1_i32_118 : i32
    %c0_119 = arith.constant 0 : index
    %c3_120 = arith.constant 3 : index
    %122 = arith.index_cast %121 : i32 to index
    %c1_121 = arith.constant 1 : index
    %c0_122 = arith.constant 0 : index
    %123 = vector.load %arg2[%c0_119, %c3_120, %122, %c1_121, %c0_122] : memref<1x4x9x9x8xbf16, #tpu.memory_space<vmem>>, vector<1x1x1x8x8xbf16>
    %124 = vector.shape_cast %123 : vector<1x1x1x8x8xbf16> to vector<8x8xbf16>
    %c15 = arith.constant 15 : index
    %c0_123 = arith.constant 0 : index
    %c0_124 = arith.constant 0 : index
    %125 = vector.load %arg3[%c15, %c0_123, %c0_124] : memref<16x8x128xbf16, #tpu.memory_space<vmem>>, vector<1x8x128xbf16>
    %126 = vector.shape_cast %125 : vector<1x8x128xbf16> to vector<8x128xbf16>
    %cst_125 = arith.constant dense<0.000000e+00> : vector<8x128xf32>
    %127 = tpu.matmul %124, %126, %cst_125 {dimension_numbers = #tpu.dot_dimension_numbers<[1], [0], [0], [1], [0, 0, 1, 1], [], []>} : vector<8x8xbf16>, vector<8x128xbf16>, vector<8x128xf32> -> vector<8x128xf32>
    %128 = arith.addf %120, %127 : vector<8x128xf32>
    %cst_126 = arith.constant dense<0.000000e+00> : vector<128xf32>
    %129 = vector.multi_reduction <add>, %128, %cst_126 [0] : vector<8x128xf32> to vector<128xf32>
    %130 = vector.shape_cast %129 : vector<128xf32> to vector<1x128xf32>
    %131 = arith.mulf %128, %128 : vector<8x128xf32>
    %cst_127 = arith.constant dense<0.000000e+00> : vector<128xf32>
    %132 = vector.multi_reduction <add>, %131, %cst_127 [0] : vector<8x128xf32> to vector<128xf32>
    %133 = vector.shape_cast %132 : vector<128xf32> to vector<1x128xf32>
    %134 = tpu.concatenate %130, %133 in 0 : vector<1x128xf32>, vector<1x128xf32> -> vector<2x128xf32>
    %c0_128 = arith.constant 0 : index
    %c0_129 = arith.constant 0 : index
    %c0_130 = arith.constant 0 : index
    %c0_131 = arith.constant 0 : index
    %135 = vector.load %arg5[%c0_128, %c0_129, %c0_130, %c0_131] : memref<1x1x2x128xf32, #tpu.memory_space<vmem>>, vector<1x1x2x128xf32>
    %136 = vector.shape_cast %135 : vector<1x1x2x128xf32> to vector<2x128xf32>
    %137 = vector.shape_cast %134 : vector<2x128xf32> to vector<1x1x2x128xf32>
    tpu.vector_store %arg5[%c0_128, %c0_129, %c0_130, %c0_131], %137 {strides = array<i32>} : memref<1x1x2x128xf32, #tpu.memory_space<vmem>>, vector<1x1x2x128xf32>,
    %c0_132 = arith.constant 0 : index
    %c0_133 = arith.constant 0 : index
    %c0_134 = arith.constant 0 : index
    %c0_135 = arith.constant 0 : index
    %138 = vector.load %arg4[%c0_132, %c0_133, %c0_134, %c0_135] : memref<1x1x8x128xf32, #tpu.memory_space<vmem>>, vector<1x1x8x128xf32>
    %139 = vector.shape_cast %138 : vector<1x1x8x128xf32> to vector<8x128xf32>
    %140 = vector.shape_cast %128 : vector<8x128xf32> to vector<1x1x8x128xf32>
    tpu.vector_store %arg4[%c0_132, %c0_133, %c0_134, %c0_135], %140 {strides = array<i32>} : memref<1x1x8x128xf32, #tpu.memory_space<vmem>>, vector<1x1x8x128xf32>,
    return
  }
  func.func @transform_0(%arg0: i32, %arg1: i32) -> (i32, i32, i32, i32, i32) {
    %c0_i32 = arith.constant 0 : i32
    %c0_i32_0 = arith.constant 0 : i32
    %c0_i32_1 = arith.constant 0 : i32
    %c0_i32_2 = arith.constant 0 : i32
    %c0_i32_3 = arith.constant 0 : i32
    return %arg0, %c0_i32, %c0_i32_0, %c0_i32_1, %c0_i32_2 : i32, i32, i32, i32, i32
  }
  func.func @transform_1(%arg0: i32, %arg1: i32) -> (i32, i32, i32) {
    %c0_i32 = arith.constant 0 : i32
    %c0_i32_0 = arith.constant 0 : i32
    %c0_i32_1 = arith.constant 0 : i32
    %c0_i32_2 = arith.constant 0 : i32
    return %c0_i32, %c0_i32_0, %c0_i32_1 : i32, i32, i32
  }
  func.func @transform_2(%arg0: i32, %arg1: i32) -> (i32, i32, i32, i32) {
    %c0_i32 = arith.constant 0 : i32
    %c0_i32_0 = arith.constant 0 : i32
    %c0_i32_1 = arith.constant 0 : i32
    return %arg0, %arg1, %c0_i32, %c0_i32_0 : i32, i32, i32, i32
  }
  func.func @transform_3(%arg0: i32, %arg1: i32) -> (i32, i32, i32, i32) {
    %c0_i32 = arith.constant 0 : i32
    %c0_i32_0 = arith.constant 0 : i32
    %c0_i32_1 = arith.constant 0 : i32
    return %arg0, %arg1, %c0_i32, %c0_i32_0 : i32, i32, i32, i32
  }
}

module attributes {stable_mosaic.version = 11 : i64} {
  func.func @kernel(%arg0: i32, %arg1: i32, %arg2: memref<1x8x8x128xf32, #tpu.memory_space<vmem>>, %arg3: memref<1x1x1x128xf32, #tpu.memory_space<vmem>>, %arg4: memref<1x1x1x128xf32, #tpu.memory_space<vmem>>, %arg5: memref<1x8x8x128xbf16, #tpu.memory_space<vmem>>) attributes {dimension_semantics = [#tpu.dimension_semantics<parallel>, #tpu.dimension_semantics<parallel>], iteration_bounds = array<i64: 2, 1>, scalar_prefetch = 0 : i64, scratch_operands = 0 : i64, tpu.core_type = #tpu.core_type<tc>, window_params = [{transform_indices = @transform_0, window_bounds = array<i64: 1, 8, 8, 128>}, {pipeline_mode = #tpu.pipeline_mode<synchronous>, transform_indices = @transform_1, window_bounds = array<i64: 1, 1, 1, 128>}, {pipeline_mode = #tpu.pipeline_mode<synchronous>, transform_indices = @transform_2, window_bounds = array<i64: 1, 1, 1, 128>}, {transform_indices = @transform_3, window_bounds = array<i64: 1, 8, 8, 128>}]} {
    %c0 = arith.constant 0 : index
    %c0_0 = arith.constant 0 : index
    %c0_1 = arith.constant 0 : index
    %c0_2 = arith.constant 0 : index
    %0 = vector.load %arg2[%c0, %c0_0, %c0_1, %c0_2] : memref<1x8x8x128xf32, #tpu.memory_space<vmem>>, vector<1x8x8x128xf32>
    %c0_3 = arith.constant 0 : index
    %c0_4 = arith.constant 0 : index
    %c0_5 = arith.constant 0 : index
    %c0_6 = arith.constant 0 : index
    %1 = vector.load %arg3[%c0_3, %c0_4, %c0_5, %c0_6] : memref<1x1x1x128xf32, #tpu.memory_space<vmem>>, vector<1x1x1x128xf32>
    %2 = vector.broadcast %1 : vector<1x1x1x128xf32> to vector<1x8x8x128xf32>
    %3 = arith.mulf %0, %2 : vector<1x8x8x128xf32>
    %c0_7 = arith.constant 0 : index
    %c0_8 = arith.constant 0 : index
    %c0_9 = arith.constant 0 : index
    %c0_10 = arith.constant 0 : index
    %4 = vector.load %arg4[%c0_7, %c0_8, %c0_9, %c0_10] : memref<1x1x1x128xf32, #tpu.memory_space<vmem>>, vector<1x1x1x128xf32>
    %5 = vector.broadcast %4 : vector<1x1x1x128xf32> to vector<1x8x8x128xf32>
    %6 = arith.addf %3, %5 : vector<1x8x8x128xf32>
    %cst = arith.constant 0.000000e+00 : f32
    %7 = vector.broadcast %cst : f32 to vector<1x8x8x128xf32>
    %8 = arith.cmpf ogt, %6, %7 : vector<1x8x8x128xf32>
    %cst_11 = arith.constant 2.000000e-01 : f32
    %9 = vector.broadcast %cst_11 : f32 to vector<1x8x8x128xf32>
    %10 = arith.mulf %9, %6 : vector<1x8x8x128xf32>
    %11 = arith.select %8, %6, %10 : vector<1x8x8x128xi1>, vector<1x8x8x128xf32>
    %12 = arith.truncf %11 : vector<1x8x8x128xf32> to vector<1x8x8x128xbf16>
    %c0_12 = arith.constant 0 : index
    %c0_13 = arith.constant 0 : index
    %c0_14 = arith.constant 0 : index
    %c0_15 = arith.constant 0 : index
    %13 = vector.load %arg5[%c0_12, %c0_13, %c0_14, %c0_15] : memref<1x8x8x128xbf16, #tpu.memory_space<vmem>>, vector<1x8x8x128xbf16>
    tpu.vector_store %arg5[%c0_12, %c0_13, %c0_14, %c0_15], %12 {strides = array<i32>} : memref<1x8x8x128xbf16, #tpu.memory_space<vmem>>, vector<1x8x8x128xbf16>,
    return
  }
  func.func @transform_0(%arg0: i32, %arg1: i32) -> (i32, i32, i32, i32) {
    %c0_i32 = arith.constant 0 : i32
    %c0_i32_0 = arith.constant 0 : i32
    %c0_i32_1 = arith.constant 0 : i32
    return %arg0, %arg1, %c0_i32, %c0_i32_0 : i32, i32, i32, i32
  }
  func.func @transform_1(%arg0: i32, %arg1: i32) -> (i32, i32, i32, i32) {
    %c0_i32 = arith.constant 0 : i32
    %c0_i32_0 = arith.constant 0 : i32
    %c0_i32_1 = arith.constant 0 : i32
    %c0_i32_2 = arith.constant 0 : i32
    %c0_i32_3 = arith.constant 0 : i32
    return %c0_i32, %c0_i32_0, %c0_i32_1, %c0_i32_2 : i32, i32, i32, i32
  }
  func.func @transform_2(%arg0: i32, %arg1: i32) -> (i32, i32, i32, i32) {
    %c0_i32 = arith.constant 0 : i32
    %c0_i32_0 = arith.constant 0 : i32
    %c0_i32_1 = arith.constant 0 : i32
    %c0_i32_2 = arith.constant 0 : i32
    %c0_i32_3 = arith.constant 0 : i32
    return %c0_i32, %c0_i32_0, %c0_i32_1, %c0_i32_2 : i32, i32, i32, i32
  }
  func.func @transform_3(%arg0: i32, %arg1: i32) -> (i32, i32, i32, i32) {
    %c0_i32 = arith.constant 0 : i32
    %c0_i32_0 = arith.constant 0 : i32
    %c0_i32_1 = arith.constant 0 : i32
    return %arg0, %arg1, %c0_i32, %c0_i32_0 : i32, i32, i32, i32
  }
}

module attributes {stable_mosaic.version = 11 : i64} {
  func.func @kernel(%arg0: i32, %arg1: i32, %arg2: memref<1x4x5x5x16xbf16, #tpu.memory_space<vmem>>, %arg3: memref<16x16x128xbf16, #tpu.memory_space<vmem>>, %arg4: memref<1x1x4x128xf32, #tpu.memory_space<vmem>>, %arg5: memref<1x1x2x128xf32, #tpu.memory_space<vmem>>) attributes {dimension_semantics = [#tpu.dimension_semantics<parallel>, #tpu.dimension_semantics<parallel>], iteration_bounds = array<i64: 2, 4>, scalar_prefetch = 0 : i64, scratch_operands = 0 : i64, tpu.core_type = #tpu.core_type<tc>, window_params = [{transform_indices = @transform_0, window_bounds = array<i64: 1, 4, 5, 5, 16>}, {pipeline_mode = #tpu.pipeline_mode<synchronous>, transform_indices = @transform_1, window_bounds = array<i64: 16, 16, 128>}, {transform_indices = @transform_2, window_bounds = array<i64: 1, 1, 4, 128>}, {transform_indices = @transform_3, window_bounds = array<i64: 1, 1, 2, 128>}]} {
    %cst = arith.constant 0.000000e+00 : f32
    %0 = vector.broadcast %cst : f32 to vector<4x128xf32>
    %c0_i32 = arith.constant 0 : i32
    %1 = arith.addi %arg1, %c0_i32 : i32
    %c0 = arith.constant 0 : index
    %c0_0 = arith.constant 0 : index
    %2 = arith.index_cast %1 : i32 to index
    %c0_1 = arith.constant 0 : index
    %c0_2 = arith.constant 0 : index
    %3 = vector.load %arg2[%c0, %c0_0, %2, %c0_1, %c0_2] : memref<1x4x5x5x16xbf16, #tpu.memory_space<vmem>>, vector<1x1x1x4x16xbf16>
    %4 = vector.shape_cast %3 : vector<1x1x1x4x16xbf16> to vector<4x16xbf16>
    %c0_3 = arith.constant 0 : index
    %c0_4 = arith.constant 0 : index
    %c0_5 = arith.constant 0 : index
    %5 = vector.load %arg3[%c0_3, %c0_4, %c0_5] : memref<16x16x128xbf16, #tpu.memory_space<vmem>>, vector<1x16x128xbf16>
    %6 = vector.shape_cast %5 : vector<1x16x128xbf16> to vector<16x128xbf16>
    %cst_6 = arith.constant dense<0.000000e+00> : vector<4x128xf32>
    %7 = tpu.matmul %4, %6, %cst_6 {dimension_numbers = #tpu.dot_dimension_numbers<[1], [0], [0], [1], [0, 0, 1, 1], [], []>} : vector<4x16xbf16>, vector<16x128xbf16>, vector<4x128xf32> -> vector<4x128xf32>
    %8 = arith.addf %0, %7 : vector<4x128xf32>
    %c0_i32_7 = arith.constant 0 : i32
    %9 = arith.addi %arg1, %c0_i32_7 : i32
    %c0_8 = arith.constant 0 : index
    %c1 = arith.constant 1 : index
    %10 = arith.index_cast %9 : i32 to index
    %c0_9 = arith.constant 0 : index
    %c0_10 = arith.constant 0 : index
    %11 = vector.load %arg2[%c0_8, %c1, %10, %c0_9, %c0_10] : memref<1x4x5x5x16xbf16, #tpu.memory_space<vmem>>, vector<1x1x1x4x16xbf16>
    %12 = vector.shape_cast %11 : vector<1x1x1x4x16xbf16> to vector<4x16xbf16>
    %c1_11 = arith.constant 1 : index
    %c0_12 = arith.constant 0 : index
    %c0_13 = arith.constant 0 : index
    %13 = vector.load %arg3[%c1_11, %c0_12, %c0_13] : memref<16x16x128xbf16, #tpu.memory_space<vmem>>, vector<1x16x128xbf16>
    %14 = vector.shape_cast %13 : vector<1x16x128xbf16> to vector<16x128xbf16>
    %cst_14 = arith.constant dense<0.000000e+00> : vector<4x128xf32>
    %15 = tpu.matmul %12, %14, %cst_14 {dimension_numbers = #tpu.dot_dimension_numbers<[1], [0], [0], [1], [0, 0, 1, 1], [], []>} : vector<4x16xbf16>, vector<16x128xbf16>, vector<4x128xf32> -> vector<4x128xf32>
    %16 = arith.addf %8, %15 : vector<4x128xf32>
    %c0_i32_15 = arith.constant 0 : i32
    %17 = arith.addi %arg1, %c0_i32_15 : i32
    %c0_16 = arith.constant 0 : index
    %c0_17 = arith.constant 0 : index
    %18 = arith.index_cast %17 : i32 to index
    %c1_18 = arith.constant 1 : index
    %c0_19 = arith.constant 0 : index
    %19 = vector.load %arg2[%c0_16, %c0_17, %18, %c1_18, %c0_19] : memref<1x4x5x5x16xbf16, #tpu.memory_space<vmem>>, vector<1x1x1x4x16xbf16>
    %20 = vector.shape_cast %19 : vector<1x1x1x4x16xbf16> to vector<4x16xbf16>
    %c2 = arith.constant 2 : index
    %c0_20 = arith.constant 0 : index
    %c0_21 = arith.constant 0 : index
    %21 = vector.load %arg3[%c2, %c0_20, %c0_21] : memref<16x16x128xbf16, #tpu.memory_space<vmem>>, vector<1x16x128xbf16>
    %22 = vector.shape_cast %21 : vector<1x16x128xbf16> to vector<16x128xbf16>
    %cst_22 = arith.constant dense<0.000000e+00> : vector<4x128xf32>
    %23 = tpu.matmul %20, %22, %cst_22 {dimension_numbers = #tpu.dot_dimension_numbers<[1], [0], [0], [1], [0, 0, 1, 1], [], []>} : vector<4x16xbf16>, vector<16x128xbf16>, vector<4x128xf32> -> vector<4x128xf32>
    %24 = arith.addf %16, %23 : vector<4x128xf32>
    %c0_i32_23 = arith.constant 0 : i32
    %25 = arith.addi %arg1, %c0_i32_23 : i32
    %c0_24 = arith.constant 0 : index
    %c1_25 = arith.constant 1 : index
    %26 = arith.index_cast %25 : i32 to index
    %c1_26 = arith.constant 1 : index
    %c0_27 = arith.constant 0 : index
    %27 = vector.load %arg2[%c0_24, %c1_25, %26, %c1_26, %c0_27] : memref<1x4x5x5x16xbf16, #tpu.memory_space<vmem>>, vector<1x1x1x4x16xbf16>
    %28 = vector.shape_cast %27 : vector<1x1x1x4x16xbf16> to vector<4x16xbf16>
    %c3 = arith.constant 3 : index
    %c0_28 = arith.constant 0 : index
    %c0_29 = arith.constant 0 : index
    %29 = vector.load %arg3[%c3, %c0_28, %c0_29] : memref<16x16x128xbf16, #tpu.memory_space<vmem>>, vector<1x16x128xbf16>
    %30 = vector.shape_cast %29 : vector<1x16x128xbf16> to vector<16x128xbf16>
    %cst_30 = arith.constant dense<0.000000e+00> : vector<4x128xf32>
    %31 = tpu.matmul %28, %30, %cst_30 {dimension_numbers = #tpu.dot_dimension_numbers<[1], [0], [0], [1], [0, 0, 1, 1], [], []>} : vector<4x16xbf16>, vector<16x128xbf16>, vector<4x128xf32> -> vector<4x128xf32>
    %32 = arith.addf %24, %31 : vector<4x128xf32>
    %c0_i32_31 = arith.constant 0 : i32
    %33 = arith.addi %arg1, %c0_i32_31 : i32
    %c0_32 = arith.constant 0 : index
    %c2_33 = arith.constant 2 : index
    %34 = arith.index_cast %33 : i32 to index
    %c0_34 = arith.constant 0 : index
    %c0_35 = arith.constant 0 : index
    %35 = vector.load %arg2[%c0_32, %c2_33, %34, %c0_34, %c0_35] : memref<1x4x5x5x16xbf16, #tpu.memory_space<vmem>>, vector<1x1x1x4x16xbf16>
    %36 = vector.shape_cast %35 : vector<1x1x1x4x16xbf16> to vector<4x16xbf16>
    %c4 = arith.constant 4 : index
    %c0_36 = arith.constant 0 : index
    %c0_37 = arith.constant 0 : index
    %37 = vector.load %arg3[%c4, %c0_36, %c0_37] : memref<16x16x128xbf16, #tpu.memory_space<vmem>>, vector<1x16x128xbf16>
    %38 = vector.shape_cast %37 : vector<1x16x128xbf16> to vector<16x128xbf16>
    %cst_38 = arith.constant dense<0.000000e+00> : vector<4x128xf32>
    %39 = tpu.matmul %36, %38, %cst_38 {dimension_numbers = #tpu.dot_dimension_numbers<[1], [0], [0], [1], [0, 0, 1, 1], [], []>} : vector<4x16xbf16>, vector<16x128xbf16>, vector<4x128xf32> -> vector<4x128xf32>
    %40 = arith.addf %32, %39 : vector<4x128xf32>
    %c0_i32_39 = arith.constant 0 : i32
    %41 = arith.addi %arg1, %c0_i32_39 : i32
    %c0_40 = arith.constant 0 : index
    %c3_41 = arith.constant 3 : index
    %42 = arith.index_cast %41 : i32 to index
    %c0_42 = arith.constant 0 : index
    %c0_43 = arith.constant 0 : index
    %43 = vector.load %arg2[%c0_40, %c3_41, %42, %c0_42, %c0_43] : memref<1x4x5x5x16xbf16, #tpu.memory_space<vmem>>, vector<1x1x1x4x16xbf16>
    %44 = vector.shape_cast %43 : vector<1x1x1x4x16xbf16> to vector<4x16xbf16>
    %c5 = arith.constant 5 : index
    %c0_44 = arith.constant 0 : index
    %c0_45 = arith.constant 0 : index
    %45 = vector.load %arg3[%c5, %c0_44, %c0_45] : memref<16x16x128xbf16, #tpu.memory_space<vmem>>, vector<1x16x128xbf16>
    %46 = vector.shape_cast %45 : vector<1x16x128xbf16> to vector<16x128xbf16>
    %cst_46 = arith.constant dense<0.000000e+00> : vector<4x128xf32>
    %47 = tpu.matmul %44, %46, %cst_46 {dimension_numbers = #tpu.dot_dimension_numbers<[1], [0], [0], [1], [0, 0, 1, 1], [], []>} : vector<4x16xbf16>, vector<16x128xbf16>, vector<4x128xf32> -> vector<4x128xf32>
    %48 = arith.addf %40, %47 : vector<4x128xf32>
    %c0_i32_47 = arith.constant 0 : i32
    %49 = arith.addi %arg1, %c0_i32_47 : i32
    %c0_48 = arith.constant 0 : index
    %c2_49 = arith.constant 2 : index
    %50 = arith.index_cast %49 : i32 to index
    %c1_50 = arith.constant 1 : index
    %c0_51 = arith.constant 0 : index
    %51 = vector.load %arg2[%c0_48, %c2_49, %50, %c1_50, %c0_51] : memref<1x4x5x5x16xbf16, #tpu.memory_space<vmem>>, vector<1x1x1x4x16xbf16>
    %52 = vector.shape_cast %51 : vector<1x1x1x4x16xbf16> to vector<4x16xbf16>
    %c6 = arith.constant 6 : index
    %c0_52 = arith.constant 0 : index
    %c0_53 = arith.constant 0 : index
    %53 = vector.load %arg3[%c6, %c0_52, %c0_53] : memref<16x16x128xbf16, #tpu.memory_space<vmem>>, vector<1x16x128xbf16>
    %54 = vector.shape_cast %53 : vector<1x16x128xbf16> to vector<16x128xbf16>
    %cst_54 = arith.constant dense<0.000000e+00> : vector<4x128xf32>
    %55 = tpu.matmul %52, %54, %cst_54 {dimension_numbers = #tpu.dot_dimension_numbers<[1], [0], [0], [1], [0, 0, 1, 1], [], []>} : vector<4x16xbf16>, vector<16x128xbf16>, vector<4x128xf32> -> vector<4x128xf32>
    %56 = arith.addf %48, %55 : vector<4x128xf32>
    %c0_i32_55 = arith.constant 0 : i32
    %57 = arith.addi %arg1, %c0_i32_55 : i32
    %c0_56 = arith.constant 0 : index
    %c3_57 = arith.constant 3 : index
    %58 = arith.index_cast %57 : i32 to index
    %c1_58 = arith.constant 1 : index
    %c0_59 = arith.constant 0 : index
    %59 = vector.load %arg2[%c0_56, %c3_57, %58, %c1_58, %c0_59] : memref<1x4x5x5x16xbf16, #tpu.memory_space<vmem>>, vector<1x1x1x4x16xbf16>
    %60 = vector.shape_cast %59 : vector<1x1x1x4x16xbf16> to vector<4x16xbf16>
    %c7 = arith.constant 7 : index
    %c0_60 = arith.constant 0 : index
    %c0_61 = arith.constant 0 : index
    %61 = vector.load %arg3[%c7, %c0_60, %c0_61] : memref<16x16x128xbf16, #tpu.memory_space<vmem>>, vector<1x16x128xbf16>
    %62 = vector.shape_cast %61 : vector<1x16x128xbf16> to vector<16x128xbf16>
    %cst_62 = arith.constant dense<0.000000e+00> : vector<4x128xf32>
    %63 = tpu.matmul %60, %62, %cst_62 {dimension_numbers = #tpu.dot_dimension_numbers<[1], [0], [0], [1], [0, 0, 1, 1], [], []>} : vector<4x16xbf16>, vector<16x128xbf16>, vector<4x128xf32> -> vector<4x128xf32>
    %64 = arith.addf %56, %63 : vector<4x128xf32>
    %c1_i32 = arith.constant 1 : i32
    %65 = arith.addi %arg1, %c1_i32 : i32
    %c0_63 = arith.constant 0 : index
    %c0_64 = arith.constant 0 : index
    %66 = arith.index_cast %65 : i32 to index
    %c0_65 = arith.constant 0 : index
    %c0_66 = arith.constant 0 : index
    %67 = vector.load %arg2[%c0_63, %c0_64, %66, %c0_65, %c0_66] : memref<1x4x5x5x16xbf16, #tpu.memory_space<vmem>>, vector<1x1x1x4x16xbf16>
    %68 = vector.shape_cast %67 : vector<1x1x1x4x16xbf16> to vector<4x16xbf16>
    %c8 = arith.constant 8 : index
    %c0_67 = arith.constant 0 : index
    %c0_68 = arith.constant 0 : index
    %69 = vector.load %arg3[%c8, %c0_67, %c0_68] : memref<16x16x128xbf16, #tpu.memory_space<vmem>>, vector<1x16x128xbf16>
    %70 = vector.shape_cast %69 : vector<1x16x128xbf16> to vector<16x128xbf16>
    %cst_69 = arith.constant dense<0.000000e+00> : vector<4x128xf32>
    %71 = tpu.matmul %68, %70, %cst_69 {dimension_numbers = #tpu.dot_dimension_numbers<[1], [0], [0], [1], [0, 0, 1, 1], [], []>} : vector<4x16xbf16>, vector<16x128xbf16>, vector<4x128xf32> -> vector<4x128xf32>
    %72 = arith.addf %64, %71 : vector<4x128xf32>
    %c1_i32_70 = arith.constant 1 : i32
    %73 = arith.addi %arg1, %c1_i32_70 : i32
    %c0_71 = arith.constant 0 : index
    %c1_72 = arith.constant 1 : index
    %74 = arith.index_cast %73 : i32 to index
    %c0_73 = arith.constant 0 : index
    %c0_74 = arith.constant 0 : index
    %75 = vector.load %arg2[%c0_71, %c1_72, %74, %c0_73, %c0_74] : memref<1x4x5x5x16xbf16, #tpu.memory_space<vmem>>, vector<1x1x1x4x16xbf16>
    %76 = vector.shape_cast %75 : vector<1x1x1x4x16xbf16> to vector<4x16xbf16>
    %c9 = arith.constant 9 : index
    %c0_75 = arith.constant 0 : index
    %c0_76 = arith.constant 0 : index
    %77 = vector.load %arg3[%c9, %c0_75, %c0_76] : memref<16x16x128xbf16, #tpu.memory_space<vmem>>, vector<1x16x128xbf16>
    %78 = vector.shape_cast %77 : vector<1x16x128xbf16> to vector<16x128xbf16>
    %cst_77 = arith.constant dense<0.000000e+00> : vector<4x128xf32>
    %79 = tpu.matmul %76, %78, %cst_77 {dimension_numbers = #tpu.dot_dimension_numbers<[1], [0], [0], [1], [0, 0, 1, 1], [], []>} : vector<4x16xbf16>, vector<16x128xbf16>, vector<4x128xf32> -> vector<4x128xf32>
    %80 = arith.addf %72, %79 : vector<4x128xf32>
    %c1_i32_78 = arith.constant 1 : i32
    %81 = arith.addi %arg1, %c1_i32_78 : i32
    %c0_79 = arith.constant 0 : index
    %c0_80 = arith.constant 0 : index
    %82 = arith.index_cast %81 : i32 to index
    %c1_81 = arith.constant 1 : index
    %c0_82 = arith.constant 0 : index
    %83 = vector.load %arg2[%c0_79, %c0_80, %82, %c1_81, %c0_82] : memref<1x4x5x5x16xbf16, #tpu.memory_space<vmem>>, vector<1x1x1x4x16xbf16>
    %84 = vector.shape_cast %83 : vector<1x1x1x4x16xbf16> to vector<4x16xbf16>
    %c10 = arith.constant 10 : index
    %c0_83 = arith.constant 0 : index
    %c0_84 = arith.constant 0 : index
    %85 = vector.load %arg3[%c10, %c0_83, %c0_84] : memref<16x16x128xbf16, #tpu.memory_space<vmem>>, vector<1x16x128xbf16>
    %86 = vector.shape_cast %85 : vector<1x16x128xbf16> to vector<16x128xbf16>
    %cst_85 = arith.constant dense<0.000000e+00> : vector<4x128xf32>
    %87 = tpu.matmul %84, %86, %cst_85 {dimension_numbers = #tpu.dot_dimension_numbers<[1], [0], [0], [1], [0, 0, 1, 1], [], []>} : vector<4x16xbf16>, vector<16x128xbf16>, vector<4x128xf32> -> vector<4x128xf32>
    %88 = arith.addf %80, %87 : vector<4x128xf32>
    %c1_i32_86 = arith.constant 1 : i32
    %89 = arith.addi %arg1, %c1_i32_86 : i32
    %c0_87 = arith.constant 0 : index
    %c1_88 = arith.constant 1 : index
    %90 = arith.index_cast %89 : i32 to index
    %c1_89 = arith.constant 1 : index
    %c0_90 = arith.constant 0 : index
    %91 = vector.load %arg2[%c0_87, %c1_88, %90, %c1_89, %c0_90] : memref<1x4x5x5x16xbf16, #tpu.memory_space<vmem>>, vector<1x1x1x4x16xbf16>
    %92 = vector.shape_cast %91 : vector<1x1x1x4x16xbf16> to vector<4x16xbf16>
    %c11 = arith.constant 11 : index
    %c0_91 = arith.constant 0 : index
    %c0_92 = arith.constant 0 : index
    %93 = vector.load %arg3[%c11, %c0_91, %c0_92] : memref<16x16x128xbf16, #tpu.memory_space<vmem>>, vector<1x16x128xbf16>
    %94 = vector.shape_cast %93 : vector<1x16x128xbf16> to vector<16x128xbf16>
    %cst_93 = arith.constant dense<0.000000e+00> : vector<4x128xf32>
    %95 = tpu.matmul %92, %94, %cst_93 {dimension_numbers = #tpu.dot_dimension_numbers<[1], [0], [0], [1], [0, 0, 1, 1], [], []>} : vector<4x16xbf16>, vector<16x128xbf16>, vector<4x128xf32> -> vector<4x128xf32>
    %96 = arith.addf %88, %95 : vector<4x128xf32>
    %c1_i32_94 = arith.constant 1 : i32
    %97 = arith.addi %arg1, %c1_i32_94 : i32
    %c0_95 = arith.constant 0 : index
    %c2_96 = arith.constant 2 : index
    %98 = arith.index_cast %97 : i32 to index
    %c0_97 = arith.constant 0 : index
    %c0_98 = arith.constant 0 : index
    %99 = vector.load %arg2[%c0_95, %c2_96, %98, %c0_97, %c0_98] : memref<1x4x5x5x16xbf16, #tpu.memory_space<vmem>>, vector<1x1x1x4x16xbf16>
    %100 = vector.shape_cast %99 : vector<1x1x1x4x16xbf16> to vector<4x16xbf16>
    %c12 = arith.constant 12 : index
    %c0_99 = arith.constant 0 : index
    %c0_100 = arith.constant 0 : index
    %101 = vector.load %arg3[%c12, %c0_99, %c0_100] : memref<16x16x128xbf16, #tpu.memory_space<vmem>>, vector<1x16x128xbf16>
    %102 = vector.shape_cast %101 : vector<1x16x128xbf16> to vector<16x128xbf16>
    %cst_101 = arith.constant dense<0.000000e+00> : vector<4x128xf32>
    %103 = tpu.matmul %100, %102, %cst_101 {dimension_numbers = #tpu.dot_dimension_numbers<[1], [0], [0], [1], [0, 0, 1, 1], [], []>} : vector<4x16xbf16>, vector<16x128xbf16>, vector<4x128xf32> -> vector<4x128xf32>
    %104 = arith.addf %96, %103 : vector<4x128xf32>
    %c1_i32_102 = arith.constant 1 : i32
    %105 = arith.addi %arg1, %c1_i32_102 : i32
    %c0_103 = arith.constant 0 : index
    %c3_104 = arith.constant 3 : index
    %106 = arith.index_cast %105 : i32 to index
    %c0_105 = arith.constant 0 : index
    %c0_106 = arith.constant 0 : index
    %107 = vector.load %arg2[%c0_103, %c3_104, %106, %c0_105, %c0_106] : memref<1x4x5x5x16xbf16, #tpu.memory_space<vmem>>, vector<1x1x1x4x16xbf16>
    %108 = vector.shape_cast %107 : vector<1x1x1x4x16xbf16> to vector<4x16xbf16>
    %c13 = arith.constant 13 : index
    %c0_107 = arith.constant 0 : index
    %c0_108 = arith.constant 0 : index
    %109 = vector.load %arg3[%c13, %c0_107, %c0_108] : memref<16x16x128xbf16, #tpu.memory_space<vmem>>, vector<1x16x128xbf16>
    %110 = vector.shape_cast %109 : vector<1x16x128xbf16> to vector<16x128xbf16>
    %cst_109 = arith.constant dense<0.000000e+00> : vector<4x128xf32>
    %111 = tpu.matmul %108, %110, %cst_109 {dimension_numbers = #tpu.dot_dimension_numbers<[1], [0], [0], [1], [0, 0, 1, 1], [], []>} : vector<4x16xbf16>, vector<16x128xbf16>, vector<4x128xf32> -> vector<4x128xf32>
    %112 = arith.addf %104, %111 : vector<4x128xf32>
    %c1_i32_110 = arith.constant 1 : i32
    %113 = arith.addi %arg1, %c1_i32_110 : i32
    %c0_111 = arith.constant 0 : index
    %c2_112 = arith.constant 2 : index
    %114 = arith.index_cast %113 : i32 to index
    %c1_113 = arith.constant 1 : index
    %c0_114 = arith.constant 0 : index
    %115 = vector.load %arg2[%c0_111, %c2_112, %114, %c1_113, %c0_114] : memref<1x4x5x5x16xbf16, #tpu.memory_space<vmem>>, vector<1x1x1x4x16xbf16>
    %116 = vector.shape_cast %115 : vector<1x1x1x4x16xbf16> to vector<4x16xbf16>
    %c14 = arith.constant 14 : index
    %c0_115 = arith.constant 0 : index
    %c0_116 = arith.constant 0 : index
    %117 = vector.load %arg3[%c14, %c0_115, %c0_116] : memref<16x16x128xbf16, #tpu.memory_space<vmem>>, vector<1x16x128xbf16>
    %118 = vector.shape_cast %117 : vector<1x16x128xbf16> to vector<16x128xbf16>
    %cst_117 = arith.constant dense<0.000000e+00> : vector<4x128xf32>
    %119 = tpu.matmul %116, %118, %cst_117 {dimension_numbers = #tpu.dot_dimension_numbers<[1], [0], [0], [1], [0, 0, 1, 1], [], []>} : vector<4x16xbf16>, vector<16x128xbf16>, vector<4x128xf32> -> vector<4x128xf32>
    %120 = arith.addf %112, %119 : vector<4x128xf32>
    %c1_i32_118 = arith.constant 1 : i32
    %121 = arith.addi %arg1, %c1_i32_118 : i32
    %c0_119 = arith.constant 0 : index
    %c3_120 = arith.constant 3 : index
    %122 = arith.index_cast %121 : i32 to index
    %c1_121 = arith.constant 1 : index
    %c0_122 = arith.constant 0 : index
    %123 = vector.load %arg2[%c0_119, %c3_120, %122, %c1_121, %c0_122] : memref<1x4x5x5x16xbf16, #tpu.memory_space<vmem>>, vector<1x1x1x4x16xbf16>
    %124 = vector.shape_cast %123 : vector<1x1x1x4x16xbf16> to vector<4x16xbf16>
    %c15 = arith.constant 15 : index
    %c0_123 = arith.constant 0 : index
    %c0_124 = arith.constant 0 : index
    %125 = vector.load %arg3[%c15, %c0_123, %c0_124] : memref<16x16x128xbf16, #tpu.memory_space<vmem>>, vector<1x16x128xbf16>
    %126 = vector.shape_cast %125 : vector<1x16x128xbf16> to vector<16x128xbf16>
    %cst_125 = arith.constant dense<0.000000e+00> : vector<4x128xf32>
    %127 = tpu.matmul %124, %126, %cst_125 {dimension_numbers = #tpu.dot_dimension_numbers<[1], [0], [0], [1], [0, 0, 1, 1], [], []>} : vector<4x16xbf16>, vector<16x128xbf16>, vector<4x128xf32> -> vector<4x128xf32>
    %128 = arith.addf %120, %127 : vector<4x128xf32>
    %cst_126 = arith.constant dense<0.000000e+00> : vector<128xf32>
    %129 = vector.multi_reduction <add>, %128, %cst_126 [0] : vector<4x128xf32> to vector<128xf32>
    %130 = vector.shape_cast %129 : vector<128xf32> to vector<1x128xf32>
    %131 = arith.mulf %128, %128 : vector<4x128xf32>
    %cst_127 = arith.constant dense<0.000000e+00> : vector<128xf32>
    %132 = vector.multi_reduction <add>, %131, %cst_127 [0] : vector<4x128xf32> to vector<128xf32>
    %133 = vector.shape_cast %132 : vector<128xf32> to vector<1x128xf32>
    %134 = tpu.concatenate %130, %133 in 0 : vector<1x128xf32>, vector<1x128xf32> -> vector<2x128xf32>
    %c0_128 = arith.constant 0 : index
    %c0_129 = arith.constant 0 : index
    %c0_130 = arith.constant 0 : index
    %c0_131 = arith.constant 0 : index
    %135 = vector.load %arg5[%c0_128, %c0_129, %c0_130, %c0_131] : memref<1x1x2x128xf32, #tpu.memory_space<vmem>>, vector<1x1x2x128xf32>
    %136 = vector.shape_cast %135 : vector<1x1x2x128xf32> to vector<2x128xf32>
    %137 = vector.shape_cast %134 : vector<2x128xf32> to vector<1x1x2x128xf32>
    tpu.vector_store %arg5[%c0_128, %c0_129, %c0_130, %c0_131], %137 {strides = array<i32>} : memref<1x1x2x128xf32, #tpu.memory_space<vmem>>, vector<1x1x2x128xf32>,
    %c0_132 = arith.constant 0 : index
    %c0_133 = arith.constant 0 : index
    %c0_134 = arith.constant 0 : index
    %c0_135 = arith.constant 0 : index
    %138 = vector.load %arg4[%c0_132, %c0_133, %c0_134, %c0_135] : memref<1x1x4x128xf32, #tpu.memory_space<vmem>>, vector<1x1x4x128xf32>
    %139 = vector.shape_cast %138 : vector<1x1x4x128xf32> to vector<4x128xf32>
    %140 = vector.shape_cast %128 : vector<4x128xf32> to vector<1x1x4x128xf32>
    tpu.vector_store %arg4[%c0_132, %c0_133, %c0_134, %c0_135], %140 {strides = array<i32>} : memref<1x1x4x128xf32, #tpu.memory_space<vmem>>, vector<1x1x4x128xf32>,
    return
  }
  func.func @transform_0(%arg0: i32, %arg1: i32) -> (i32, i32, i32, i32, i32) {
    %c0_i32 = arith.constant 0 : i32
    %c0_i32_0 = arith.constant 0 : i32
    %c0_i32_1 = arith.constant 0 : i32
    %c0_i32_2 = arith.constant 0 : i32
    %c0_i32_3 = arith.constant 0 : i32
    return %arg0, %c0_i32, %c0_i32_0, %c0_i32_1, %c0_i32_2 : i32, i32, i32, i32, i32
  }
  func.func @transform_1(%arg0: i32, %arg1: i32) -> (i32, i32, i32) {
    %c0_i32 = arith.constant 0 : i32
    %c0_i32_0 = arith.constant 0 : i32
    %c0_i32_1 = arith.constant 0 : i32
    %c0_i32_2 = arith.constant 0 : i32
    return %c0_i32, %c0_i32_0, %c0_i32_1 : i32, i32, i32
  }
  func.func @transform_2(%arg0: i32, %arg1: i32) -> (i32, i32, i32, i32) {
    %c0_i32 = arith.constant 0 : i32
    %c0_i32_0 = arith.constant 0 : i32
    %c0_i32_1 = arith.constant 0 : i32
    return %arg0, %arg1, %c0_i32, %c0_i32_0 : i32, i32, i32, i32
  }
  func.func @transform_3(%arg0: i32, %arg1: i32) -> (i32, i32, i32, i32) {
    %c0_i32 = arith.constant 0 : i32
    %c0_i32_0 = arith.constant 0 : i32
    %c0_i32_1 = arith.constant 0 : i32
    return %arg0, %arg1, %c0_i32, %c0_i32_0 : i32, i32, i32, i32
  }
}

module attributes {stable_mosaic.version = 11 : i64} {
  func.func @kernel(%arg0: i32, %arg1: i32, %arg2: memref<1x4x4x128xf32, #tpu.memory_space<vmem>>, %arg3: memref<1x1x1x128xf32, #tpu.memory_space<vmem>>, %arg4: memref<1x1x1x128xf32, #tpu.memory_space<vmem>>, %arg5: memref<1x4x4x128xbf16, #tpu.memory_space<vmem>>) attributes {dimension_semantics = [#tpu.dimension_semantics<parallel>, #tpu.dimension_semantics<parallel>], iteration_bounds = array<i64: 2, 1>, scalar_prefetch = 0 : i64, scratch_operands = 0 : i64, tpu.core_type = #tpu.core_type<tc>, window_params = [{transform_indices = @transform_0, window_bounds = array<i64: 1, 4, 4, 128>}, {pipeline_mode = #tpu.pipeline_mode<synchronous>, transform_indices = @transform_1, window_bounds = array<i64: 1, 1, 1, 128>}, {pipeline_mode = #tpu.pipeline_mode<synchronous>, transform_indices = @transform_2, window_bounds = array<i64: 1, 1, 1, 128>}, {transform_indices = @transform_3, window_bounds = array<i64: 1, 4, 4, 128>}]} {
    %c0 = arith.constant 0 : index
    %c0_0 = arith.constant 0 : index
    %c0_1 = arith.constant 0 : index
    %c0_2 = arith.constant 0 : index
    %0 = vector.load %arg2[%c0, %c0_0, %c0_1, %c0_2] : memref<1x4x4x128xf32, #tpu.memory_space<vmem>>, vector<1x4x4x128xf32>
    %c0_3 = arith.constant 0 : index
    %c0_4 = arith.constant 0 : index
    %c0_5 = arith.constant 0 : index
    %c0_6 = arith.constant 0 : index
    %1 = vector.load %arg3[%c0_3, %c0_4, %c0_5, %c0_6] : memref<1x1x1x128xf32, #tpu.memory_space<vmem>>, vector<1x1x1x128xf32>
    %2 = vector.broadcast %1 : vector<1x1x1x128xf32> to vector<1x4x4x128xf32>
    %3 = arith.mulf %0, %2 : vector<1x4x4x128xf32>
    %c0_7 = arith.constant 0 : index
    %c0_8 = arith.constant 0 : index
    %c0_9 = arith.constant 0 : index
    %c0_10 = arith.constant 0 : index
    %4 = vector.load %arg4[%c0_7, %c0_8, %c0_9, %c0_10] : memref<1x1x1x128xf32, #tpu.memory_space<vmem>>, vector<1x1x1x128xf32>
    %5 = vector.broadcast %4 : vector<1x1x1x128xf32> to vector<1x4x4x128xf32>
    %6 = arith.addf %3, %5 : vector<1x4x4x128xf32>
    %cst = arith.constant 0.000000e+00 : f32
    %7 = vector.broadcast %cst : f32 to vector<1x4x4x128xf32>
    %8 = arith.cmpf ogt, %6, %7 : vector<1x4x4x128xf32>
    %cst_11 = arith.constant 2.000000e-01 : f32
    %9 = vector.broadcast %cst_11 : f32 to vector<1x4x4x128xf32>
    %10 = arith.mulf %9, %6 : vector<1x4x4x128xf32>
    %11 = arith.select %8, %6, %10 : vector<1x4x4x128xi1>, vector<1x4x4x128xf32>
    %12 = arith.truncf %11 : vector<1x4x4x128xf32> to vector<1x4x4x128xbf16>
    %c0_12 = arith.constant 0 : index
    %c0_13 = arith.constant 0 : index
    %c0_14 = arith.constant 0 : index
    %c0_15 = arith.constant 0 : index
    %13 = vector.load %arg5[%c0_12, %c0_13, %c0_14, %c0_15] : memref<1x4x4x128xbf16, #tpu.memory_space<vmem>>, vector<1x4x4x128xbf16>
    tpu.vector_store %arg5[%c0_12, %c0_13, %c0_14, %c0_15], %12 {strides = array<i32>} : memref<1x4x4x128xbf16, #tpu.memory_space<vmem>>, vector<1x4x4x128xbf16>,
    return
  }
  func.func @transform_0(%arg0: i32, %arg1: i32) -> (i32, i32, i32, i32) {
    %c0_i32 = arith.constant 0 : i32
    %c0_i32_0 = arith.constant 0 : i32
    %c0_i32_1 = arith.constant 0 : i32
    return %arg0, %arg1, %c0_i32, %c0_i32_0 : i32, i32, i32, i32
  }
  func.func @transform_1(%arg0: i32, %arg1: i32) -> (i32, i32, i32, i32) {
    %c0_i32 = arith.constant 0 : i32
    %c0_i32_0 = arith.constant 0 : i32
    %c0_i32_1 = arith.constant 0 : i32
    %c0_i32_2 = arith.constant 0 : i32
    %c0_i32_3 = arith.constant 0 : i32
    return %c0_i32, %c0_i32_0, %c0_i32_1, %c0_i32_2 : i32, i32, i32, i32
  }
  func.func @transform_2(%arg0: i32, %arg1: i32) -> (i32, i32, i32, i32) {
    %c0_i32 = arith.constant 0 : i32
    %c0_i32_0 = arith.constant 0 : i32
    %c0_i32_1 = arith.constant 0 : i32
    %c0_i32_2 = arith.constant 0 : i32
    %c0_i32_3 = arith.constant 0 : i32
    return %c0_i32, %c0_i32_0, %c0_i32_1, %c0_i32_2 : i32, i32, i32, i32
  }
  func.func @transform_3(%arg0: i32, %arg1: i32) -> (i32, i32, i32, i32) {
    %c0_i32 = arith.constant 0 : i32
    %c0_i32_0 = arith.constant 0 : i32
    %c0_i32_1 = arith.constant 0 : i32
    return %arg0, %arg1, %c0_i32, %c0_i32_0 : i32, i32, i32, i32
  }
}

module attributes {stable_mosaic.version = 11 : i64} {
  func.func @kernel(%arg0: i32, %arg1: i32, %arg2: memref<1x1x6x6x32xbf16, #tpu.memory_space<vmem>>, %arg3: memref<16x32x128xbf16, #tpu.memory_space<vmem>>, %arg4: memref<1x1x3x128xf32, #tpu.memory_space<vmem>>, %arg5: memref<1x1x2x128xf32, #tpu.memory_space<vmem>>) attributes {dimension_semantics = [#tpu.dimension_semantics<parallel>, #tpu.dimension_semantics<parallel>], iteration_bounds = array<i64: 2, 3>, scalar_prefetch = 0 : i64, scratch_operands = 0 : i64, tpu.core_type = #tpu.core_type<tc>, window_params = [{transform_indices = @transform_0, window_bounds = array<i64: 1, 1, 6, 6, 32>}, {pipeline_mode = #tpu.pipeline_mode<synchronous>, transform_indices = @transform_1, window_bounds = array<i64: 16, 32, 128>}, {transform_indices = @transform_2, window_bounds = array<i64: 1, 1, 3, 128>}, {transform_indices = @transform_3, window_bounds = array<i64: 1, 1, 2, 128>}]} {
    %cst = arith.constant 0.000000e+00 : f32
    %0 = vector.broadcast %cst : f32 to vector<3x128xf32>
    %c0_i32 = arith.constant 0 : i32
    %1 = arith.addi %arg1, %c0_i32 : i32
    %c0 = arith.constant 0 : index
    %c0_0 = arith.constant 0 : index
    %2 = arith.index_cast %1 : i32 to index
    %c0_1 = arith.constant 0 : index
    %c0_2 = arith.constant 0 : index
    %3 = vector.load %arg2[%c0, %c0_0, %2, %c0_1, %c0_2] : memref<1x1x6x6x32xbf16, #tpu.memory_space<vmem>>, vector<1x1x1x3x32xbf16>
    %4 = vector.shape_cast %3 : vector<1x1x1x3x32xbf16> to vector<3x32xbf16>
    %c0_3 = arith.constant 0 : index
    %c0_4 = arith.constant 0 : index
    %c0_5 = arith.constant 0 : index
    %5 = vector.load %arg3[%c0_3, %c0_4, %c0_5] : memref<16x32x128xbf16, #tpu.memory_space<vmem>>, vector<1x32x128xbf16>
    %6 = vector.shape_cast %5 : vector<1x32x128xbf16> to vector<32x128xbf16>
    %cst_6 = arith.constant dense<0.000000e+00> : vector<3x128xf32>
    %7 = tpu.matmul %4, %6, %cst_6 {dimension_numbers = #tpu.dot_dimension_numbers<[1], [0], [0], [1], [0, 0, 1, 1], [], []>} : vector<3x32xbf16>, vector<32x128xbf16>, vector<3x128xf32> -> vector<3x128xf32>
    %8 = arith.addf %0, %7 : vector<3x128xf32>
    %c0_i32_7 = arith.constant 0 : i32
    %9 = arith.addi %arg1, %c0_i32_7 : i32
    %c0_8 = arith.constant 0 : index
    %c0_9 = arith.constant 0 : index
    %10 = arith.index_cast %9 : i32 to index
    %c1 = arith.constant 1 : index
    %c0_10 = arith.constant 0 : index
    %11 = vector.load %arg2[%c0_8, %c0_9, %10, %c1, %c0_10] : memref<1x1x6x6x32xbf16, #tpu.memory_space<vmem>>, vector<1x1x1x3x32xbf16>
    %12 = vector.shape_cast %11 : vector<1x1x1x3x32xbf16> to vector<3x32xbf16>
    %c1_11 = arith.constant 1 : index
    %c0_12 = arith.constant 0 : index
    %c0_13 = arith.constant 0 : index
    %13 = vector.load %arg3[%c1_11, %c0_12, %c0_13] : memref<16x32x128xbf16, #tpu.memory_space<vmem>>, vector<1x32x128xbf16>
    %14 = vector.shape_cast %13 : vector<1x32x128xbf16> to vector<32x128xbf16>
    %cst_14 = arith.constant dense<0.000000e+00> : vector<3x128xf32>
    %15 = tpu.matmul %12, %14, %cst_14 {dimension_numbers = #tpu.dot_dimension_numbers<[1], [0], [0], [1], [0, 0, 1, 1], [], []>} : vector<3x32xbf16>, vector<32x128xbf16>, vector<3x128xf32> -> vector<3x128xf32>
    %16 = arith.addf %8, %15 : vector<3x128xf32>
    %c0_i32_15 = arith.constant 0 : i32
    %17 = arith.addi %arg1, %c0_i32_15 : i32
    %c0_16 = arith.constant 0 : index
    %c0_17 = arith.constant 0 : index
    %18 = arith.index_cast %17 : i32 to index
    %c2 = arith.constant 2 : index
    %c0_18 = arith.constant 0 : index
    %19 = vector.load %arg2[%c0_16, %c0_17, %18, %c2, %c0_18] : memref<1x1x6x6x32xbf16, #tpu.memory_space<vmem>>, vector<1x1x1x3x32xbf16>
    %20 = vector.shape_cast %19 : vector<1x1x1x3x32xbf16> to vector<3x32xbf16>
    %c2_19 = arith.constant 2 : index
    %c0_20 = arith.constant 0 : index
    %c0_21 = arith.constant 0 : index
    %21 = vector.load %arg3[%c2_19, %c0_20, %c0_21] : memref<16x32x128xbf16, #tpu.memory_space<vmem>>, vector<1x32x128xbf16>
    %22 = vector.shape_cast %21 : vector<1x32x128xbf16> to vector<32x128xbf16>
    %cst_22 = arith.constant dense<0.000000e+00> : vector<3x128xf32>
    %23 = tpu.matmul %20, %22, %cst_22 {dimension_numbers = #tpu.dot_dimension_numbers<[1], [0], [0], [1], [0, 0, 1, 1], [], []>} : vector<3x32xbf16>, vector<32x128xbf16>, vector<3x128xf32> -> vector<3x128xf32>
    %24 = arith.addf %16, %23 : vector<3x128xf32>
    %c0_i32_23 = arith.constant 0 : i32
    %25 = arith.addi %arg1, %c0_i32_23 : i32
    %c0_24 = arith.constant 0 : index
    %c0_25 = arith.constant 0 : index
    %26 = arith.index_cast %25 : i32 to index
    %c3 = arith.constant 3 : index
    %c0_26 = arith.constant 0 : index
    %27 = vector.load %arg2[%c0_24, %c0_25, %26, %c3, %c0_26] : memref<1x1x6x6x32xbf16, #tpu.memory_space<vmem>>, vector<1x1x1x3x32xbf16>
    %28 = vector.shape_cast %27 : vector<1x1x1x3x32xbf16> to vector<3x32xbf16>
    %c3_27 = arith.constant 3 : index
    %c0_28 = arith.constant 0 : index
    %c0_29 = arith.constant 0 : index
    %29 = vector.load %arg3[%c3_27, %c0_28, %c0_29] : memref<16x32x128xbf16, #tpu.memory_space<vmem>>, vector<1x32x128xbf16>
    %30 = vector.shape_cast %29 : vector<1x32x128xbf16> to vector<32x128xbf16>
    %cst_30 = arith.constant dense<0.000000e+00> : vector<3x128xf32>
    %31 = tpu.matmul %28, %30, %cst_30 {dimension_numbers = #tpu.dot_dimension_numbers<[1], [0], [0], [1], [0, 0, 1, 1], [], []>} : vector<3x32xbf16>, vector<32x128xbf16>, vector<3x128xf32> -> vector<3x128xf32>
    %32 = arith.addf %24, %31 : vector<3x128xf32>
    %c1_i32 = arith.constant 1 : i32
    %33 = arith.addi %arg1, %c1_i32 : i32
    %c0_31 = arith.constant 0 : index
    %c0_32 = arith.constant 0 : index
    %34 = arith.index_cast %33 : i32 to index
    %c0_33 = arith.constant 0 : index
    %c0_34 = arith.constant 0 : index
    %35 = vector.load %arg2[%c0_31, %c0_32, %34, %c0_33, %c0_34] : memref<1x1x6x6x32xbf16, #tpu.memory_space<vmem>>, vector<1x1x1x3x32xbf16>
    %36 = vector.shape_cast %35 : vector<1x1x1x3x32xbf16> to vector<3x32xbf16>
    %c4 = arith.constant 4 : index
    %c0_35 = arith.constant 0 : index
    %c0_36 = arith.constant 0 : index
    %37 = vector.load %arg3[%c4, %c0_35, %c0_36] : memref<16x32x128xbf16, #tpu.memory_space<vmem>>, vector<1x32x128xbf16>
    %38 = vector.shape_cast %37 : vector<1x32x128xbf16> to vector<32x128xbf16>
    %cst_37 = arith.constant dense<0.000000e+00> : vector<3x128xf32>
    %39 = tpu.matmul %36, %38, %cst_37 {dimension_numbers = #tpu.dot_dimension_numbers<[1], [0], [0], [1], [0, 0, 1, 1], [], []>} : vector<3x32xbf16>, vector<32x128xbf16>, vector<3x128xf32> -> vector<3x128xf32>
    %40 = arith.addf %32, %39 : vector<3x128xf32>
    %c1_i32_38 = arith.constant 1 : i32
    %41 = arith.addi %arg1, %c1_i32_38 : i32
    %c0_39 = arith.constant 0 : index
    %c0_40 = arith.constant 0 : index
    %42 = arith.index_cast %41 : i32 to index
    %c1_41 = arith.constant 1 : index
    %c0_42 = arith.constant 0 : index
    %43 = vector.load %arg2[%c0_39, %c0_40, %42, %c1_41, %c0_42] : memref<1x1x6x6x32xbf16, #tpu.memory_space<vmem>>, vector<1x1x1x3x32xbf16>
    %44 = vector.shape_cast %43 : vector<1x1x1x3x32xbf16> to vector<3x32xbf16>
    %c5 = arith.constant 5 : index
    %c0_43 = arith.constant 0 : index
    %c0_44 = arith.constant 0 : index
    %45 = vector.load %arg3[%c5, %c0_43, %c0_44] : memref<16x32x128xbf16, #tpu.memory_space<vmem>>, vector<1x32x128xbf16>
    %46 = vector.shape_cast %45 : vector<1x32x128xbf16> to vector<32x128xbf16>
    %cst_45 = arith.constant dense<0.000000e+00> : vector<3x128xf32>
    %47 = tpu.matmul %44, %46, %cst_45 {dimension_numbers = #tpu.dot_dimension_numbers<[1], [0], [0], [1], [0, 0, 1, 1], [], []>} : vector<3x32xbf16>, vector<32x128xbf16>, vector<3x128xf32> -> vector<3x128xf32>
    %48 = arith.addf %40, %47 : vector<3x128xf32>
    %c1_i32_46 = arith.constant 1 : i32
    %49 = arith.addi %arg1, %c1_i32_46 : i32
    %c0_47 = arith.constant 0 : index
    %c0_48 = arith.constant 0 : index
    %50 = arith.index_cast %49 : i32 to index
    %c2_49 = arith.constant 2 : index
    %c0_50 = arith.constant 0 : index
    %51 = vector.load %arg2[%c0_47, %c0_48, %50, %c2_49, %c0_50] : memref<1x1x6x6x32xbf16, #tpu.memory_space<vmem>>, vector<1x1x1x3x32xbf16>
    %52 = vector.shape_cast %51 : vector<1x1x1x3x32xbf16> to vector<3x32xbf16>
    %c6 = arith.constant 6 : index
    %c0_51 = arith.constant 0 : index
    %c0_52 = arith.constant 0 : index
    %53 = vector.load %arg3[%c6, %c0_51, %c0_52] : memref<16x32x128xbf16, #tpu.memory_space<vmem>>, vector<1x32x128xbf16>
    %54 = vector.shape_cast %53 : vector<1x32x128xbf16> to vector<32x128xbf16>
    %cst_53 = arith.constant dense<0.000000e+00> : vector<3x128xf32>
    %55 = tpu.matmul %52, %54, %cst_53 {dimension_numbers = #tpu.dot_dimension_numbers<[1], [0], [0], [1], [0, 0, 1, 1], [], []>} : vector<3x32xbf16>, vector<32x128xbf16>, vector<3x128xf32> -> vector<3x128xf32>
    %56 = arith.addf %48, %55 : vector<3x128xf32>
    %c1_i32_54 = arith.constant 1 : i32
    %57 = arith.addi %arg1, %c1_i32_54 : i32
    %c0_55 = arith.constant 0 : index
    %c0_56 = arith.constant 0 : index
    %58 = arith.index_cast %57 : i32 to index
    %c3_57 = arith.constant 3 : index
    %c0_58 = arith.constant 0 : index
    %59 = vector.load %arg2[%c0_55, %c0_56, %58, %c3_57, %c0_58] : memref<1x1x6x6x32xbf16, #tpu.memory_space<vmem>>, vector<1x1x1x3x32xbf16>
    %60 = vector.shape_cast %59 : vector<1x1x1x3x32xbf16> to vector<3x32xbf16>
    %c7 = arith.constant 7 : index
    %c0_59 = arith.constant 0 : index
    %c0_60 = arith.constant 0 : index
    %61 = vector.load %arg3[%c7, %c0_59, %c0_60] : memref<16x32x128xbf16, #tpu.memory_space<vmem>>, vector<1x32x128xbf16>
    %62 = vector.shape_cast %61 : vector<1x32x128xbf16> to vector<32x128xbf16>
    %cst_61 = arith.constant dense<0.000000e+00> : vector<3x128xf32>
    %63 = tpu.matmul %60, %62, %cst_61 {dimension_numbers = #tpu.dot_dimension_numbers<[1], [0], [0], [1], [0, 0, 1, 1], [], []>} : vector<3x32xbf16>, vector<32x128xbf16>, vector<3x128xf32> -> vector<3x128xf32>
    %64 = arith.addf %56, %63 : vector<3x128xf32>
    %c2_i32 = arith.constant 2 : i32
    %65 = arith.addi %arg1, %c2_i32 : i32
    %c0_62 = arith.constant 0 : index
    %c0_63 = arith.constant 0 : index
    %66 = arith.index_cast %65 : i32 to index
    %c0_64 = arith.constant 0 : index
    %c0_65 = arith.constant 0 : index
    %67 = vector.load %arg2[%c0_62, %c0_63, %66, %c0_64, %c0_65] : memref<1x1x6x6x32xbf16, #tpu.memory_space<vmem>>, vector<1x1x1x3x32xbf16>
    %68 = vector.shape_cast %67 : vector<1x1x1x3x32xbf16> to vector<3x32xbf16>
    %c8 = arith.constant 8 : index
    %c0_66 = arith.constant 0 : index
    %c0_67 = arith.constant 0 : index
    %69 = vector.load %arg3[%c8, %c0_66, %c0_67] : memref<16x32x128xbf16, #tpu.memory_space<vmem>>, vector<1x32x128xbf16>
    %70 = vector.shape_cast %69 : vector<1x32x128xbf16> to vector<32x128xbf16>
    %cst_68 = arith.constant dense<0.000000e+00> : vector<3x128xf32>
    %71 = tpu.matmul %68, %70, %cst_68 {dimension_numbers = #tpu.dot_dimension_numbers<[1], [0], [0], [1], [0, 0, 1, 1], [], []>} : vector<3x32xbf16>, vector<32x128xbf16>, vector<3x128xf32> -> vector<3x128xf32>
    %72 = arith.addf %64, %71 : vector<3x128xf32>
    %c2_i32_69 = arith.constant 2 : i32
    %73 = arith.addi %arg1, %c2_i32_69 : i32
    %c0_70 = arith.constant 0 : index
    %c0_71 = arith.constant 0 : index
    %74 = arith.index_cast %73 : i32 to index
    %c1_72 = arith.constant 1 : index
    %c0_73 = arith.constant 0 : index
    %75 = vector.load %arg2[%c0_70, %c0_71, %74, %c1_72, %c0_73] : memref<1x1x6x6x32xbf16, #tpu.memory_space<vmem>>, vector<1x1x1x3x32xbf16>
    %76 = vector.shape_cast %75 : vector<1x1x1x3x32xbf16> to vector<3x32xbf16>
    %c9 = arith.constant 9 : index
    %c0_74 = arith.constant 0 : index
    %c0_75 = arith.constant 0 : index
    %77 = vector.load %arg3[%c9, %c0_74, %c0_75] : memref<16x32x128xbf16, #tpu.memory_space<vmem>>, vector<1x32x128xbf16>
    %78 = vector.shape_cast %77 : vector<1x32x128xbf16> to vector<32x128xbf16>
    %cst_76 = arith.constant dense<0.000000e+00> : vector<3x128xf32>
    %79 = tpu.matmul %76, %78, %cst_76 {dimension_numbers = #tpu.dot_dimension_numbers<[1], [0], [0], [1], [0, 0, 1, 1], [], []>} : vector<3x32xbf16>, vector<32x128xbf16>, vector<3x128xf32> -> vector<3x128xf32>
    %80 = arith.addf %72, %79 : vector<3x128xf32>
    %c2_i32_77 = arith.constant 2 : i32
    %81 = arith.addi %arg1, %c2_i32_77 : i32
    %c0_78 = arith.constant 0 : index
    %c0_79 = arith.constant 0 : index
    %82 = arith.index_cast %81 : i32 to index
    %c2_80 = arith.constant 2 : index
    %c0_81 = arith.constant 0 : index
    %83 = vector.load %arg2[%c0_78, %c0_79, %82, %c2_80, %c0_81] : memref<1x1x6x6x32xbf16, #tpu.memory_space<vmem>>, vector<1x1x1x3x32xbf16>
    %84 = vector.shape_cast %83 : vector<1x1x1x3x32xbf16> to vector<3x32xbf16>
    %c10 = arith.constant 10 : index
    %c0_82 = arith.constant 0 : index
    %c0_83 = arith.constant 0 : index
    %85 = vector.load %arg3[%c10, %c0_82, %c0_83] : memref<16x32x128xbf16, #tpu.memory_space<vmem>>, vector<1x32x128xbf16>
    %86 = vector.shape_cast %85 : vector<1x32x128xbf16> to vector<32x128xbf16>
    %cst_84 = arith.constant dense<0.000000e+00> : vector<3x128xf32>
    %87 = tpu.matmul %84, %86, %cst_84 {dimension_numbers = #tpu.dot_dimension_numbers<[1], [0], [0], [1], [0, 0, 1, 1], [], []>} : vector<3x32xbf16>, vector<32x128xbf16>, vector<3x128xf32> -> vector<3x128xf32>
    %88 = arith.addf %80, %87 : vector<3x128xf32>
    %c2_i32_85 = arith.constant 2 : i32
    %89 = arith.addi %arg1, %c2_i32_85 : i32
    %c0_86 = arith.constant 0 : index
    %c0_87 = arith.constant 0 : index
    %90 = arith.index_cast %89 : i32 to index
    %c3_88 = arith.constant 3 : index
    %c0_89 = arith.constant 0 : index
    %91 = vector.load %arg2[%c0_86, %c0_87, %90, %c3_88, %c0_89] : memref<1x1x6x6x32xbf16, #tpu.memory_space<vmem>>, vector<1x1x1x3x32xbf16>
    %92 = vector.shape_cast %91 : vector<1x1x1x3x32xbf16> to vector<3x32xbf16>
    %c11 = arith.constant 11 : index
    %c0_90 = arith.constant 0 : index
    %c0_91 = arith.constant 0 : index
    %93 = vector.load %arg3[%c11, %c0_90, %c0_91] : memref<16x32x128xbf16, #tpu.memory_space<vmem>>, vector<1x32x128xbf16>
    %94 = vector.shape_cast %93 : vector<1x32x128xbf16> to vector<32x128xbf16>
    %cst_92 = arith.constant dense<0.000000e+00> : vector<3x128xf32>
    %95 = tpu.matmul %92, %94, %cst_92 {dimension_numbers = #tpu.dot_dimension_numbers<[1], [0], [0], [1], [0, 0, 1, 1], [], []>} : vector<3x32xbf16>, vector<32x128xbf16>, vector<3x128xf32> -> vector<3x128xf32>
    %96 = arith.addf %88, %95 : vector<3x128xf32>
    %c3_i32 = arith.constant 3 : i32
    %97 = arith.addi %arg1, %c3_i32 : i32
    %c0_93 = arith.constant 0 : index
    %c0_94 = arith.constant 0 : index
    %98 = arith.index_cast %97 : i32 to index
    %c0_95 = arith.constant 0 : index
    %c0_96 = arith.constant 0 : index
    %99 = vector.load %arg2[%c0_93, %c0_94, %98, %c0_95, %c0_96] : memref<1x1x6x6x32xbf16, #tpu.memory_space<vmem>>, vector<1x1x1x3x32xbf16>
    %100 = vector.shape_cast %99 : vector<1x1x1x3x32xbf16> to vector<3x32xbf16>
    %c12 = arith.constant 12 : index
    %c0_97 = arith.constant 0 : index
    %c0_98 = arith.constant 0 : index
    %101 = vector.load %arg3[%c12, %c0_97, %c0_98] : memref<16x32x128xbf16, #tpu.memory_space<vmem>>, vector<1x32x128xbf16>
    %102 = vector.shape_cast %101 : vector<1x32x128xbf16> to vector<32x128xbf16>
    %cst_99 = arith.constant dense<0.000000e+00> : vector<3x128xf32>
    %103 = tpu.matmul %100, %102, %cst_99 {dimension_numbers = #tpu.dot_dimension_numbers<[1], [0], [0], [1], [0, 0, 1, 1], [], []>} : vector<3x32xbf16>, vector<32x128xbf16>, vector<3x128xf32> -> vector<3x128xf32>
    %104 = arith.addf %96, %103 : vector<3x128xf32>
    %c3_i32_100 = arith.constant 3 : i32
    %105 = arith.addi %arg1, %c3_i32_100 : i32
    %c0_101 = arith.constant 0 : index
    %c0_102 = arith.constant 0 : index
    %106 = arith.index_cast %105 : i32 to index
    %c1_103 = arith.constant 1 : index
    %c0_104 = arith.constant 0 : index
    %107 = vector.load %arg2[%c0_101, %c0_102, %106, %c1_103, %c0_104] : memref<1x1x6x6x32xbf16, #tpu.memory_space<vmem>>, vector<1x1x1x3x32xbf16>
    %108 = vector.shape_cast %107 : vector<1x1x1x3x32xbf16> to vector<3x32xbf16>
    %c13 = arith.constant 13 : index
    %c0_105 = arith.constant 0 : index
    %c0_106 = arith.constant 0 : index
    %109 = vector.load %arg3[%c13, %c0_105, %c0_106] : memref<16x32x128xbf16, #tpu.memory_space<vmem>>, vector<1x32x128xbf16>
    %110 = vector.shape_cast %109 : vector<1x32x128xbf16> to vector<32x128xbf16>
    %cst_107 = arith.constant dense<0.000000e+00> : vector<3x128xf32>
    %111 = tpu.matmul %108, %110, %cst_107 {dimension_numbers = #tpu.dot_dimension_numbers<[1], [0], [0], [1], [0, 0, 1, 1], [], []>} : vector<3x32xbf16>, vector<32x128xbf16>, vector<3x128xf32> -> vector<3x128xf32>
    %112 = arith.addf %104, %111 : vector<3x128xf32>
    %c3_i32_108 = arith.constant 3 : i32
    %113 = arith.addi %arg1, %c3_i32_108 : i32
    %c0_109 = arith.constant 0 : index
    %c0_110 = arith.constant 0 : index
    %114 = arith.index_cast %113 : i32 to index
    %c2_111 = arith.constant 2 : index
    %c0_112 = arith.constant 0 : index
    %115 = vector.load %arg2[%c0_109, %c0_110, %114, %c2_111, %c0_112] : memref<1x1x6x6x32xbf16, #tpu.memory_space<vmem>>, vector<1x1x1x3x32xbf16>
    %116 = vector.shape_cast %115 : vector<1x1x1x3x32xbf16> to vector<3x32xbf16>
    %c14 = arith.constant 14 : index
    %c0_113 = arith.constant 0 : index
    %c0_114 = arith.constant 0 : index
    %117 = vector.load %arg3[%c14, %c0_113, %c0_114] : memref<16x32x128xbf16, #tpu.memory_space<vmem>>, vector<1x32x128xbf16>
    %118 = vector.shape_cast %117 : vector<1x32x128xbf16> to vector<32x128xbf16>
    %cst_115 = arith.constant dense<0.000000e+00> : vector<3x128xf32>
    %119 = tpu.matmul %116, %118, %cst_115 {dimension_numbers = #tpu.dot_dimension_numbers<[1], [0], [0], [1], [0, 0, 1, 1], [], []>} : vector<3x32xbf16>, vector<32x128xbf16>, vector<3x128xf32> -> vector<3x128xf32>
    %120 = arith.addf %112, %119 : vector<3x128xf32>
    %c3_i32_116 = arith.constant 3 : i32
    %121 = arith.addi %arg1, %c3_i32_116 : i32
    %c0_117 = arith.constant 0 : index
    %c0_118 = arith.constant 0 : index
    %122 = arith.index_cast %121 : i32 to index
    %c3_119 = arith.constant 3 : index
    %c0_120 = arith.constant 0 : index
    %123 = vector.load %arg2[%c0_117, %c0_118, %122, %c3_119, %c0_120] : memref<1x1x6x6x32xbf16, #tpu.memory_space<vmem>>, vector<1x1x1x3x32xbf16>
    %124 = vector.shape_cast %123 : vector<1x1x1x3x32xbf16> to vector<3x32xbf16>
    %c15 = arith.constant 15 : index
    %c0_121 = arith.constant 0 : index
    %c0_122 = arith.constant 0 : index
    %125 = vector.load %arg3[%c15, %c0_121, %c0_122] : memref<16x32x128xbf16, #tpu.memory_space<vmem>>, vector<1x32x128xbf16>
    %126 = vector.shape_cast %125 : vector<1x32x128xbf16> to vector<32x128xbf16>
    %cst_123 = arith.constant dense<0.000000e+00> : vector<3x128xf32>
    %127 = tpu.matmul %124, %126, %cst_123 {dimension_numbers = #tpu.dot_dimension_numbers<[1], [0], [0], [1], [0, 0, 1, 1], [], []>} : vector<3x32xbf16>, vector<32x128xbf16>, vector<3x128xf32> -> vector<3x128xf32>
    %128 = arith.addf %120, %127 : vector<3x128xf32>
    %cst_124 = arith.constant dense<0.000000e+00> : vector<128xf32>
    %129 = vector.multi_reduction <add>, %128, %cst_124 [0] : vector<3x128xf32> to vector<128xf32>
    %130 = vector.shape_cast %129 : vector<128xf32> to vector<1x128xf32>
    %131 = arith.mulf %128, %128 : vector<3x128xf32>
    %cst_125 = arith.constant dense<0.000000e+00> : vector<128xf32>
    %132 = vector.multi_reduction <add>, %131, %cst_125 [0] : vector<3x128xf32> to vector<128xf32>
    %133 = vector.shape_cast %132 : vector<128xf32> to vector<1x128xf32>
    %134 = tpu.concatenate %130, %133 in 0 : vector<1x128xf32>, vector<1x128xf32> -> vector<2x128xf32>
    %c0_126 = arith.constant 0 : index
    %c0_127 = arith.constant 0 : index
    %c0_128 = arith.constant 0 : index
    %c0_129 = arith.constant 0 : index
    %135 = vector.load %arg5[%c0_126, %c0_127, %c0_128, %c0_129] : memref<1x1x2x128xf32, #tpu.memory_space<vmem>>, vector<1x1x2x128xf32>
    %136 = vector.shape_cast %135 : vector<1x1x2x128xf32> to vector<2x128xf32>
    %137 = vector.shape_cast %134 : vector<2x128xf32> to vector<1x1x2x128xf32>
    tpu.vector_store %arg5[%c0_126, %c0_127, %c0_128, %c0_129], %137 {strides = array<i32>} : memref<1x1x2x128xf32, #tpu.memory_space<vmem>>, vector<1x1x2x128xf32>,
    %c0_130 = arith.constant 0 : index
    %c0_131 = arith.constant 0 : index
    %c0_132 = arith.constant 0 : index
    %c0_133 = arith.constant 0 : index
    %138 = vector.load %arg4[%c0_130, %c0_131, %c0_132, %c0_133] : memref<1x1x3x128xf32, #tpu.memory_space<vmem>>, vector<1x1x3x128xf32>
    %139 = vector.shape_cast %138 : vector<1x1x3x128xf32> to vector<3x128xf32>
    %140 = vector.shape_cast %128 : vector<3x128xf32> to vector<1x1x3x128xf32>
    tpu.vector_store %arg4[%c0_130, %c0_131, %c0_132, %c0_133], %140 {strides = array<i32>} : memref<1x1x3x128xf32, #tpu.memory_space<vmem>>, vector<1x1x3x128xf32>,
    return
  }
  func.func @transform_0(%arg0: i32, %arg1: i32) -> (i32, i32, i32, i32, i32) {
    %c0_i32 = arith.constant 0 : i32
    %c0_i32_0 = arith.constant 0 : i32
    %c0_i32_1 = arith.constant 0 : i32
    %c0_i32_2 = arith.constant 0 : i32
    %c0_i32_3 = arith.constant 0 : i32
    return %arg0, %c0_i32, %c0_i32_0, %c0_i32_1, %c0_i32_2 : i32, i32, i32, i32, i32
  }
  func.func @transform_1(%arg0: i32, %arg1: i32) -> (i32, i32, i32) {
    %c0_i32 = arith.constant 0 : i32
    %c0_i32_0 = arith.constant 0 : i32
    %c0_i32_1 = arith.constant 0 : i32
    %c0_i32_2 = arith.constant 0 : i32
    return %c0_i32, %c0_i32_0, %c0_i32_1 : i32, i32, i32
  }
  func.func @transform_2(%arg0: i32, %arg1: i32) -> (i32, i32, i32, i32) {
    %c0_i32 = arith.constant 0 : i32
    %c0_i32_0 = arith.constant 0 : i32
    %c0_i32_1 = arith.constant 0 : i32
    return %arg0, %arg1, %c0_i32, %c0_i32_0 : i32, i32, i32, i32
  }
  func.func @transform_3(%arg0: i32, %arg1: i32) -> (i32, i32, i32, i32) {
    %c0_i32 = arith.constant 0 : i32
    %c0_i32_0 = arith.constant 0 : i32
    %c0_i32_1 = arith.constant 0 : i32
    return %arg0, %arg1, %c0_i32, %c0_i32_0 : i32, i32, i32, i32
  }
}

module attributes {stable_mosaic.version = 11 : i64} {
  func.func @kernel(%arg0: i32, %arg1: i32, %arg2: memref<1x3x3x128xf32, #tpu.memory_space<vmem>>, %arg3: memref<1x1x1x128xf32, #tpu.memory_space<vmem>>, %arg4: memref<1x1x1x128xf32, #tpu.memory_space<vmem>>, %arg5: memref<1x3x3x128xbf16, #tpu.memory_space<vmem>>) attributes {dimension_semantics = [#tpu.dimension_semantics<parallel>, #tpu.dimension_semantics<parallel>], iteration_bounds = array<i64: 2, 1>, scalar_prefetch = 0 : i64, scratch_operands = 0 : i64, tpu.core_type = #tpu.core_type<tc>, window_params = [{transform_indices = @transform_0, window_bounds = array<i64: 1, 3, 3, 128>}, {pipeline_mode = #tpu.pipeline_mode<synchronous>, transform_indices = @transform_1, window_bounds = array<i64: 1, 1, 1, 128>}, {pipeline_mode = #tpu.pipeline_mode<synchronous>, transform_indices = @transform_2, window_bounds = array<i64: 1, 1, 1, 128>}, {transform_indices = @transform_3, window_bounds = array<i64: 1, 3, 3, 128>}]} {
    %c0 = arith.constant 0 : index
    %c0_0 = arith.constant 0 : index
    %c0_1 = arith.constant 0 : index
    %c0_2 = arith.constant 0 : index
    %0 = vector.load %arg2[%c0, %c0_0, %c0_1, %c0_2] : memref<1x3x3x128xf32, #tpu.memory_space<vmem>>, vector<1x3x3x128xf32>
    %c0_3 = arith.constant 0 : index
    %c0_4 = arith.constant 0 : index
    %c0_5 = arith.constant 0 : index
    %c0_6 = arith.constant 0 : index
    %1 = vector.load %arg3[%c0_3, %c0_4, %c0_5, %c0_6] : memref<1x1x1x128xf32, #tpu.memory_space<vmem>>, vector<1x1x1x128xf32>
    %2 = vector.broadcast %1 : vector<1x1x1x128xf32> to vector<1x3x3x128xf32>
    %3 = arith.mulf %0, %2 : vector<1x3x3x128xf32>
    %c0_7 = arith.constant 0 : index
    %c0_8 = arith.constant 0 : index
    %c0_9 = arith.constant 0 : index
    %c0_10 = arith.constant 0 : index
    %4 = vector.load %arg4[%c0_7, %c0_8, %c0_9, %c0_10] : memref<1x1x1x128xf32, #tpu.memory_space<vmem>>, vector<1x1x1x128xf32>
    %5 = vector.broadcast %4 : vector<1x1x1x128xf32> to vector<1x3x3x128xf32>
    %6 = arith.addf %3, %5 : vector<1x3x3x128xf32>
    %cst = arith.constant 0.000000e+00 : f32
    %7 = vector.broadcast %cst : f32 to vector<1x3x3x128xf32>
    %8 = arith.cmpf ogt, %6, %7 : vector<1x3x3x128xf32>
    %cst_11 = arith.constant 2.000000e-01 : f32
    %9 = vector.broadcast %cst_11 : f32 to vector<1x3x3x128xf32>
    %10 = arith.mulf %9, %6 : vector<1x3x3x128xf32>
    %11 = arith.select %8, %6, %10 : vector<1x3x3x128xi1>, vector<1x3x3x128xf32>
    %12 = arith.truncf %11 : vector<1x3x3x128xf32> to vector<1x3x3x128xbf16>
    %c0_12 = arith.constant 0 : index
    %c0_13 = arith.constant 0 : index
    %c0_14 = arith.constant 0 : index
    %c0_15 = arith.constant 0 : index
    %13 = vector.load %arg5[%c0_12, %c0_13, %c0_14, %c0_15] : memref<1x3x3x128xbf16, #tpu.memory_space<vmem>>, vector<1x3x3x128xbf16>
    tpu.vector_store %arg5[%c0_12, %c0_13, %c0_14, %c0_15], %12 {strides = array<i32>} : memref<1x3x3x128xbf16, #tpu.memory_space<vmem>>, vector<1x3x3x128xbf16>,
    return
  }
  func.func @transform_0(%arg0: i32, %arg1: i32) -> (i32, i32, i32, i32) {
    %c0_i32 = arith.constant 0 : i32
    %c0_i32_0 = arith.constant 0 : i32
    %c0_i32_1 = arith.constant 0 : i32
    return %arg0, %arg1, %c0_i32, %c0_i32_0 : i32, i32, i32, i32
  }
  func.func @transform_1(%arg0: i32, %arg1: i32) -> (i32, i32, i32, i32) {
    %c0_i32 = arith.constant 0 : i32
    %c0_i32_0 = arith.constant 0 : i32
    %c0_i32_1 = arith.constant 0 : i32
    %c0_i32_2 = arith.constant 0 : i32
    %c0_i32_3 = arith.constant 0 : i32
    return %c0_i32, %c0_i32_0, %c0_i32_1, %c0_i32_2 : i32, i32, i32, i32
  }
  func.func @transform_2(%arg0: i32, %arg1: i32) -> (i32, i32, i32, i32) {
    %c0_i32 = arith.constant 0 : i32
    %c0_i32_0 = arith.constant 0 : i32
    %c0_i32_1 = arith.constant 0 : i32
    %c0_i32_2 = arith.constant 0 : i32
    %c0_i32_3 = arith.constant 0 : i32
    return %c0_i32, %c0_i32_0, %c0_i32_1, %c0_i32_2 : i32, i32, i32, i32
  }
  func.func @transform_3(%arg0: i32, %arg1: i32) -> (i32, i32, i32, i32) {
    %c0_i32 = arith.constant 0 : i32
    %c0_i32_0 = arith.constant 0 : i32
    %c0_i32_1 = arith.constant 0 : i32
    return %arg0, %arg1, %c0_i32, %c0_i32_0 : i32, i32, i32, i32
  }
}

module attributes {stable_mosaic.version = 11 : i64} {
  func.func @kernel(%arg0: i32, %arg1: i32, %arg2: memref<1x1x5x5x64xbf16, #tpu.memory_space<vmem>>, %arg3: memref<16x64x128xbf16, #tpu.memory_space<vmem>>, %arg4: memref<1x128xf32, #tpu.memory_space<vmem>>, %arg5: memref<1x1x2x128xf32, #tpu.memory_space<vmem>>) attributes {dimension_semantics = [#tpu.dimension_semantics<parallel>, #tpu.dimension_semantics<parallel>], iteration_bounds = array<i64: 2, 2>, scalar_prefetch = 0 : i64, scratch_operands = 0 : i64, tpu.core_type = #tpu.core_type<tc>, window_params = [{transform_indices = @transform_0, window_bounds = array<i64: 1, 1, 5, 5, 64>}, {pipeline_mode = #tpu.pipeline_mode<synchronous>, transform_indices = @transform_1, window_bounds = array<i64: 16, 64, 128>}, {pipeline_mode = #tpu.pipeline_mode<synchronous>, transform_indices = @transform_2, window_bounds = array<i64: 1, 128>}, {transform_indices = @transform_3, window_bounds = array<i64: 1, 1, 2, 128>}]} {
    %cst = arith.constant 0.000000e+00 : f32
    %0 = vector.broadcast %cst : f32 to vector<2x128xf32>
    %c0_i32 = arith.constant 0 : i32
    %1 = arith.addi %arg1, %c0_i32 : i32
    %c0 = arith.constant 0 : index
    %c0_0 = arith.constant 0 : index
    %2 = arith.index_cast %1 : i32 to index
    %c0_1 = arith.constant 0 : index
    %c0_2 = arith.constant 0 : index
    %3 = vector.load %arg2[%c0, %c0_0, %2, %c0_1, %c0_2] : memref<1x1x5x5x64xbf16, #tpu.memory_space<vmem>>, vector<1x1x1x2x64xbf16>
    %4 = vector.shape_cast %3 : vector<1x1x1x2x64xbf16> to vector<2x64xbf16>
    %c0_3 = arith.constant 0 : index
    %c0_4 = arith.constant 0 : index
    %c0_5 = arith.constant 0 : index
    %5 = vector.load %arg3[%c0_3, %c0_4, %c0_5] : memref<16x64x128xbf16, #tpu.memory_space<vmem>>, vector<1x64x128xbf16>
    %6 = vector.shape_cast %5 : vector<1x64x128xbf16> to vector<64x128xbf16>
    %cst_6 = arith.constant dense<0.000000e+00> : vector<2x128xf32>
    %7 = tpu.matmul %4, %6, %cst_6 {dimension_numbers = #tpu.dot_dimension_numbers<[1], [0], [0], [1], [0, 0, 1, 1], [], []>} : vector<2x64xbf16>, vector<64x128xbf16>, vector<2x128xf32> -> vector<2x128xf32>
    %8 = arith.addf %0, %7 : vector<2x128xf32>
    %c0_i32_7 = arith.constant 0 : i32
    %9 = arith.addi %arg1, %c0_i32_7 : i32
    %c0_8 = arith.constant 0 : index
    %c0_9 = arith.constant 0 : index
    %10 = arith.index_cast %9 : i32 to index
    %c1 = arith.constant 1 : index
    %c0_10 = arith.constant 0 : index
    %11 = vector.load %arg2[%c0_8, %c0_9, %10, %c1, %c0_10] : memref<1x1x5x5x64xbf16, #tpu.memory_space<vmem>>, vector<1x1x1x2x64xbf16>
    %12 = vector.shape_cast %11 : vector<1x1x1x2x64xbf16> to vector<2x64xbf16>
    %c1_11 = arith.constant 1 : index
    %c0_12 = arith.constant 0 : index
    %c0_13 = arith.constant 0 : index
    %13 = vector.load %arg3[%c1_11, %c0_12, %c0_13] : memref<16x64x128xbf16, #tpu.memory_space<vmem>>, vector<1x64x128xbf16>
    %14 = vector.shape_cast %13 : vector<1x64x128xbf16> to vector<64x128xbf16>
    %cst_14 = arith.constant dense<0.000000e+00> : vector<2x128xf32>
    %15 = tpu.matmul %12, %14, %cst_14 {dimension_numbers = #tpu.dot_dimension_numbers<[1], [0], [0], [1], [0, 0, 1, 1], [], []>} : vector<2x64xbf16>, vector<64x128xbf16>, vector<2x128xf32> -> vector<2x128xf32>
    %16 = arith.addf %8, %15 : vector<2x128xf32>
    %c0_i32_15 = arith.constant 0 : i32
    %17 = arith.addi %arg1, %c0_i32_15 : i32
    %c0_16 = arith.constant 0 : index
    %c0_17 = arith.constant 0 : index
    %18 = arith.index_cast %17 : i32 to index
    %c2 = arith.constant 2 : index
    %c0_18 = arith.constant 0 : index
    %19 = vector.load %arg2[%c0_16, %c0_17, %18, %c2, %c0_18] : memref<1x1x5x5x64xbf16, #tpu.memory_space<vmem>>, vector<1x1x1x2x64xbf16>
    %20 = vector.shape_cast %19 : vector<1x1x1x2x64xbf16> to vector<2x64xbf16>
    %c2_19 = arith.constant 2 : index
    %c0_20 = arith.constant 0 : index
    %c0_21 = arith.constant 0 : index
    %21 = vector.load %arg3[%c2_19, %c0_20, %c0_21] : memref<16x64x128xbf16, #tpu.memory_space<vmem>>, vector<1x64x128xbf16>
    %22 = vector.shape_cast %21 : vector<1x64x128xbf16> to vector<64x128xbf16>
    %cst_22 = arith.constant dense<0.000000e+00> : vector<2x128xf32>
    %23 = tpu.matmul %20, %22, %cst_22 {dimension_numbers = #tpu.dot_dimension_numbers<[1], [0], [0], [1], [0, 0, 1, 1], [], []>} : vector<2x64xbf16>, vector<64x128xbf16>, vector<2x128xf32> -> vector<2x128xf32>
    %24 = arith.addf %16, %23 : vector<2x128xf32>
    %c0_i32_23 = arith.constant 0 : i32
    %25 = arith.addi %arg1, %c0_i32_23 : i32
    %c0_24 = arith.constant 0 : index
    %c0_25 = arith.constant 0 : index
    %26 = arith.index_cast %25 : i32 to index
    %c3 = arith.constant 3 : index
    %c0_26 = arith.constant 0 : index
    %27 = vector.load %arg2[%c0_24, %c0_25, %26, %c3, %c0_26] : memref<1x1x5x5x64xbf16, #tpu.memory_space<vmem>>, vector<1x1x1x2x64xbf16>
    %28 = vector.shape_cast %27 : vector<1x1x1x2x64xbf16> to vector<2x64xbf16>
    %c3_27 = arith.constant 3 : index
    %c0_28 = arith.constant 0 : index
    %c0_29 = arith.constant 0 : index
    %29 = vector.load %arg3[%c3_27, %c0_28, %c0_29] : memref<16x64x128xbf16, #tpu.memory_space<vmem>>, vector<1x64x128xbf16>
    %30 = vector.shape_cast %29 : vector<1x64x128xbf16> to vector<64x128xbf16>
    %cst_30 = arith.constant dense<0.000000e+00> : vector<2x128xf32>
    %31 = tpu.matmul %28, %30, %cst_30 {dimension_numbers = #tpu.dot_dimension_numbers<[1], [0], [0], [1], [0, 0, 1, 1], [], []>} : vector<2x64xbf16>, vector<64x128xbf16>, vector<2x128xf32> -> vector<2x128xf32>
    %32 = arith.addf %24, %31 : vector<2x128xf32>
    %c1_i32 = arith.constant 1 : i32
    %33 = arith.addi %arg1, %c1_i32 : i32
    %c0_31 = arith.constant 0 : index
    %c0_32 = arith.constant 0 : index
    %34 = arith.index_cast %33 : i32 to index
    %c0_33 = arith.constant 0 : index
    %c0_34 = arith.constant 0 : index
    %35 = vector.load %arg2[%c0_31, %c0_32, %34, %c0_33, %c0_34] : memref<1x1x5x5x64xbf16, #tpu.memory_space<vmem>>, vector<1x1x1x2x64xbf16>
    %36 = vector.shape_cast %35 : vector<1x1x1x2x64xbf16> to vector<2x64xbf16>
    %c4 = arith.constant 4 : index
    %c0_35 = arith.constant 0 : index
    %c0_36 = arith.constant 0 : index
    %37 = vector.load %arg3[%c4, %c0_35, %c0_36] : memref<16x64x128xbf16, #tpu.memory_space<vmem>>, vector<1x64x128xbf16>
    %38 = vector.shape_cast %37 : vector<1x64x128xbf16> to vector<64x128xbf16>
    %cst_37 = arith.constant dense<0.000000e+00> : vector<2x128xf32>
    %39 = tpu.matmul %36, %38, %cst_37 {dimension_numbers = #tpu.dot_dimension_numbers<[1], [0], [0], [1], [0, 0, 1, 1], [], []>} : vector<2x64xbf16>, vector<64x128xbf16>, vector<2x128xf32> -> vector<2x128xf32>
    %40 = arith.addf %32, %39 : vector<2x128xf32>
    %c1_i32_38 = arith.constant 1 : i32
    %41 = arith.addi %arg1, %c1_i32_38 : i32
    %c0_39 = arith.constant 0 : index
    %c0_40 = arith.constant 0 : index
    %42 = arith.index_cast %41 : i32 to index
    %c1_41 = arith.constant 1 : index
    %c0_42 = arith.constant 0 : index
    %43 = vector.load %arg2[%c0_39, %c0_40, %42, %c1_41, %c0_42] : memref<1x1x5x5x64xbf16, #tpu.memory_space<vmem>>, vector<1x1x1x2x64xbf16>
    %44 = vector.shape_cast %43 : vector<1x1x1x2x64xbf16> to vector<2x64xbf16>
    %c5 = arith.constant 5 : index
    %c0_43 = arith.constant 0 : index
    %c0_44 = arith.constant 0 : index
    %45 = vector.load %arg3[%c5, %c0_43, %c0_44] : memref<16x64x128xbf16, #tpu.memory_space<vmem>>, vector<1x64x128xbf16>
    %46 = vector.shape_cast %45 : vector<1x64x128xbf16> to vector<64x128xbf16>
    %cst_45 = arith.constant dense<0.000000e+00> : vector<2x128xf32>
    %47 = tpu.matmul %44, %46, %cst_45 {dimension_numbers = #tpu.dot_dimension_numbers<[1], [0], [0], [1], [0, 0, 1, 1], [], []>} : vector<2x64xbf16>, vector<64x128xbf16>, vector<2x128xf32> -> vector<2x128xf32>
    %48 = arith.addf %40, %47 : vector<2x128xf32>
    %c1_i32_46 = arith.constant 1 : i32
    %49 = arith.addi %arg1, %c1_i32_46 : i32
    %c0_47 = arith.constant 0 : index
    %c0_48 = arith.constant 0 : index
    %50 = arith.index_cast %49 : i32 to index
    %c2_49 = arith.constant 2 : index
    %c0_50 = arith.constant 0 : index
    %51 = vector.load %arg2[%c0_47, %c0_48, %50, %c2_49, %c0_50] : memref<1x1x5x5x64xbf16, #tpu.memory_space<vmem>>, vector<1x1x1x2x64xbf16>
    %52 = vector.shape_cast %51 : vector<1x1x1x2x64xbf16> to vector<2x64xbf16>
    %c6 = arith.constant 6 : index
    %c0_51 = arith.constant 0 : index
    %c0_52 = arith.constant 0 : index
    %53 = vector.load %arg3[%c6, %c0_51, %c0_52] : memref<16x64x128xbf16, #tpu.memory_space<vmem>>, vector<1x64x128xbf16>
    %54 = vector.shape_cast %53 : vector<1x64x128xbf16> to vector<64x128xbf16>
    %cst_53 = arith.constant dense<0.000000e+00> : vector<2x128xf32>
    %55 = tpu.matmul %52, %54, %cst_53 {dimension_numbers = #tpu.dot_dimension_numbers<[1], [0], [0], [1], [0, 0, 1, 1], [], []>} : vector<2x64xbf16>, vector<64x128xbf16>, vector<2x128xf32> -> vector<2x128xf32>
    %56 = arith.addf %48, %55 : vector<2x128xf32>
    %c1_i32_54 = arith.constant 1 : i32
    %57 = arith.addi %arg1, %c1_i32_54 : i32
    %c0_55 = arith.constant 0 : index
    %c0_56 = arith.constant 0 : index
    %58 = arith.index_cast %57 : i32 to index
    %c3_57 = arith.constant 3 : index
    %c0_58 = arith.constant 0 : index
    %59 = vector.load %arg2[%c0_55, %c0_56, %58, %c3_57, %c0_58] : memref<1x1x5x5x64xbf16, #tpu.memory_space<vmem>>, vector<1x1x1x2x64xbf16>
    %60 = vector.shape_cast %59 : vector<1x1x1x2x64xbf16> to vector<2x64xbf16>
    %c7 = arith.constant 7 : index
    %c0_59 = arith.constant 0 : index
    %c0_60 = arith.constant 0 : index
    %61 = vector.load %arg3[%c7, %c0_59, %c0_60] : memref<16x64x128xbf16, #tpu.memory_space<vmem>>, vector<1x64x128xbf16>
    %62 = vector.shape_cast %61 : vector<1x64x128xbf16> to vector<64x128xbf16>
    %cst_61 = arith.constant dense<0.000000e+00> : vector<2x128xf32>
    %63 = tpu.matmul %60, %62, %cst_61 {dimension_numbers = #tpu.dot_dimension_numbers<[1], [0], [0], [1], [0, 0, 1, 1], [], []>} : vector<2x64xbf16>, vector<64x128xbf16>, vector<2x128xf32> -> vector<2x128xf32>
    %64 = arith.addf %56, %63 : vector<2x128xf32>
    %c2_i32 = arith.constant 2 : i32
    %65 = arith.addi %arg1, %c2_i32 : i32
    %c0_62 = arith.constant 0 : index
    %c0_63 = arith.constant 0 : index
    %66 = arith.index_cast %65 : i32 to index
    %c0_64 = arith.constant 0 : index
    %c0_65 = arith.constant 0 : index
    %67 = vector.load %arg2[%c0_62, %c0_63, %66, %c0_64, %c0_65] : memref<1x1x5x5x64xbf16, #tpu.memory_space<vmem>>, vector<1x1x1x2x64xbf16>
    %68 = vector.shape_cast %67 : vector<1x1x1x2x64xbf16> to vector<2x64xbf16>
    %c8 = arith.constant 8 : index
    %c0_66 = arith.constant 0 : index
    %c0_67 = arith.constant 0 : index
    %69 = vector.load %arg3[%c8, %c0_66, %c0_67] : memref<16x64x128xbf16, #tpu.memory_space<vmem>>, vector<1x64x128xbf16>
    %70 = vector.shape_cast %69 : vector<1x64x128xbf16> to vector<64x128xbf16>
    %cst_68 = arith.constant dense<0.000000e+00> : vector<2x128xf32>
    %71 = tpu.matmul %68, %70, %cst_68 {dimension_numbers = #tpu.dot_dimension_numbers<[1], [0], [0], [1], [0, 0, 1, 1], [], []>} : vector<2x64xbf16>, vector<64x128xbf16>, vector<2x128xf32> -> vector<2x128xf32>
    %72 = arith.addf %64, %71 : vector<2x128xf32>
    %c2_i32_69 = arith.constant 2 : i32
    %73 = arith.addi %arg1, %c2_i32_69 : i32
    %c0_70 = arith.constant 0 : index
    %c0_71 = arith.constant 0 : index
    %74 = arith.index_cast %73 : i32 to index
    %c1_72 = arith.constant 1 : index
    %c0_73 = arith.constant 0 : index
    %75 = vector.load %arg2[%c0_70, %c0_71, %74, %c1_72, %c0_73] : memref<1x1x5x5x64xbf16, #tpu.memory_space<vmem>>, vector<1x1x1x2x64xbf16>
    %76 = vector.shape_cast %75 : vector<1x1x1x2x64xbf16> to vector<2x64xbf16>
    %c9 = arith.constant 9 : index
    %c0_74 = arith.constant 0 : index
    %c0_75 = arith.constant 0 : index
    %77 = vector.load %arg3[%c9, %c0_74, %c0_75] : memref<16x64x128xbf16, #tpu.memory_space<vmem>>, vector<1x64x128xbf16>
    %78 = vector.shape_cast %77 : vector<1x64x128xbf16> to vector<64x128xbf16>
    %cst_76 = arith.constant dense<0.000000e+00> : vector<2x128xf32>
    %79 = tpu.matmul %76, %78, %cst_76 {dimension_numbers = #tpu.dot_dimension_numbers<[1], [0], [0], [1], [0, 0, 1, 1], [], []>} : vector<2x64xbf16>, vector<64x128xbf16>, vector<2x128xf32> -> vector<2x128xf32>
    %80 = arith.addf %72, %79 : vector<2x128xf32>
    %c2_i32_77 = arith.constant 2 : i32
    %81 = arith.addi %arg1, %c2_i32_77 : i32
    %c0_78 = arith.constant 0 : index
    %c0_79 = arith.constant 0 : index
    %82 = arith.index_cast %81 : i32 to index
    %c2_80 = arith.constant 2 : index
    %c0_81 = arith.constant 0 : index
    %83 = vector.load %arg2[%c0_78, %c0_79, %82, %c2_80, %c0_81] : memref<1x1x5x5x64xbf16, #tpu.memory_space<vmem>>, vector<1x1x1x2x64xbf16>
    %84 = vector.shape_cast %83 : vector<1x1x1x2x64xbf16> to vector<2x64xbf16>
    %c10 = arith.constant 10 : index
    %c0_82 = arith.constant 0 : index
    %c0_83 = arith.constant 0 : index
    %85 = vector.load %arg3[%c10, %c0_82, %c0_83] : memref<16x64x128xbf16, #tpu.memory_space<vmem>>, vector<1x64x128xbf16>
    %86 = vector.shape_cast %85 : vector<1x64x128xbf16> to vector<64x128xbf16>
    %cst_84 = arith.constant dense<0.000000e+00> : vector<2x128xf32>
    %87 = tpu.matmul %84, %86, %cst_84 {dimension_numbers = #tpu.dot_dimension_numbers<[1], [0], [0], [1], [0, 0, 1, 1], [], []>} : vector<2x64xbf16>, vector<64x128xbf16>, vector<2x128xf32> -> vector<2x128xf32>
    %88 = arith.addf %80, %87 : vector<2x128xf32>
    %c2_i32_85 = arith.constant 2 : i32
    %89 = arith.addi %arg1, %c2_i32_85 : i32
    %c0_86 = arith.constant 0 : index
    %c0_87 = arith.constant 0 : index
    %90 = arith.index_cast %89 : i32 to index
    %c3_88 = arith.constant 3 : index
    %c0_89 = arith.constant 0 : index
    %91 = vector.load %arg2[%c0_86, %c0_87, %90, %c3_88, %c0_89] : memref<1x1x5x5x64xbf16, #tpu.memory_space<vmem>>, vector<1x1x1x2x64xbf16>
    %92 = vector.shape_cast %91 : vector<1x1x1x2x64xbf16> to vector<2x64xbf16>
    %c11 = arith.constant 11 : index
    %c0_90 = arith.constant 0 : index
    %c0_91 = arith.constant 0 : index
    %93 = vector.load %arg3[%c11, %c0_90, %c0_91] : memref<16x64x128xbf16, #tpu.memory_space<vmem>>, vector<1x64x128xbf16>
    %94 = vector.shape_cast %93 : vector<1x64x128xbf16> to vector<64x128xbf16>
    %cst_92 = arith.constant dense<0.000000e+00> : vector<2x128xf32>
    %95 = tpu.matmul %92, %94, %cst_92 {dimension_numbers = #tpu.dot_dimension_numbers<[1], [0], [0], [1], [0, 0, 1, 1], [], []>} : vector<2x64xbf16>, vector<64x128xbf16>, vector<2x128xf32> -> vector<2x128xf32>
    %96 = arith.addf %88, %95 : vector<2x128xf32>
    %c3_i32 = arith.constant 3 : i32
    %97 = arith.addi %arg1, %c3_i32 : i32
    %c0_93 = arith.constant 0 : index
    %c0_94 = arith.constant 0 : index
    %98 = arith.index_cast %97 : i32 to index
    %c0_95 = arith.constant 0 : index
    %c0_96 = arith.constant 0 : index
    %99 = vector.load %arg2[%c0_93, %c0_94, %98, %c0_95, %c0_96] : memref<1x1x5x5x64xbf16, #tpu.memory_space<vmem>>, vector<1x1x1x2x64xbf16>
    %100 = vector.shape_cast %99 : vector<1x1x1x2x64xbf16> to vector<2x64xbf16>
    %c12 = arith.constant 12 : index
    %c0_97 = arith.constant 0 : index
    %c0_98 = arith.constant 0 : index
    %101 = vector.load %arg3[%c12, %c0_97, %c0_98] : memref<16x64x128xbf16, #tpu.memory_space<vmem>>, vector<1x64x128xbf16>
    %102 = vector.shape_cast %101 : vector<1x64x128xbf16> to vector<64x128xbf16>
    %cst_99 = arith.constant dense<0.000000e+00> : vector<2x128xf32>
    %103 = tpu.matmul %100, %102, %cst_99 {dimension_numbers = #tpu.dot_dimension_numbers<[1], [0], [0], [1], [0, 0, 1, 1], [], []>} : vector<2x64xbf16>, vector<64x128xbf16>, vector<2x128xf32> -> vector<2x128xf32>
    %104 = arith.addf %96, %103 : vector<2x128xf32>
    %c3_i32_100 = arith.constant 3 : i32
    %105 = arith.addi %arg1, %c3_i32_100 : i32
    %c0_101 = arith.constant 0 : index
    %c0_102 = arith.constant 0 : index
    %106 = arith.index_cast %105 : i32 to index
    %c1_103 = arith.constant 1 : index
    %c0_104 = arith.constant 0 : index
    %107 = vector.load %arg2[%c0_101, %c0_102, %106, %c1_103, %c0_104] : memref<1x1x5x5x64xbf16, #tpu.memory_space<vmem>>, vector<1x1x1x2x64xbf16>
    %108 = vector.shape_cast %107 : vector<1x1x1x2x64xbf16> to vector<2x64xbf16>
    %c13 = arith.constant 13 : index
    %c0_105 = arith.constant 0 : index
    %c0_106 = arith.constant 0 : index
    %109 = vector.load %arg3[%c13, %c0_105, %c0_106] : memref<16x64x128xbf16, #tpu.memory_space<vmem>>, vector<1x64x128xbf16>
    %110 = vector.shape_cast %109 : vector<1x64x128xbf16> to vector<64x128xbf16>
    %cst_107 = arith.constant dense<0.000000e+00> : vector<2x128xf32>
    %111 = tpu.matmul %108, %110, %cst_107 {dimension_numbers = #tpu.dot_dimension_numbers<[1], [0], [0], [1], [0, 0, 1, 1], [], []>} : vector<2x64xbf16>, vector<64x128xbf16>, vector<2x128xf32> -> vector<2x128xf32>
    %112 = arith.addf %104, %111 : vector<2x128xf32>
    %c3_i32_108 = arith.constant 3 : i32
    %113 = arith.addi %arg1, %c3_i32_108 : i32
    %c0_109 = arith.constant 0 : index
    %c0_110 = arith.constant 0 : index
    %114 = arith.index_cast %113 : i32 to index
    %c2_111 = arith.constant 2 : index
    %c0_112 = arith.constant 0 : index
    %115 = vector.load %arg2[%c0_109, %c0_110, %114, %c2_111, %c0_112] : memref<1x1x5x5x64xbf16, #tpu.memory_space<vmem>>, vector<1x1x1x2x64xbf16>
    %116 = vector.shape_cast %115 : vector<1x1x1x2x64xbf16> to vector<2x64xbf16>
    %c14 = arith.constant 14 : index
    %c0_113 = arith.constant 0 : index
    %c0_114 = arith.constant 0 : index
    %117 = vector.load %arg3[%c14, %c0_113, %c0_114] : memref<16x64x128xbf16, #tpu.memory_space<vmem>>, vector<1x64x128xbf16>
    %118 = vector.shape_cast %117 : vector<1x64x128xbf16> to vector<64x128xbf16>
    %cst_115 = arith.constant dense<0.000000e+00> : vector<2x128xf32>
    %119 = tpu.matmul %116, %118, %cst_115 {dimension_numbers = #tpu.dot_dimension_numbers<[1], [0], [0], [1], [0, 0, 1, 1], [], []>} : vector<2x64xbf16>, vector<64x128xbf16>, vector<2x128xf32> -> vector<2x128xf32>
    %120 = arith.addf %112, %119 : vector<2x128xf32>
    %c3_i32_116 = arith.constant 3 : i32
    %121 = arith.addi %arg1, %c3_i32_116 : i32
    %c0_117 = arith.constant 0 : index
    %c0_118 = arith.constant 0 : index
    %122 = arith.index_cast %121 : i32 to index
    %c3_119 = arith.constant 3 : index
    %c0_120 = arith.constant 0 : index
    %123 = vector.load %arg2[%c0_117, %c0_118, %122, %c3_119, %c0_120] : memref<1x1x5x5x64xbf16, #tpu.memory_space<vmem>>, vector<1x1x1x2x64xbf16>
    %124 = vector.shape_cast %123 : vector<1x1x1x2x64xbf16> to vector<2x64xbf16>
    %c15 = arith.constant 15 : index
    %c0_121 = arith.constant 0 : index
    %c0_122 = arith.constant 0 : index
    %125 = vector.load %arg3[%c15, %c0_121, %c0_122] : memref<16x64x128xbf16, #tpu.memory_space<vmem>>, vector<1x64x128xbf16>
    %126 = vector.shape_cast %125 : vector<1x64x128xbf16> to vector<64x128xbf16>
    %cst_123 = arith.constant dense<0.000000e+00> : vector<2x128xf32>
    %127 = tpu.matmul %124, %126, %cst_123 {dimension_numbers = #tpu.dot_dimension_numbers<[1], [0], [0], [1], [0, 0, 1, 1], [], []>} : vector<2x64xbf16>, vector<64x128xbf16>, vector<2x128xf32> -> vector<2x128xf32>
    %128 = arith.addf %120, %127 : vector<2x128xf32>
    %c0_124 = arith.constant 0 : index
    %c0_125 = arith.constant 0 : index
    %129 = vector.load %arg4[%c0_124, %c0_125] : memref<1x128xf32, #tpu.memory_space<vmem>>, vector<1x128xf32>
    %130 = vector.broadcast %129 : vector<1x128xf32> to vector<2x128xf32>
    %131 = arith.addf %128, %130 : vector<2x128xf32>
    %c0_126 = arith.constant 0 : index
    %c0_127 = arith.constant 0 : index
    %c0_128 = arith.constant 0 : index
    %c0_129 = arith.constant 0 : index
    %132 = vector.load %arg5[%c0_126, %c0_127, %c0_128, %c0_129] : memref<1x1x2x128xf32, #tpu.memory_space<vmem>>, vector<1x1x2x128xf32>
    %133 = vector.shape_cast %132 : vector<1x1x2x128xf32> to vector<2x128xf32>
    %134 = vector.shape_cast %131 : vector<2x128xf32> to vector<1x1x2x128xf32>
    tpu.vector_store %arg5[%c0_126, %c0_127, %c0_128, %c0_129], %134 {strides = array<i32>} : memref<1x1x2x128xf32, #tpu.memory_space<vmem>>, vector<1x1x2x128xf32>,
    return
  }
  func.func @transform_0(%arg0: i32, %arg1: i32) -> (i32, i32, i32, i32, i32) {
    %c0_i32 = arith.constant 0 : i32
    %c0_i32_0 = arith.constant 0 : i32
    %c0_i32_1 = arith.constant 0 : i32
    %c0_i32_2 = arith.constant 0 : i32
    %c0_i32_3 = arith.constant 0 : i32
    return %arg0, %c0_i32, %c0_i32_0, %c0_i32_1, %c0_i32_2 : i32, i32, i32, i32, i32
  }
  func.func @transform_1(%arg0: i32, %arg1: i32) -> (i32, i32, i32) {
    %c0_i32 = arith.constant 0 : i32
    %c0_i32_0 = arith.constant 0 : i32
    %c0_i32_1 = arith.constant 0 : i32
    %c0_i32_2 = arith.constant 0 : i32
    return %c0_i32, %c0_i32_0, %c0_i32_1 : i32, i32, i32
  }
  func.func @transform_2(%arg0: i32, %arg1: i32) -> (i32, i32) {
    %c0_i32 = arith.constant 0 : i32
    %c0_i32_0 = arith.constant 0 : i32
    %c0_i32_1 = arith.constant 0 : i32
    return %c0_i32, %c0_i32_0 : i32, i32
  }
  func.func @transform_3(%arg0: i32, %arg1: i32) -> (i32, i32, i32, i32) {
    %c0_i32 = arith.constant 0 : i32
    %c0_i32_0 = arith.constant 0 : i32
    %c0_i32_1 = arith.constant 0 : i32
    return %arg0, %arg1, %c0_i32, %c0_i32_0 : i32, i32, i32, i32
  }
}

</mosaic_0001>

<bundles_post_ra>
// kernel: forward.8
= control target key start
LH: loop header
LB: loop body
LE: loop exit
PB: predicated region body
PF: predicated region fallthrough
CT: control target
= control target key end

     0   :  { %s1789_s12 = smov 0   ;;  %s1791_s13 = smov 0   ;;  %s2014_s0 = inlined_call_operand.vmem [shape: bf16[2,4,17,17,4], index: 0, kind: input, shape index: {}]   ;;  %s2015_s1 = inlined_call_operand.vmem [shape: bf16[16,4,128], index: 1, kind: input, shape index: {}]   ;;  %s2016_s2 = inlined_call_operand.vmem [shape: f32[1,128], index: 2, kind: input, shape index: {}]   ;;  %s2017_s3 = inlined_call_operand.vmem [shape: bf16[2,16,16,128], index: 3, kind: output, shape index: {}]  }
   0x1   :  { %s1793_s14 = smov 0   ;;  %s1795_s15 = smov 0  }
   0x2   :  { %s1797_s16 = smov 0  }
   0x3 LB: > { %s22_s17 = sadd.s32 1, %s1757_s14  ;;  %s25_s18 = sadd.s32 1, %s1761_s15  ;;  %s1765_s16 = sphi %s1797_s16, %s13_s16   ;;  %s1761_s15 = sphi %s1795_s15, %s2021_s15   ;;  %s1757_s14 = sphi %s1793_s14, %s2020_s14   ;;  %s1753_s13 = sphi %s1791_s13, %s2019_s13   ;;  %s1749_s12 = sphi %s1789_s12, %s2018_s12  }
   0x4   : > { %p23_p0 = scmp.ge.s32.totalorder %s22_s17, 16  ;;  %p1417_p1 = scmp.ge.s32.totalorder %s1765_s16, 1 }
   0x5   : > { %p151_p2 = scmp.lt.s32.totalorder %s1765_s16, 33 }
   0x6   : > { %s2023_s17 = smov (%p23_p0, %s22_s17), 0  ;;  %s2025_s18 = smov (!%p23_p0, %s25_s18), %s1761_s15 }
   0x7   : > { %p152_p3 = pnand %p1417_p1, %p151_p2  ;;  %p27_p4 = scmp.ge.s32.totalorder %s2025_s18, 2 }
   0x8   : > { %p179_p5 = scmp.lt.s32.totalorder (!%p152_p3), %s1753_s13, 1  ;;  %s1524_s23 = smul.u32 (!%p152_p3), 12, %s1749_s12 }
   0x9   : > { %s2027_s18 = smov (%p27_p4, %s2025_s18), 0  ;;  %155 = sbr.rel (%p152_p3) target bundleno = 286 (0x11e), region = 32 }
   0xa   : > { %p186_p6 = scmp.lt.s32.totalorder (!%p152_p3), %s1749_s12, 15 }
   0xe   : > { %v1426_v0 = vld [vmem:[%s2015_s1 + $0x2] sm:$0x3]  ;;  %vm216_vm0 = vcmask 1041408   ;;  %v199_v1 = vld [vmem:[%s2015_s1] sm:$0x3]  ;;  %v1767_v2 = vmov 0.0  }
   0xf   : > { %1564 = vmatprep.subr.bf16.mxu0 %v1767_v2  ;;  %v218_v3 = vsel %vm216_vm0, %v1426_v0, 0  ;;  %1570 = vmatprep.subr.bf16.mxu1 %v1767_v2  ;;  %v270_v4 = vsel %vm216_vm0, %v199_v1, 0  ;;  %vm1768_vm1 = vmmov 0   ;;  %s2029_s13 = smov (!%p179_p5, %s1753_s13), 1  ;;  %v1431_v5 = vld [vmem:[%s2015_s1 + $0x4] sm:$0x3] }
  0x10   : > { %1565 = vmatpush3.bf16.msra.mxu0 %v218_v3  ;;  %1571 = vmatpush3.bf16.msra.mxu1 %v270_v4  ;;  %s1660_s24 = smul.u32 816, %s2029_s13  ;;  %v1438_v6 = vld [vmem:[%s2015_s1 + $0x6] sm:$0x3]  ;;  %vm212_vm2 = vcmask 31744   ;;  %v343_v8 = vsel %vm216_vm0, %v1431_v5, 0  ;;  %s2031_s12 = smov (!%p186_p6, %s1749_s12), 15 }
  0x11   : > { %1566 = vmatprep.mubr.msk.bf16.mxu0 %vm1768_vm1, %v1767_v2  ;;  %1572 = vmatprep.mubr.msk.bf16.mxu1 %vm1768_vm1, %v1767_v2  ;;  %vm326_vm3 = vsmask.f32 7424  ;;  %v417_v10 = vsel %vm216_vm0, %v1438_v6, 0  ;;  %v1445_v18 = vld [vmem:[%s2015_s1 + $0x8] sm:$0x3]  ;;  %s1419_s19 = sshll.u32 %s2031_s12, 1 }
  0x12   : > { %1576 = vmatprep.subr.bf16.mxu0 %v1767_v2  ;;  %1582 = vmatprep.subr.bf16.mxu1 %v1767_v2  ;;  %s183_s29 = scalar_lea.vmem %s2014_s0, %s1660_s24  ;;  %v1451_v21 = vld [vmem:[%s2015_s1 + $0xa] sm:$0x3]  ;;  %v478_v30 = vsel %vm216_vm0, %v1445_v18, 0  ;;  %v1457_v35 = vld [vmem:[%s2015_s1 + $0xc] sm:$0x3]  ;;  %s1420_s20 = sshll.u32 %s2029_s13, 5 }
  0x13   : > { %s1850_s5 = scalar_lea.vmem %s183_s29, %s1524_s23  ;;  %v539_v33 = vsel %vm216_vm0, %v1451_v21, 0  ;;  %v1464_v39 = vld [vmem:[%s2015_s1 + $0xe] sm:$0x3]  ;;  %v613_v43 = vsel %vm216_vm0, %v1457_v35, 0  ;;  %v1470_v55 = vld [vmem:[%s2015_s1 + $0x10] sm:$0x3]  ;;  %s190_s21 = sadd.s32 %s1420_s20, %s1419_s19 }
  0x14   : > { %v1703_v7 = vld [vmem:[%s1850_s5 + $0xcc] sm:$0xff]   ;;  %v1704_v9 = vld [vmem:[%s1850_s5] sm:$0xff]   ;;  %v1706_v12 = vld [vmem:[%s1850_s5 + $0x8] ss:$0 sps:$4 sm:$0x11]   ;;  %v687_v50 = vsel %vm216_vm0, %v1464_v39, 0 }
  0x15   : > { %1567 = vmatmul.mubr.msk.bf16.vlgmr.msra.gmra.mxu0 %vm212_vm2, %v1703_v7  ;;  %1573 = vmatmul.mubr.msk.bf16.vlgmr.msra.gmra.mxu1 %vm212_vm2, %v1704_v9  ;;  %v1705_v11 = vld [vmem:[%s1850_s5] sm:$0xff]   ;;  %v1707_v13 = vld [vmem:[%s1850_s5 + $0xcc] sm:$0xff]   ;;  %v335_v16 = vshll.u32 %v1706_v12, 16  ;;  %v1708_v17 = vld [vmem:[%s1850_s5 + $0xd4] ss:$0 sps:$4 sm:$0x11]  }
  0x16   : > { %1577 = vmatpush3.bf16.msra.mxu0 %v343_v8  ;;  %1583 = vmatpush3.bf16.msra.mxu1 %v417_v10  ;;  %v328_v14 = vshrl.u32 %v1705_v11, 16  ;;  %v330_v15 = vshll.u32 %v1705_v11, 16  ;;  %v402_v19 = vshrl.u32 %v1707_v13, 16  ;;  %v404_v20 = vshll.u32 %v1707_v13, 16  ;;  %v1711_v28 = vld [vmem:[%s1850_s5 + $0x198] sm:$0xff]   ;;  %v1713_v31 = vld [vmem:[%s1850_s5 + $0x264] sm:$0xff]  }
  0x17   : > { %1578 = vmatprep.mubr.msk.bf16.mxu0 %vm1768_vm1, %v1767_v2  ;;  %1584 = vmatprep.mubr.msk.bf16.mxu1 %vm1768_vm1, %v1767_v2  ;;  %v337_v23 = vrot.slane %v335_v16, 1  ;;  %v409_v24 = vshll.u32 %v1708_v17, 16  ;;  %v1712_v36 = vld [vmem:[%s1850_s5 + $0x1a0] ss:$0 sps:$4 sm:$0x11]   ;;  %v600_v37 = vshll.u32 %v1711_v28, 16 }
  0x18   : > { %1588 = vmatprep.subr.bf16.mxu0 %v1767_v2  ;;  %1594 = vmatprep.subr.bf16.mxu1 %v1767_v2  ;;  %v332_v22 = vrot.slane %v330_v15, 1  ;;  %v406_v25 = vrot.slane %v404_v20, 1  ;;  %v1709_v38 = vld [vmem:[%s1850_s5 + $0x198] sm:$0xff]   ;;  %v1714_v40 = vld [vmem:[%s1850_s5 + $0x26c] ss:$0 sps:$4 sm:$0x11]  }
  0x19   : > { %v411_v27 = vrot.slane %v409_v24, 1  ;;  %v674_v41 = vshll.u32 %v1713_v31, 16  ;;  %v1710_v42 = vld [vmem:[%s1850_s5 + $0x264] sm:$0xff]   ;;  %v598_v44 = vshrl.u32 %v1711_v28, 16  ;;  %v602_v45 = vrot.slane %v600_v37, 1  ;;  %v1717_v58 = vld [vmem:[%s1850_s5 + $0xc] sm:$0xff]  }
  0x1a   : > { %v333_v26 = vor.u32 %v332_v22, %v328_v14  ;;  %v407_v29 = vor.u32 %v406_v25, %v402_v19  ;;  %v605_v46 = vshll.u32 %v1712_v36, 16  ;;  %v672_v47 = vshrl.u32 %v1713_v31, 16  ;;  %v1476_v56 = vld [vmem:[%s2015_s1 + $0x12] sm:$0x3]  ;;  %v1719_v61 = vld [vmem:[%s1850_s5 + $0xd8] sm:$0xff]   ;;  %s1421_s22 = sshll.u32 %s190_s21, 2 }
  0x1b   : > { %v676_v48 = vrot.slane %v674_v41, 1  ;;  %v679_v49 = vshll.u32 %v1714_v40, 16  ;;  %v603_v51 = vor.u32 %v602_v45, %v598_v44  ;;  %v749_v60 = vsel %vm216_vm0, %v1470_v55, 0  ;;  %v1718_v63 = vld [vmem:[%s1850_s5 + $0x14] ss:$0 sps:$4 sm:$0x11]   ;;  %s192_s25 = scalar_lea.vmem %s2017_s3, %s1421_s22 }
  0x1c   : > { %v338_v32 = vsel %vm326_vm3, %v333_v26, %v337_v23  ;;  %v412_v34 = vsel %vm326_vm3, %v407_v29, %v411_v27  ;;  %v607_v52 = vrot.slane %v605_v46, 1  ;;  %v810_v62 = vsel %vm216_vm0, %v1476_v56, 0  ;;  %v1720_v1 = vld [vmem:[%s1850_s5 + $0xe0] ss:$0 sps:$4 sm:$0x11]   ;;  %v1715_v5 = vld [vmem:[%s1850_s5 + $0xc] sm:$0xff]  }
  0x1d   : > { %1579 = vmatmul.mubr.msk.bf16.vlgmr.msra.gmra.mxu0 %vm212_vm2, %v338_v32  ;;  %1585 = vmatmul.mubr.msk.bf16.vlgmr.msra.gmra.mxu1 %vm212_vm2, %v412_v34  ;;  %v677_v53 = vor.u32 %v676_v48, %v672_v47  ;;  %v681_v54 = vrot.slane %v679_v49, 1  ;;  %v871_v0 = vshll.u32 %v1717_v58, 16  ;;  %v945_v3 = vshll.u32 %v1719_v61, 16  ;;  %v1482_v4 = vld [vmem:[%s2015_s1 + $0x14] sm:$0x3]  ;;  %v1716_v7 = vld [vmem:[%s1850_s5 + $0xd8] sm:$0xff]  }
  0x1e   : > { %1589 = vmatpush3.bf16.msra.mxu0 %v478_v30  ;;  %1595 = vmatpush3.bf16.msra.mxu1 %v539_v33  ;;  %v608_v57 = vsel %vm326_vm3, %v603_v51, %v607_v52  ;;  %v1489_v6 = vld [vmem:[%s2015_s1 + $0x16] sm:$0x3]  ;;  %v869_v8 = vshrl.u32 %v1717_v58, 16  ;;  %v876_v10 = vshll.u32 %v1718_v63, 16  ;;  %v884_v11 = vsel %vm216_vm0, %v1482_v4, 0  ;;  %v1723_v23 = vld [vmem:[%s1850_s5 + $0x1a4] sm:$0xff]  }
  0x1f   : > { %1590 = vmatprep.mubr.msk.bf16.mxu0 %vm1768_vm1, %v1767_v2  ;;  %1596 = vmatprep.mubr.msk.bf16.mxu1 %vm1768_vm1, %v1767_v2  ;;  %v682_v59 = vsel %vm326_vm3, %v677_v53, %v681_v54  ;;  %v873_v9 = vrot.slane %v871_v0, 1  ;;  %v943_v12 = vshrl.u32 %v1719_v61, 16  ;;  %v947_v13 = vrot.slane %v945_v3, 1  ;;  %v1496_v20 = vld [vmem:[%s2015_s1 + $0x18] sm:$0x3]  ;;  %v1725_v26 = vld [vmem:[%s1850_s5 + $0x270] sm:$0xff]  }
  0x20   : > { %1600 = vmatprep.subr.bf16.mxu0 %v1767_v2  ;;  %1606 = vmatprep.subr.bf16.mxu1 %v1767_v2  ;;  %v950_v14 = vshll.u32 %v1720_v1, 16  ;;  %v958_v15 = vsel %vm216_vm0, %v1489_v6, 0  ;;  %v878_v17 = vrot.slane %v876_v10, 1  ;;  %v1502_v21 = vld [vmem:[%s2015_s1 + $0x1a] sm:$0x3]  ;;  %v1019_v25 = vsel %vm216_vm0, %v1496_v20, 0 }
  0x21   : > { %v874_v16 = vor.u32 %v873_v9, %v869_v8  ;;  %v948_v18 = vor.u32 %v947_v13, %v943_v12  ;;  %v1080_v27 = vsel %vm216_vm0, %v1502_v21, 0  ;;  %v1724_v28 = vld [vmem:[%s1850_s5 + $0x1ac] ss:$0 sps:$4 sm:$0x11]   ;;  %v1141_v29 = vshll.u32 %v1723_v23, 16  ;;  %v1721_v33 = vld [vmem:[%s1850_s5 + $0x1a4] sm:$0xff]  }
  0x22   : > { %v952_v19 = vrot.slane %v950_v14, 1  ;;  %v1726_v30 = vld [vmem:[%s1850_s5 + $0x278] ss:$0 sps:$4 sm:$0x11]   ;;  %v1215_v31 = vshll.u32 %v1725_v26, 16  ;;  %v1722_v35 = vld [vmem:[%s1850_s5 + $0x270] sm:$0xff]  }
  0x23   : > { %v879_v22 = vsel %vm326_vm3, %v874_v16, %v878_v17  ;;  %v1508_v32 = vld [vmem:[%s2015_s1 + $0x1c] sm:$0x3]  ;;  %v1515_v34 = vld [vmem:[%s2015_s1 + $0x1e] sm:$0x3]  ;;  %v1139_v36 = vshrl.u32 %v1723_v23, 16  ;;  %v1143_v37 = vrot.slane %v1141_v29, 1 }
  0x24   : > { %v953_v24 = vsel %vm326_vm3, %v948_v18, %v952_v19  ;;  %v1154_v39 = vsel %vm216_vm0, %v1508_v32, 0  ;;  %v1213_v40 = vshrl.u32 %v1725_v26, 16  ;;  %v1217_v41 = vrot.slane %v1215_v31, 1 }
  0x25   : > { %1591 = vmatmul.mubr.msk.bf16.vlgmr.msra.gmra.mxu0 %vm212_vm2, %v1709_v38  ;;  %1597 = vmatmul.mubr.msk.bf16.vlgmr.msra.gmra.mxu1 %vm212_vm2, %v1710_v42  ;;  %v1146_v38 = vshll.u32 %v1724_v28, 16  ;;  %v1220_v42 = vshll.u32 %v1726_v30, 16  ;;  %v1144_v44 = vor.u32 %v1143_v37, %v1139_v36 }
  0x26   : > { %1601 = vmatpush3.bf16.msra.mxu0 %v613_v43  ;;  %1607 = vmatpush3.bf16.msra.mxu1 %v687_v50  ;;  %v1228_v43 = vsel %vm216_vm0, %v1515_v34, 0  ;;  %v1218_v46 = vor.u32 %v1217_v41, %v1213_v40 }
  0x27   : > { %1602 = vmatprep.mubr.msk.bf16.mxu0 %vm1768_vm1, %v1767_v2  ;;  %1608 = vmatprep.mubr.msk.bf16.mxu1 %vm1768_vm1, %v1767_v2  ;;  %v1148_v45 = vrot.slane %v1146_v38, 1  ;;  %v1222_v47 = vrot.slane %v1220_v42, 1 }
  0x28   : > { %1612 = vmatprep.subr.bf16.mxu0 %v1767_v2  ;;  %1618 = vmatprep.subr.bf16.mxu1 %v1767_v2 }
  0x29   : > { %v1149_v48 = vsel %vm326_vm3, %v1144_v44, %v1148_v45  ;;  %v1223_v49 = vsel %vm326_vm3, %v1218_v46, %v1222_v47 }
  0x2d   : > { %1603 = vmatmul.mubr.msk.bf16.vlgmr.msra.gmra.mxu0 %vm212_vm2, %v608_v57  ;;  %1609 = vmatmul.mubr.msk.bf16.vlgmr.msra.gmra.mxu1 %vm212_vm2, %v682_v59 }
  0x2e   : > { %1613 = vmatpush3.bf16.msra.mxu0 %v749_v60  ;;  %1619 = vmatpush3.bf16.msra.mxu1 %v810_v62 }
  0x2f   : > { %1614 = vmatprep.mubr.msk.bf16.mxu0 %vm1768_vm1, %v1767_v2  ;;  %1620 = vmatprep.mubr.msk.bf16.mxu1 %vm1768_vm1, %v1767_v2 }
  0x30   : > { %1624 = vmatprep.subr.bf16.mxu0 %v1767_v2  ;;  %1630 = vmatprep.subr.bf16.mxu1 %v1767_v2 }
  0x35   : > { %1615 = vmatmul.mubr.msk.bf16.vlgmr.msra.gmra.mxu0 %vm212_vm2, %v1715_v5  ;;  %1621 = vmatmul.mubr.msk.bf16.vlgmr.msra.gmra.mxu1 %vm212_vm2, %v1716_v7 }
  0x36   : > { %1625 = vmatpush3.bf16.msra.mxu0 %v884_v11  ;;  %1631 = vmatpush3.bf16.msra.mxu1 %v958_v15 }
  0x37   : > { %1626 = vmatprep.mubr.msk.bf16.mxu0 %vm1768_vm1, %v1767_v2  ;;  %1632 = vmatprep.mubr.msk.bf16.mxu1 %vm1768_vm1, %v1767_v2 }
  0x38   : > { %1636 = vmatprep.subr.bf16.mxu0 %v1767_v2  ;;  %1642 = vmatprep.subr.bf16.mxu1 %v1767_v2 }
  0x3d   : > { %1627 = vmatmul.mubr.msk.bf16.vlgmr.msra.gmra.mxu0 %vm212_vm2, %v879_v22  ;;  %1633 = vmatmul.mubr.msk.bf16.vlgmr.msra.gmra.mxu1 %vm212_vm2, %v953_v24 }
  0x3e   : > { %1637 = vmatpush3.bf16.msra.mxu0 %v1019_v25  ;;  %1643 = vmatpush3.bf16.msra.mxu1 %v1080_v27 }
  0x3f   : > { %1638 = vmatprep.mubr.msk.bf16.mxu0 %vm1768_vm1, %v1767_v2  ;;  %1644 = vmatprep.mubr.msk.bf16.mxu1 %vm1768_vm1, %v1767_v2 }
  0x40   : > { %1648 = vmatprep.subr.bf16.mxu0 %v1767_v2  ;;  %1654 = vmatprep.subr.bf16.mxu1 %v1767_v2 }
  0x45   : > { %1639 = vmatmul.mubr.msk.bf16.vlgmr.msra.gmra.mxu0 %vm212_vm2, %v1721_v33  ;;  %1645 = vmatmul.mubr.msk.bf16.vlgmr.msra.gmra.mxu1 %vm212_vm2, %v1722_v35 }
  0x46   : > { %1649 = vmatpush3.bf16.msra.mxu0 %v1154_v39  ;;  %1655 = vmatpush3.bf16.msra.mxu1 %v1228_v43 }
  0x47   : > { %1650 = vmatprep.mubr.msk.bf16.mxu0 %vm1768_vm1, %v1767_v2  ;;  %1656 = vmatprep.mubr.msk.bf16.mxu1 %vm1768_vm1, %v1767_v2 }
  0x4d   : > { %1651 = vmatmul.mubr.msk.bf16.vlgmr.msra.gmra.mxu0 %vm212_vm2, %v1149_v48  ;;  %1657 = vmatmul.mubr.msk.bf16.vlgmr.msra.gmra.mxu1 %vm212_vm2, %v1223_v49 }
  0xd5   : > { %v254_v50 = vpop.f32.mrf.mxu0  ;;  %v306_v51 = vpop.f32.mrf.mxu1 }
  0xd6   : > { %v307_v5 = vadd.f32 %v306_v51, %v254_v50 }
  0xd7   : > { %v1568_v52 = vpop.f32.mrf.mxu0  ;;  %v1574_v53 = vpop.f32.mrf.mxu1 }
  0xd9   : > { %v257_v54 = vpop.f32.mrf.mxu0  ;;  %v309_v55 = vpop.f32.mrf.mxu1 }
  0xda   : > { %v310_v11 = vadd.f32 %v309_v55, %v257_v54 }
  0xdb   : > { %v1569_v56 = vpop.f32.mrf.mxu0  ;;  %v1575_v57 = vpop.f32.mrf.mxu1 }
  0xdd   : > { %v379_v58 = vpop.f32.mrf.mxu0  ;;  %v453_v59 = vpop.f32.mrf.mxu1 }
  0xde   : > { %v386_v8 = vadd.f32 %v379_v58, %v307_v5 }
  0xdf   : > { %v1580_v60 = vpop.f32.mrf.mxu0  ;;  %v1586_v2 = vpop.f32.mrf.mxu1 }
  0xe0   : > { %v460_v14 = vadd.f32 %v453_v59, %v386_v8 }
  0xe1   : > { %v382_v61 = vpop.f32.mrf.mxu0  ;;  %v456_v62 = vpop.f32.mrf.mxu1 }
  0xe2   : > { %v387_v15 = vadd.f32 %v382_v61, %v310_v11 }
  0xe3   : > { %v1581_v63 = vpop.f32.mrf.mxu0  ;;  %v1587_v0 = vpop.f32.mrf.mxu1 }
  0xe4   : > { %v461_v21 = vadd.f32 %v456_v62, %v387_v15 }
  0xe5   : > { %v514_v1 = vpop.f32.mrf.mxu0  ;;  %v575_v3 = vpop.f32.mrf.mxu1 }
  0xe6   : > { %v521_v18 = vadd.f32 %v514_v1, %v460_v14 }
  0xe7   : > { %v1592_v4 = vpop.f32.mrf.mxu0  ;;  %v1598_v6 = vpop.f32.mrf.mxu1 }
  0xe8   : > { %v582_v24 = vadd.f32 %v575_v3, %v521_v18  ;;  %v1519_v6 = vld [vmem:[%s2016_s2] ss:$0 sm:$0xff] }
  0xe9   : > { %v517_v7 = vpop.f32.mrf.mxu0  ;;  %v578_v9 = vpop.f32.mrf.mxu1 }
  0xea   : > { %v522_v25 = vadd.f32 %v517_v7, %v461_v21 }
  0xeb   : > { %v1593_v10 = vpop.f32.mrf.mxu0  ;;  %v1599_v12 = vpop.f32.mrf.mxu1 }
  0xec   : > { %v583_v31 = vadd.f32 %v578_v9, %v522_v25 }
  0xed   : > { %v649_v13 = vpop.f32.mrf.mxu0  ;;  %v723_v16 = vpop.f32.mrf.mxu1 }
  0xee   : > { %v656_v28 = vadd.f32 %v649_v13, %v582_v24 }
  0xef   : > { %v1604_v17 = vpop.f32.mrf.mxu0  ;;  %v1610_v19 = vpop.f32.mrf.mxu1 }
  0xf0   : > { %v730_v34 = vadd.f32 %v723_v16, %v656_v28 }
  0xf1   : > { %v652_v20 = vpop.f32.mrf.mxu0  ;;  %v726_v22 = vpop.f32.mrf.mxu1 }
  0xf2   : > { %v657_v35 = vadd.f32 %v652_v20, %v583_v31 }
  0xf3   : > { %v1605_v23 = vpop.f32.mrf.mxu0  ;;  %v1611_v26 = vpop.f32.mrf.mxu1 }
  0xf4   : > { %v731_v41 = vadd.f32 %v726_v22, %v657_v35 }
  0xf5   : > { %v785_v27 = vpop.f32.mrf.mxu0  ;;  %v846_v29 = vpop.f32.mrf.mxu1 }
  0xf6   : > { %v792_v38 = vadd.f32 %v785_v27, %v730_v34 }
  0xf7   : > { %v1616_v30 = vpop.f32.mrf.mxu0  ;;  %v1622_v32 = vpop.f32.mrf.mxu1 }
  0xf8   : > { %v853_v44 = vadd.f32 %v846_v29, %v792_v38 }
  0xf9   : > { %v788_v33 = vpop.f32.mrf.mxu0  ;;  %v849_v36 = vpop.f32.mrf.mxu1 }
  0xfa   : > { %v793_v45 = vadd.f32 %v788_v33, %v731_v41 }
  0xfb   : > { %v1617_v37 = vpop.f32.mrf.mxu0  ;;  %v1623_v39 = vpop.f32.mrf.mxu1 }
  0xfc   : > { %v854_v51 = vadd.f32 %v849_v36, %v793_v45 }
  0xfd   : > { %v920_v40 = vpop.f32.mrf.mxu0  ;;  %v994_v42 = vpop.f32.mrf.mxu1 }
  0xfe   : > { %v927_v48 = vadd.f32 %v920_v40, %v853_v44 }
  0xff   : > { %v1628_v43 = vpop.f32.mrf.mxu0  ;;  %v1634_v46 = vpop.f32.mrf.mxu1 }
 0x100   : > { %v1001_v54 = vadd.f32 %v994_v42, %v927_v48 }
 0x101   : > { %v923_v47 = vpop.f32.mrf.mxu0  ;;  %v997_v49 = vpop.f32.mrf.mxu1 }
 0x102   : > { %v928_v55 = vadd.f32 %v923_v47, %v854_v51 }
 0x103   : > { %v1629_v50 = vpop.f32.mrf.mxu0  ;;  %v1635_v52 = vpop.f32.mrf.mxu1 }
 0x104   : > { %v1002_v2 = vadd.f32 %v997_v49, %v928_v55 }
 0x105   : > { %v1055_v53 = vpop.f32.mrf.mxu0  ;;  %v1116_v56 = vpop.f32.mrf.mxu1 }
 0x106   : > { %v1062_v58 = vadd.f32 %v1055_v53, %v1001_v54 }
 0x107   : > { %v1640_v57 = vpop.f32.mrf.mxu0  ;;  %v1646_v59 = vpop.f32.mrf.mxu1 }
 0x108   : > { %v1123_v63 = vadd.f32 %v1116_v56, %v1062_v58 }
 0x109   : > { %v1058_v60 = vpop.f32.mrf.mxu0  ;;  %v1119_v61 = vpop.f32.mrf.mxu1 }
 0x10a   : > { %v1063_v0 = vadd.f32 %v1058_v60, %v1002_v2 }
 0x10b   : > { %v1641_v62 = vpop.f32.mrf.mxu0  ;;  %v1647_v1 = vpop.f32.mrf.mxu1 }
 0x10c   : > { %v1124_v8 = vadd.f32 %v1119_v61, %v1063_v0 }
 0x10d   : > { %v1190_v3 = vpop.f32.mrf.mxu0  ;;  %v1264_v5 = vpop.f32.mrf.mxu1 }
 0x10e   : > { %v1197_v4 = vadd.f32 %v1190_v3, %v1123_v63 }
 0x10f   : > { %v1652_v7 = vpop.f32.mrf.mxu0  ;;  %v1658_v10 = vpop.f32.mrf.mxu1 }
 0x110   : > { %v1271_v9 = vadd.f32 %v1264_v5, %v1197_v4 }
 0x111   : > { %v1193_v11 = vpop.f32.mrf.mxu0  ;;  %v1267_v14 = vpop.f32.mrf.mxu1 }
 0x112   : > { %v1280_v12 = vadd.f32 %v1519_v6, %v1271_v9  ;;  %v1198_v13 = vadd.f32 %v1193_v11, %v1124_v8 }
 0x113   : > { %v1653_v15 = vpop.f32.mrf.mxu0  ;;  %v1659_v17 = vpop.f32.mrf.mxu1 }
 0x114   : > { %v1272_v16 = vadd.f32 %v1267_v14, %v1198_v13  ;;  %v1284_v18 = vmul.f32 0.2, %v1280_v12  ;;  %vm1282_vm4 = vcmp.gt.f32.partialorder %v1280_v12, 0.0 }
 0x116   : > { %v1281_v19 = vadd.f32 %v1519_v6, %v1272_v16  ;;  %v1286_v21 = vsel %vm1282_vm4, %v1280_v12, %v1284_v18 }
 0x118   : > { %vm1283_vm5 = vcmp.gt.f32.partialorder %v1281_v19, 0.0  ;;  %v1285_v20 = vmul.f32 0.2, %v1281_v19 }
 0x11a   : > { %v1287_v22 = vsel %vm1283_vm5, %v1281_v19, %v1285_v20 }
 0x11b   : > { %v1530_v23 = vpack.c.bf16 %v1287_v22, %v1286_v21 }
 0x11d   : > { %1531 = vst [vmem:[%s192_s25] sm:$0xff] %v1530_v23  }
 0x11e PF: > { %s13_s16 = sadd.s32 1, %s1765_s16   ;;  %s2018_s12 = smov %s1757_s14 }
 0x11f   : > { %p10_p7 = scmp.ge.s32.totalorder %s13_s16, 34   ;;  %s2019_s13 = smov %s1761_s15 }
 0x120   : > { %s2020_s14 = smov %s2023_s17  ;;  %s2021_s15 = smov %s2027_s18 }
 0x121   :  { %12 = sbr.rel (!%p10_p7) target bundleno = 3 (0x3), region = 85 }

// kernel: forward.10
= control target key start
LH: loop header
LB: loop body
LE: loop exit
PB: predicated region body
PF: predicated region fallthrough
CT: control target
= control target key end

     0   :  { %s481_s12 = smov 0   ;;  %s483_s13 = smov 0   ;;  %s524_s0 = inlined_call_operand.vmem [shape: f32[2,8,8,128], index: 0, kind: input, shape index: {}]   ;;  %s525_s1 = inlined_call_operand.vmem [shape: f32[1,1,1,128], index: 1, kind: input, shape index: {}]   ;;  %s526_s2 = inlined_call_operand.vmem [shape: f32[1,1,1,128], index: 2, kind: input, shape index: {}]   ;;  %s527_s3 = inlined_call_operand.vmem [shape: bf16[2,8,8,128], index: 3, kind: output, shape index: {}]  }
   0x1   :  { %s485_s14 = smov 0  }
   0x2 LB: > { %s25_s15 = sadd.s32 1, %s455_s13  ;;  %p379_p0 = scmp.ge.s32.totalorder %s459_s14, 1  ;;  %s459_s14 = sphi %s485_s14, %s13_s14   ;;  %s455_s13 = sphi %s483_s13, %s529_s13   ;;  %s451_s12 = sphi %s481_s12, %s528_s12  }
   0x3   : > { %p27_p1 = scmp.ge.s32.totalorder %s25_s15, 2  ;;  %p158_p2 = scmp.lt.s32.totalorder %s459_s14, 3 }
   0x5   : > { %s531_s15 = smov (%p27_p1, %s25_s15), 0  ;;  %p159_p3 = pnand %p379_p0, %p158_p2 }
   0x6   : > { %p191_p4 = scmp.lt.s32.totalorder (!%p159_p3), %s451_s12, 1 }
   0x7   : > { %162 = sbr.rel (%p159_p3) target bundleno = 33 (0x21), region = 32 }
   0xc   : > { %s533_s12 = smov (!%p191_p4, %s451_s12), 1  ;;  %v384_v0 = vld [vmem:[%s525_s1] ss:$0 sm:$0xff] }
   0xd   : > { %s388_s16 = sshll.u32 %s533_s12, 6  ;;  %v385_v1 = vld [vmem:[%s526_s2] ss:$0 sm:$0xff]  ;;  %s389_s24 = sshll.u32 %s533_s12, 5 }
   0xe   : > { %s198_s21 = scalar_lea.vmem %s524_s0, %s388_s16  ;;  %s208_s27 = scalar_lea.vmem %s527_s3, %s389_s24 }
   0xf   : > { %v210_v2 = vld [vmem:[%s198_s21] sm:$0xff]  ;;  %v211_v3 = vld [vmem:[%s198_s21 + $0x8] sm:$0xff]  ;;  %v212_v4 = vld [vmem:[%s198_s21 + $0x10] sm:$0xff] }
  0x10   : > { %v225_v5 = vmul.f32 %v384_v0, %v210_v2  ;;  %v226_v6 = vmul.f32 %v384_v0, %v211_v3  ;;  %v213_v7 = vld [vmem:[%s198_s21 + $0x18] sm:$0xff]  ;;  %v227_v8 = vmul.f32 %v384_v0, %v212_v4  ;;  %v214_v9 = vld [vmem:[%s198_s21 + $0x20] sm:$0xff]  ;;  %v215_v10 = vld [vmem:[%s198_s21 + $0x28] sm:$0xff] }
  0x11   : > { %v228_v11 = vmul.f32 %v384_v0, %v213_v7  ;;  %v229_v12 = vmul.f32 %v384_v0, %v214_v9  ;;  %v230_v13 = vmul.f32 %v384_v0, %v215_v10  ;;  %v216_v14 = vld [vmem:[%s198_s21 + $0x30] sm:$0xff]  ;;  %v217_v15 = vld [vmem:[%s198_s21 + $0x38] sm:$0xff] }
  0x12   : > { %v240_v16 = vadd.f32 %v385_v1, %v225_v5  ;;  %v241_v17 = vadd.f32 %v385_v1, %v226_v6  ;;  %v242_v18 = vadd.f32 %v385_v1, %v227_v8  ;;  %v231_v19 = vmul.f32 %v384_v0, %v216_v14 }
  0x13   : > { %v243_v20 = vadd.f32 %v385_v1, %v228_v11  ;;  %v244_v21 = vadd.f32 %v385_v1, %v229_v12  ;;  %v245_v22 = vadd.f32 %v385_v1, %v230_v13  ;;  %v232_v23 = vmul.f32 %v384_v0, %v217_v15 }
  0x14   : > { %vm248_vm0 = vcmp.gt.f32.partialorder %v240_v16, 0.0  ;;  %vm249_vm1 = vcmp.gt.f32.partialorder %v241_v17, 0.0  ;;  %v256_v24 = vmul.f32 0.2, %v240_v16  ;;  %v257_v25 = vmul.f32 0.2, %v241_v17 }
  0x15   : > { %vm250_vm2 = vcmp.gt.f32.partialorder %v242_v18, 0.0  ;;  %vm251_vm3 = vcmp.gt.f32.partialorder %v243_v20, 0.0  ;;  %v258_v26 = vmul.f32 0.2, %v242_v18  ;;  %v259_v27 = vmul.f32 0.2, %v243_v20 }
  0x16   : > { %v264_v28 = vsel %vm248_vm0, %v240_v16, %v256_v24  ;;  %v265_v29 = vsel %vm249_vm1, %v241_v17, %v257_v25  ;;  %vm252_vm4 = vcmp.gt.f32.partialorder %v244_v21, 0.0  ;;  %vm253_vm5 = vcmp.gt.f32.partialorder %v245_v22, 0.0 }
  0x17   : > { %v393_v30 = vpack.c.bf16 %v265_v29, %v264_v28  ;;  %v266_v31 = vsel %vm250_vm2, %v242_v18, %v258_v26  ;;  %v267_v32 = vsel %vm251_vm3, %v243_v20, %v259_v27  ;;  %v260_v33 = vmul.f32 0.2, %v244_v21 }
  0x18   : > { %v398_v34 = vpack.c.bf16 %v267_v32, %v266_v31  ;;  %v261_v35 = vmul.f32 0.2, %v245_v22  ;;  %v246_v36 = vadd.f32 %v385_v1, %v231_v19  ;;  %v247_v37 = vadd.f32 %v385_v1, %v232_v23 }
  0x19   : > { %394 = vst [vmem:[%s208_s27] sm:$0xff] %v393_v30   ;;  %v268_v38 = vsel %vm252_vm4, %v244_v21, %v260_v33 }
  0x1a   : > { %410 = vst [vmem:[%s208_s27 + $0x8] sm:$0xff] %v398_v34   ;;  %v269_v39 = vsel %vm253_vm5, %v245_v22, %v261_v35  ;;  %vm254_vm6 = vcmp.gt.f32.partialorder %v246_v36, 0.0  ;;  %vm255_vm7 = vcmp.gt.f32.partialorder %v247_v37, 0.0  ;;  %v262_v40 = vmul.f32 0.2, %v246_v36 }
  0x1b   : > { %v403_v41 = vpack.c.bf16 %v269_v39, %v268_v38  ;;  %v263_v42 = vmul.f32 0.2, %v247_v37 }
  0x1c   : > { %v270_v43 = vsel %vm254_vm6, %v246_v36, %v262_v40 }
  0x1d   : > { %411 = vst [vmem:[%s208_s27 + $0x10] sm:$0xff] %v403_v41   ;;  %v271_v44 = vsel %vm255_vm7, %v247_v37, %v263_v42 }
  0x1e   : > { %v408_v45 = vpack.c.bf16 %v271_v44, %v270_v43 }
  0x20   : > { %412 = vst [vmem:[%s208_s27 + $0x18] sm:$0xff] %v408_v45  }
  0x21 PF: > { %s13_s14 = sadd.s32 1, %s459_s14   ;;  %s528_s12 = smov %s455_s13 }
  0x22   : > { %p10_p5 = scmp.ge.s32.totalorder %s13_s14, 4   ;;  %s529_s13 = smov %s531_s15 }
  0x24   :  { %12 = sbr.rel (!%p10_p5) target bundleno = 2 (0x2), region = 62 }

// kernel: forward.9
= control target key start
LH: loop header
LB: loop body
LE: loop exit
PB: predicated region body
PF: predicated region fallthrough
CT: control target
= control target key end

     0   :  { %s1649_s12 = smov 0   ;;  %s1651_s13 = smov 0   ;;  %s1862_s0 = inlined_call_operand.vmem [shape: bf16[2,4,9,9,8], index: 0, kind: input, shape index: {}]   ;;  %s1863_s1 = inlined_call_operand.vmem [shape: bf16[16,8,128], index: 1, kind: input, shape index: {}]   ;;  %s1864_s2 = inlined_call_operand.vmem [shape: f32[2,8,8,128], index: 2, kind: output, shape index: {0}]   ;;  %s1865_s3 = inlined_call_operand.vmem [shape: f32[2,8,2,128], index: 3, kind: output, shape index: {1}]  }
   0x1   :  { %s1653_s14 = smov 0   ;;  %s1655_s15 = smov 0  }
   0x2   :  { %s1657_s16 = smov 0  }
   0x3 LB: > { %s23_s17 = sadd.s32 1, %s1617_s14  ;;  %s26_s18 = sadd.s32 1, %s1621_s15  ;;  %s1625_s16 = sphi %s1657_s16, %s14_s16   ;;  %s1621_s15 = sphi %s1655_s15, %s1869_s15   ;;  %s1617_s14 = sphi %s1653_s14, %s1868_s14   ;;  %s1613_s13 = sphi %s1651_s13, %s1867_s13   ;;  %s1609_s12 = sphi %s1649_s12, %s1866_s12  }
   0x4   : > { %p24_p0 = scmp.ge.s32.totalorder %s23_s17, 8  ;;  %p1318_p1 = scmp.ge.s32.totalorder %s1625_s16, 1 }
   0x5   : > { %p156_p2 = scmp.lt.s32.totalorder %s1625_s16, 17 }
   0x6   : > { %s1871_s17 = smov (%p24_p0, %s23_s17), 0  ;;  %s1873_s18 = smov (!%p24_p0, %s26_s18), %s1621_s15 }
   0x7   : > { %p157_p3 = pnand %p1318_p1, %p156_p2  ;;  %p28_p4 = scmp.ge.s32.totalorder %s1873_s18, 2 }
   0x8   : > { %p191_p5 = scmp.lt.s32.totalorder (!%p157_p3), %s1613_s13, 1  ;;  %s1401_s24 = sshll.u32 (!%p157_p3), %s1609_s12, 3 }
   0x9   : > { %s1875_s18 = smov (%p28_p4, %s1873_s18), 0  ;;  %160 = sbr.rel (%p157_p3) target bundleno = 290 (0x122), region = 28 }
   0xa   : > { %p198_p6 = scmp.lt.s32.totalorder (!%p157_p3), %s1609_s12, 7 }
   0xe   : > { %v1329_v0 = vld [vmem:[%s1863_s1 + $0x4] sm:$0xf]  ;;  %vm228_vm0 = vcmask 1043456   ;;  %v217_v1 = vld [vmem:[%s1863_s1] sm:$0xf]  ;;  %v1627_v2 = vmov 0.0  }
   0xf   : > { %1440 = vmatprep.subr.bf16.mxu0 %v1627_v2  ;;  %v230_v3 = vsel %vm228_vm0, %v1329_v0, 0  ;;  %1446 = vmatprep.subr.bf16.mxu1 %v1627_v2  ;;  %v276_v4 = vsel %vm228_vm0, %v217_v1, 0  ;;  %vm1628_vm1 = vmmov 0   ;;  %s1877_s13 = smov (!%p191_p5, %s1613_s13), 1  ;;  %v1332_v5 = vld [vmem:[%s1863_s1 + $0x8] sm:$0xf] }
  0x10   : > { %1441 = vmatpush3.bf16.msra.mxu0 %v230_v3  ;;  %1447 = vmatpush3.bf16.msra.mxu1 %v276_v4  ;;  %s1536_s23 = smul.u32 288, %s1877_s13  ;;  %v1337_v6 = vld [vmem:[%s1863_s1 + $0xc] sm:$0xf]  ;;  %vm224_vm2 = vcmask 64512   ;;  %v338_v7 = vsel %vm228_vm0, %v1332_v5, 0  ;;  %s1879_s12 = smov (!%p198_p6, %s1609_s12), 7 }
  0x11   : > { %1442 = vmatprep.mubr.msk.bf16.mxu0 %vm1628_vm1, %v1627_v2  ;;  %1448 = vmatprep.mubr.msk.bf16.mxu1 %vm1628_vm1, %v1627_v2  ;;  %v401_v8 = vsel %vm228_vm0, %v1337_v6, 0  ;;  %v1343_v15 = vld [vmem:[%s1863_s1 + $0x10] sm:$0xf]  ;;  %v1348_v18 = vld [vmem:[%s1863_s1 + $0x14] sm:$0xf]  ;;  %vm1154_vm3 = vcmask 1040384  }
  0x12   : > { %1452 = vmatprep.subr.bf16.mxu0 %v1627_v2  ;;  %1458 = vmatprep.subr.bf16.mxu1 %v1627_v2  ;;  %s195_s4 = scalar_lea.vmem %s1862_s0, %s1536_s23  ;;  %v454_v22 = vsel %vm228_vm0, %v1343_v15, 0  ;;  %v507_v24 = vsel %vm228_vm0, %v1348_v18, 0  ;;  %v1352_v27 = vld [vmem:[%s1863_s1 + $0x18] sm:$0xf]  ;;  %v1357_v28 = vld [vmem:[%s1863_s1 + $0x1c] sm:$0xf] }
  0x13   : > { %s1710_s5 = scalar_lea.vmem %s195_s4, %s1401_s24  ;;  %v570_v33 = vsel %vm228_vm0, %v1352_v27, 0  ;;  %v633_v34 = vsel %vm228_vm0, %v1357_v28, 0  ;;  %v1362_v39 = vld [vmem:[%s1863_s1 + $0x20] sm:$0xf]  ;;  %v1367_v41 = vld [vmem:[%s1863_s1 + $0x24] sm:$0xf] }
  0x14   : > { %v1328_v9 = vld [vmem:[%s1710_s5 + $0x48] sm:$0xf]  ;;  %v216_v10 = vld [vmem:[%s1710_s5] sm:$0xf]  ;;  %v1581_v25 = vld [vmem:[%s1710_s5 + $0x90] sm:$0x1f]  }
  0x15   : > { %1443 = vmatmul.mubr.msk.bf16.vlgmr.msra.gmra.mxu0 %vm224_vm2, %v1328_v9  ;;  %1449 = vmatmul.mubr.msk.bf16.vlgmr.msra.gmra.mxu1 %vm224_vm2, %v216_v10  ;;  %v1579_v11 = vld [vmem:[%s1710_s5] sm:$0x1f]   ;;  %v1580_v12 = vld [vmem:[%s1710_s5 + $0x48] sm:$0x1f]   ;;  %v1582_v26 = vld [vmem:[%s1710_s5 + $0xd8] sm:$0x1f]  }
  0x16   : > { %1453 = vmatpush3.bf16.msra.mxu0 %v338_v7  ;;  %1459 = vmatpush3.bf16.msra.mxu1 %v401_v8  ;;  %v328_v13 = vshrl.u32 %v1579_v11, 16  ;;  %v330_v14 = vshll.u32 %v1579_v11, 16  ;;  %v391_v16 = vshrl.u32 %v1580_v12, 16  ;;  %v393_v17 = vshll.u32 %v1580_v12, 16  ;;  %v1342_v29 = vld [vmem:[%s1710_s5 + $0x90] sm:$0xf] }
  0x17   : > { %1454 = vmatprep.mubr.msk.bf16.mxu0 %vm1628_vm1, %v1627_v2  ;;  %1460 = vmatprep.mubr.msk.bf16.mxu1 %vm1628_vm1, %v1627_v2  ;;  %v562_v30 = vshll.u32 %v1581_v25, 16  ;;  %v625_v31 = vshll.u32 %v1582_v26, 16  ;;  %v1347_v32 = vld [vmem:[%s1710_s5 + $0xd8] sm:$0xf]  ;;  %v560_v35 = vshrl.u32 %v1581_v25, 16  ;;  %v623_v37 = vshrl.u32 %v1582_v26, 16 }
  0x18   : > { %1464 = vmatprep.subr.bf16.mxu0 %v1627_v2  ;;  %1470 = vmatprep.subr.bf16.mxu1 %v1627_v2  ;;  %v332_v19 = vrot.slane %v330_v14, 1  ;;  %v395_v20 = vrot.slane %v393_v17, 1  ;;  %v687_v43 = vsel %vm228_vm0, %v1362_v39, 0  ;;  %v740_v44 = vsel %vm228_vm0, %v1367_v41, 0  ;;  %v1583_v45 = vld [vmem:[%s1710_s5 + $0x8] sm:$0x1f]  }
  0x19   : > { %v564_v36 = vrot.slane %v562_v30, 1  ;;  %v627_v38 = vrot.slane %v625_v31, 1  ;;  %v1584_v46 = vld [vmem:[%s1710_s5 + $0x50] sm:$0x1f]   ;;  %v1371_v47 = vld [vmem:[%s1863_s1 + $0x28] sm:$0xf] }
  0x1a   : > { %v333_v21 = vor.u32 %v332_v19, %v328_v13  ;;  %v396_v23 = vor.u32 %v395_v20, %v391_v16  ;;  %v1376_v48 = vld [vmem:[%s1863_s1 + $0x2c] sm:$0xf]  ;;  %v795_v49 = vshll.u32 %v1583_v45, 16  ;;  %v1361_v50 = vld [vmem:[%s1710_s5 + $0x8] sm:$0xf]  ;;  %v858_v51 = vshll.u32 %v1584_v46, 16 }
  0x1b   : > { %v565_v40 = vor.u32 %v564_v36, %v560_v35  ;;  %v628_v42 = vor.u32 %v627_v38, %v623_v37  ;;  %v1366_v52 = vld [vmem:[%s1710_s5 + $0x50] sm:$0xf]  ;;  %v803_v53 = vsel %vm228_vm0, %v1371_v47, 0  ;;  %v866_v54 = vsel %vm228_vm0, %v1376_v48, 0  ;;  %v1387_v61 = vld [vmem:[%s1863_s1 + $0x34] sm:$0xf] }
  0x1c   : > { %v793_v55 = vshrl.u32 %v1583_v45, 16  ;;  %v797_v56 = vrot.slane %v795_v49, 1  ;;  %v856_v57 = vshrl.u32 %v1584_v46, 16  ;;  %v860_v58 = vrot.slane %v858_v51, 1  ;;  %v1382_v59 = vld [vmem:[%s1863_s1 + $0x30] sm:$0xf] }
  0x1d   : > { %1455 = vmatmul.mubr.msk.bf16.vlgmr.msra.gmra.mxu0 %vm224_vm2, %v333_v21  ;;  %1461 = vmatmul.mubr.msk.bf16.vlgmr.msra.gmra.mxu1 %vm224_vm2, %v396_v23  ;;  %v919_v63 = vsel %vm228_vm0, %v1382_v59, 0  ;;  %v972_v0 = vsel %vm228_vm0, %v1387_v61, 0  ;;  %v1585_v1 = vld [vmem:[%s1710_s5 + $0x98] sm:$0x1f]   ;;  %v1586_v3 = vld [vmem:[%s1710_s5 + $0xe0] sm:$0x1f]  }
  0x1e   : > { %1465 = vmatpush3.bf16.msra.mxu0 %v454_v22  ;;  %1471 = vmatpush3.bf16.msra.mxu1 %v507_v24  ;;  %v798_v60 = vor.u32 %v797_v56, %v793_v55  ;;  %v861_v62 = vor.u32 %v860_v58, %v856_v57  ;;  %v1391_v4 = vld [vmem:[%s1863_s1 + $0x38] sm:$0xf]  ;;  %v1396_v5 = vld [vmem:[%s1863_s1 + $0x3c] sm:$0xf]  ;;  %v1027_v6 = vshll.u32 %v1585_v1, 16  ;;  %v1090_v8 = vshll.u32 %v1586_v3, 16 }
  0x1f   : > { %1466 = vmatprep.mubr.msk.bf16.mxu0 %vm1628_vm1, %v1627_v2  ;;  %1472 = vmatprep.mubr.msk.bf16.mxu1 %vm1628_vm1, %v1627_v2  ;;  %v1381_v7 = vld [vmem:[%s1710_s5 + $0x98] sm:$0xf]  ;;  %v1386_v9 = vld [vmem:[%s1710_s5 + $0xe0] sm:$0xf]  ;;  %v1035_v10 = vsel %vm228_vm0, %v1391_v4, 0  ;;  %v1098_v11 = vsel %vm228_vm0, %v1396_v5, 0 }
  0x20   : > { %1476 = vmatprep.subr.bf16.mxu0 %v1627_v2  ;;  %1482 = vmatprep.subr.bf16.mxu1 %v1627_v2  ;;  %v1025_v12 = vshrl.u32 %v1585_v1, 16  ;;  %v1029_v13 = vrot.slane %v1027_v6, 1  ;;  %v1088_v14 = vshrl.u32 %v1586_v3, 16  ;;  %v1092_v15 = vrot.slane %v1090_v8, 1  ;;  %s1320_s5 = sshll.u32 %s1877_s13, 3 }
  0x21   : > { %s1837_s11 = sadd.s32 %s1320_s5, %s1879_s12 }
  0x22   : > { %v1030_v16 = vor.u32 %v1029_v13, %v1025_v12  ;;  %v1093_v17 = vor.u32 %v1092_v15, %v1088_v14  ;;  %s1321_s19 = sshll.u32 %s1837_s11, 3  ;;  %s1323_s12 = sshll.u32 %s1837_s11, 1 }
  0x23   : > { %s203_s22 = scalar_lea.vmem %s1864_s2, %s1321_s19  ;;  %s211_s24 = scalar_lea.vmem %s1865_s3, %s1323_s12 }
  0x25   : > { %1467 = vmatmul.mubr.msk.bf16.vlgmr.msra.gmra.mxu0 %vm224_vm2, %v1342_v29  ;;  %1473 = vmatmul.mubr.msk.bf16.vlgmr.msra.gmra.mxu1 %vm224_vm2, %v1347_v32 }
  0x26   : > { %1477 = vmatpush3.bf16.msra.mxu0 %v570_v33  ;;  %1483 = vmatpush3.bf16.msra.mxu1 %v633_v34 }
  0x27   : > { %1478 = vmatprep.mubr.msk.bf16.mxu0 %vm1628_vm1, %v1627_v2  ;;  %1484 = vmatprep.mubr.msk.bf16.mxu1 %vm1628_vm1, %v1627_v2 }
  0x28   : > { %1488 = vmatprep.subr.bf16.mxu0 %v1627_v2  ;;  %1494 = vmatprep.subr.bf16.mxu1 %v1627_v2 }
  0x2d   : > { %1479 = vmatmul.mubr.msk.bf16.vlgmr.msra.gmra.mxu0 %vm224_vm2, %v565_v40  ;;  %1485 = vmatmul.mubr.msk.bf16.vlgmr.msra.gmra.mxu1 %vm224_vm2, %v628_v42 }
  0x2e   : > { %1489 = vmatpush3.bf16.msra.mxu0 %v687_v43  ;;  %1495 = vmatpush3.bf16.msra.mxu1 %v740_v44 }
  0x2f   : > { %1490 = vmatprep.mubr.msk.bf16.mxu0 %vm1628_vm1, %v1627_v2  ;;  %1496 = vmatprep.mubr.msk.bf16.mxu1 %vm1628_vm1, %v1627_v2 }
  0x30   : > { %1500 = vmatprep.subr.bf16.mxu0 %v1627_v2  ;;  %1506 = vmatprep.subr.bf16.mxu1 %v1627_v2 }
  0x35   : > { %1491 = vmatmul.mubr.msk.bf16.vlgmr.msra.gmra.mxu0 %vm224_vm2, %v1361_v50  ;;  %1497 = vmatmul.mubr.msk.bf16.vlgmr.msra.gmra.mxu1 %vm224_vm2, %v1366_v52 }
  0x36   : > { %1501 = vmatpush3.bf16.msra.mxu0 %v803_v53  ;;  %1507 = vmatpush3.bf16.msra.mxu1 %v866_v54 }
  0x37   : > { %1502 = vmatprep.mubr.msk.bf16.mxu0 %vm1628_vm1, %v1627_v2  ;;  %1508 = vmatprep.mubr.msk.bf16.mxu1 %vm1628_vm1, %v1627_v2 }
  0x38   : > { %1512 = vmatprep.subr.bf16.mxu0 %v1627_v2  ;;  %1518 = vmatprep.subr.bf16.mxu1 %v1627_v2 }
  0x3d   : > { %1503 = vmatmul.mubr.msk.bf16.vlgmr.msra.gmra.mxu0 %vm224_vm2, %v798_v60  ;;  %1509 = vmatmul.mubr.msk.bf16.vlgmr.msra.gmra.mxu1 %vm224_vm2, %v861_v62 }
  0x3e   : > { %1513 = vmatpush3.bf16.msra.mxu0 %v919_v63  ;;  %1519 = vmatpush3.bf16.msra.mxu1 %v972_v0 }
  0x3f   : > { %1514 = vmatprep.mubr.msk.bf16.mxu0 %vm1628_vm1, %v1627_v2  ;;  %1520 = vmatprep.mubr.msk.bf16.mxu1 %vm1628_vm1, %v1627_v2 }
  0x40   : > { %1524 = vmatprep.subr.bf16.mxu0 %v1627_v2  ;;  %1530 = vmatprep.subr.bf16.mxu1 %v1627_v2 }
  0x45   : > { %1515 = vmatmul.mubr.msk.bf16.vlgmr.msra.gmra.mxu0 %vm224_vm2, %v1381_v7  ;;  %1521 = vmatmul.mubr.msk.bf16.vlgmr.msra.gmra.mxu1 %vm224_vm2, %v1386_v9 }
  0x46   : > { %1525 = vmatpush3.bf16.msra.mxu0 %v1035_v10  ;;  %1531 = vmatpush3.bf16.msra.mxu1 %v1098_v11 }
  0x47   : > { %1526 = vmatprep.mubr.msk.bf16.mxu0 %vm1628_vm1, %v1627_v2  ;;  %1532 = vmatprep.mubr.msk.bf16.mxu1 %vm1628_vm1, %v1627_v2 }
  0x4d   : > { %1527 = vmatmul.mubr.msk.bf16.vlgmr.msra.gmra.mxu0 %vm224_vm2, %v1030_v16  ;;  %1533 = vmatmul.mubr.msk.bf16.vlgmr.msra.gmra.mxu1 %vm224_vm2, %v1093_v17 }
  0xd5   : > { %v266_v18 = vpop.f32.mrf.mxu0  ;;  %v312_v19 = vpop.f32.mrf.mxu1 }
  0xd6   : > { %v313_v36 = vadd.f32 %v312_v19, %v266_v18 }
  0xd7   : > { %v1444_v20 = vpop.f32.mrf.mxu0  ;;  %v1450_v21 = vpop.f32.mrf.mxu1 }
  0xd9   : > { %v269_v22 = vpop.f32.mrf.mxu0  ;;  %v315_v23 = vpop.f32.mrf.mxu1 }
  0xdb   : > { %v1445_v24 = vpop.f32.mrf.mxu0  ;;  %v1451_v25 = vpop.f32.mrf.mxu1 }
  0xdd   : > { %v374_v26 = vpop.f32.mrf.mxu0  ;;  %v437_v27 = vpop.f32.mrf.mxu1 }
  0xde   : > { %v380_v39 = vadd.f32 %v374_v26, %v313_v36 }
  0xdf   : > { %v1456_v28 = vpop.f32.mrf.mxu0  ;;  %v1462_v29 = vpop.f32.mrf.mxu1 }
  0xe0   : > { %v443_v44 = vadd.f32 %v437_v27, %v380_v39 }
  0xe1   : > { %v377_v30 = vpop.f32.mrf.mxu0  ;;  %v440_v2 = vpop.f32.mrf.mxu1 }
  0xe3   : > { %v1457_v31 = vpop.f32.mrf.mxu0  ;;  %v1463_v32 = vpop.f32.mrf.mxu1 }
  0xe5   : > { %v490_v33 = vpop.f32.mrf.mxu0  ;;  %v543_v34 = vpop.f32.mrf.mxu1 }
  0xe6   : > { %v496_v47 = vadd.f32 %v490_v33, %v443_v44 }
  0xe7   : > { %v1468_v35 = vpop.f32.mrf.mxu0  ;;  %v1474_v37 = vpop.f32.mrf.mxu1 }
  0xe8   : > { %v549_v52 = vadd.f32 %v543_v34, %v496_v47 }
  0xe9   : > { %v493_v38 = vpop.f32.mrf.mxu0  ;;  %v546_v40 = vpop.f32.mrf.mxu1 }
  0xeb   : > { %v1469_v41 = vpop.f32.mrf.mxu0  ;;  %v1475_v42 = vpop.f32.mrf.mxu1 }
  0xed   : > { %v606_v43 = vpop.f32.mrf.mxu0  ;;  %v669_v45 = vpop.f32.mrf.mxu1 }
  0xee   : > { %v612_v55 = vadd.f32 %v606_v43, %v549_v52 }
  0xef   : > { %v1480_v46 = vpop.f32.mrf.mxu0  ;;  %v1486_v48 = vpop.f32.mrf.mxu1 }
  0xf0   : > { %v675_v60 = vadd.f32 %v669_v45, %v612_v55 }
  0xf1   : > { %v609_v49 = vpop.f32.mrf.mxu0  ;;  %v672_v50 = vpop.f32.mrf.mxu1 }
  0xf3   : > { %v1481_v51 = vpop.f32.mrf.mxu0  ;;  %v1487_v53 = vpop.f32.mrf.mxu1 }
  0xf5   : > { %v723_v54 = vpop.f32.mrf.mxu0  ;;  %v776_v56 = vpop.f32.mrf.mxu1 }
  0xf6   : > { %v729_v63 = vadd.f32 %v723_v54, %v675_v60 }
  0xf7   : > { %v1492_v57 = vpop.f32.mrf.mxu0  ;;  %v1498_v58 = vpop.f32.mrf.mxu1 }
  0xf8   : > { %v782_v5 = vadd.f32 %v776_v56, %v729_v63 }
  0xf9   : > { %v726_v59 = vpop.f32.mrf.mxu0  ;;  %v779_v61 = vpop.f32.mrf.mxu1 }
  0xfb   : > { %v1493_v62 = vpop.f32.mrf.mxu0  ;;  %v1499_v0 = vpop.f32.mrf.mxu1 }
  0xfd   : > { %v839_v1 = vpop.f32.mrf.mxu0  ;;  %v902_v3 = vpop.f32.mrf.mxu1 }
  0xfe   : > { %v845_v8 = vadd.f32 %v839_v1, %v782_v5 }
  0xff   : > { %v1504_v4 = vpop.f32.mrf.mxu0  ;;  %v1510_v6 = vpop.f32.mrf.mxu1 }
 0x100   : > { %v908_v13 = vadd.f32 %v902_v3, %v845_v8 }
 0x101   : > { %v842_v7 = vpop.f32.mrf.mxu0  ;;  %v905_v9 = vpop.f32.mrf.mxu1 }
 0x103   : > { %v1505_v10 = vpop.f32.mrf.mxu0  ;;  %v1511_v11 = vpop.f32.mrf.mxu1 }
 0x105   : > { %v955_v12 = vpop.f32.mrf.mxu0  ;;  %v1008_v14 = vpop.f32.mrf.mxu1 }
 0x106   : > { %v961_v16 = vadd.f32 %v955_v12, %v908_v13 }
 0x107   : > { %v1516_v15 = vpop.f32.mrf.mxu0  ;;  %v1522_v17 = vpop.f32.mrf.mxu1 }
 0x108   : > { %v1014_v21 = vadd.f32 %v1008_v14, %v961_v16 }
 0x109   : > { %v958_v18 = vpop.f32.mrf.mxu0  ;;  %v1011_v19 = vpop.f32.mrf.mxu1 }
 0x10b   : > { %v1517_v20 = vpop.f32.mrf.mxu0  ;;  %v1523_v22 = vpop.f32.mrf.mxu1 }
 0x10d   : > { %v1071_v23 = vpop.f32.mrf.mxu0  ;;  %v1134_v25 = vpop.f32.mrf.mxu1 }
 0x10e   : > { %v1077_v24 = vadd.f32 %v1071_v23, %v1014_v21 }
 0x10f   : > { %v1528_v26 = vpop.f32.mrf.mxu0  ;;  %v1534_v28 = vpop.f32.mrf.mxu1 }
 0x110   : > { %v1140_v27 = vadd.f32 %v1134_v25, %v1077_v24 }
 0x111   : > { %v1074_v29 = vpop.f32.mrf.mxu0  ;;  %v1137_v31 = vpop.f32.mrf.mxu1 }
 0x112   : > { %v1141_v30 = vrot.slane %v1140_v27, 4  ;;  %v1147_v2 = vmul.f32 %v1140_v27, %v1140_v27  ;;  %1157 = vst [vmem:[%s203_s22] sm:$0xff] %v1140_v27 }
 0x113   : > { %v1529_v32 = vpop.f32.mrf.mxu0  ;;  %v1535_v35 = vpop.f32.mrf.mxu1 }
 0x114   : > { %v1142_v33 = vadd.f32 %v1141_v30, %v1140_v27  ;;  %v1148_v34 = vrot.slane %v1147_v2, 4 }
 0x116   : > { %v1143_v36 = vrot.slane %v1142_v33, 2  ;;  %v1149_v37 = vadd.f32 %v1148_v34, %v1147_v2 }
 0x118   : > { %v1144_v38 = vadd.f32 %v1143_v36, %v1142_v33  ;;  %v1150_v39 = vrot.slane %v1149_v37, 2 }
 0x11a   : > { %v1145_v40 = vrot.slane %v1144_v38, 1  ;;  %v1151_v41 = vadd.f32 %v1150_v39, %v1149_v37 }
 0x11c   : > { %v1152_v42 = vrot.slane %v1151_v41, 1  ;;  %v1146_v43 = vadd.f32 %v1145_v40, %v1144_v38 }
 0x11e   : > { %v1153_v44 = vadd.f32 %v1152_v42, %v1151_v41 }
 0x120   : > { %v1155_v45 = vsel %vm1154_vm3, %v1146_v43, %v1153_v44 }
 0x121   : > { %1156 = vst [vmem:[%s211_s24] sm:$0x3] %v1155_v45 }
 0x122 PF: > { %s14_s16 = sadd.s32 1, %s1625_s16   ;;  %s1866_s12 = smov %s1617_s14 }
 0x123   : > { %p11_p7 = scmp.ge.s32.totalorder %s14_s16, 18   ;;  %s1867_s13 = smov %s1621_s15 }
 0x124   : > { %s1868_s14 = smov %s1871_s17  ;;  %s1869_s15 = smov %s1875_s18 }
 0x125   :  { %13 = sbr.rel (!%p11_p7) target bundleno = 3 (0x3), region = 93 }

// kernel: forward.12
= control target key start
LH: loop header
LB: loop body
LE: loop exit
PB: predicated region body
PF: predicated region fallthrough
CT: control target
= control target key end

     0   :  { %s426_s12 = smov 0   ;;  %s428_s13 = smov 0   ;;  %s465_s0 = inlined_call_operand.vmem [shape: f32[2,4,4,128], index: 0, kind: input, shape index: {}]   ;;  %s466_s1 = inlined_call_operand.vmem [shape: f32[1,1,1,128], index: 1, kind: input, shape index: {}]   ;;  %s467_s2 = inlined_call_operand.vmem [shape: f32[1,1,1,128], index: 2, kind: input, shape index: {}]   ;;  %s468_s3 = inlined_call_operand.vmem [shape: bf16[2,4,4,128], index: 3, kind: output, shape index: {}]  }
   0x1   :  { %s430_s14 = smov 0  }
   0x2 LB: > { %s25_s15 = sadd.s32 1, %s400_s13  ;;  %p347_p0 = scmp.ge.s32.totalorder %s404_s14, 1  ;;  %s404_s14 = sphi %s430_s14, %s13_s14   ;;  %s400_s13 = sphi %s428_s13, %s470_s13   ;;  %s396_s12 = sphi %s426_s12, %s469_s12  }
   0x3   : > { %p27_p1 = scmp.ge.s32.totalorder %s25_s15, 2  ;;  %p158_p2 = scmp.lt.s32.totalorder %s404_s14, 3 }
   0x5   : > { %s472_s15 = smov (%p27_p1, %s25_s15), 0  ;;  %p159_p3 = pnand %p347_p0, %p158_p2 }
   0x6   : > { %p191_p4 = scmp.lt.s32.totalorder (!%p159_p3), %s396_s12, 1 }
   0x7   : > { %162 = sbr.rel (%p159_p3) target bundleno = 27 (0x1b), region = 32 }
   0xc   : > { %s474_s12 = smov (!%p191_p4, %s396_s12), 1  ;;  %v352_v0 = vld [vmem:[%s466_s1] ss:$0 sm:$0xff] }
   0xd   : > { %s356_s16 = sshll.u32 %s474_s12, 4  ;;  %v353_v1 = vld [vmem:[%s467_s2] ss:$0 sm:$0xff]  ;;  %s357_s24 = sshll.u32 %s474_s12, 3 }
   0xe   : > { %s198_s21 = scalar_lea.vmem %s465_s0, %s356_s16  ;;  %s208_s27 = scalar_lea.vmem %s468_s3, %s357_s24 }
   0xf   : > { %v210_v2 = vld [vmem:[%s198_s21] sm:$0xf]  ;;  %v211_v3 = vld [vmem:[%s198_s21 + $0x4] sm:$0xf]  ;;  %v212_v4 = vld [vmem:[%s198_s21 + $0x8] sm:$0xf] }
  0x10   : > { %v221_v5 = vmul.f32 %v352_v0, %v210_v2  ;;  %v222_v6 = vmul.f32 %v352_v0, %v211_v3  ;;  %v223_v7 = vmul.f32 %v352_v0, %v212_v4  ;;  %v213_v8 = vld [vmem:[%s198_s21 + $0xc] sm:$0xf] }
  0x11   : > { %v224_v9 = vmul.f32 %v352_v0, %v213_v8 }
  0x12   : > { %v232_v10 = vadd.f32 %v353_v1, %v221_v5  ;;  %v233_v11 = vadd.f32 %v353_v1, %v222_v6  ;;  %v234_v12 = vadd.f32 %v353_v1, %v223_v7 }
  0x13   : > { %v235_v13 = vadd.f32 %v353_v1, %v224_v9 }
  0x14   : > { %vm236_vm0 = vcmp.gt.f32.partialorder %v232_v10, 0.0  ;;  %v240_v14 = vmul.f32 0.2, %v232_v10  ;;  %vm237_vm1 = vcmp.gt.f32.partialorder %v233_v11, 0.0  ;;  %v241_v15 = vmul.f32 0.2, %v233_v11 }
  0x15   : > { %vm238_vm2 = vcmp.gt.f32.partialorder %v234_v12, 0.0  ;;  %v242_v16 = vmul.f32 0.2, %v234_v12  ;;  %vm239_vm3 = vcmp.gt.f32.partialorder %v235_v13, 0.0  ;;  %v243_v17 = vmul.f32 0.2, %v235_v13 }
  0x16   : > { %v244_v18 = vsel %vm236_vm0, %v232_v10, %v240_v14  ;;  %v245_v19 = vsel %vm237_vm1, %v233_v11, %v241_v15 }
  0x17   : > { %v248_v20 = vpack.c.bf16 %v244_v18, %v244_v18  ;;  %v249_v21 = vpack.c.bf16 %v245_v19, %v245_v19  ;;  %v246_v22 = vsel %vm238_vm2, %v234_v12, %v242_v16  ;;  %v247_v23 = vsel %vm239_vm3, %v235_v13, %v243_v17 }
  0x18   : > { %v250_v24 = vpack.c.bf16 %v246_v22, %v246_v22  ;;  %v251_v25 = vpack.c.bf16 %v247_v23, %v247_v23 }
  0x19   : > { %252 = vst [vmem:[%s208_s27] sm:$0x3] %v248_v20  ;;  %253 = vst [vmem:[%s208_s27 + $0x2] sm:$0x3] %v249_v21 }
  0x1a   : > { %254 = vst [vmem:[%s208_s27 + $0x4] sm:$0x3] %v250_v24  ;;  %255 = vst [vmem:[%s208_s27 + $0x6] sm:$0x3] %v251_v25 }
  0x1b PF: > { %s13_s14 = sadd.s32 1, %s404_s14   ;;  %s469_s12 = smov %s400_s13 }
  0x1c   : > { %p10_p5 = scmp.ge.s32.totalorder %s13_s14, 4   ;;  %s470_s13 = smov %s472_s15 }
  0x1e   :  { %12 = sbr.rel (!%p10_p5) target bundleno = 2 (0x2), region = 62 }

// kernel: forward.11
= control target key start
LH: loop header
LB: loop body
LE: loop exit
PB: predicated region body
PF: predicated region fallthrough
CT: control target
= control target key end

     0   :  { %s1709_s12 = smov 0   ;;  %s1711_s13 = smov 0   ;;  %s1906_s0 = inlined_call_operand.vmem [shape: bf16[2,4,5,5,16], index: 0, kind: input, shape index: {}]   ;;  %s1907_s1 = inlined_call_operand.vmem [shape: bf16[16,16,128], index: 1, kind: input, shape index: {}]   ;;  %s1908_s2 = inlined_call_operand.vmem [shape: f32[2,4,4,128], index: 2, kind: output, shape index: {0}]   ;;  %s1909_s3 = inlined_call_operand.vmem [shape: f32[2,4,2,128], index: 3, kind: output, shape index: {1}]  }
   0x1   :  { %s1713_s14 = smov 0   ;;  %s1715_s15 = smov 0  }
   0x2   :  { %s1717_s16 = smov 0  }
   0x3 LB: > { %s23_s17 = sadd.s32 1, %s1677_s14  ;;  %s26_s18 = sadd.s32 1, %s1681_s15  ;;  %s1685_s16 = sphi %s1717_s16, %s14_s16   ;;  %s1681_s15 = sphi %s1715_s15, %s1913_s15   ;;  %s1677_s14 = sphi %s1713_s14, %s1912_s14   ;;  %s1673_s13 = sphi %s1711_s13, %s1911_s13   ;;  %s1669_s12 = sphi %s1709_s12, %s1910_s12  }
   0x4   : > { %p24_p0 = scmp.ge.s32.totalorder %s23_s17, 4  ;;  %p1352_p1 = scmp.ge.s32.totalorder %s1685_s16, 1 }
   0x5   : > { %p156_p2 = scmp.lt.s32.totalorder %s1685_s16, 9 }
   0x6   : > { %s1915_s17 = smov (%p24_p0, %s23_s17), 0  ;;  %s1917_s18 = smov (!%p24_p0, %s26_s18), %s1681_s15 }
   0x7   : > { %p157_p3 = pnand %p1352_p1, %p156_p2  ;;  %p28_p4 = scmp.ge.s32.totalorder %s1917_s18, 2 }
   0x8   : > { %p191_p5 = scmp.lt.s32.totalorder (!%p157_p3), %s1673_s13, 1  ;;  %s1358_s24 = sshll.u32 (!%p157_p3), %s1669_s12, 2 }
   0x9   : > { %s1919_s18 = smov (%p28_p4, %s1917_s18), 0  ;;  %160 = sbr.rel (%p157_p3) target bundleno = 290 (0x122), region = 28 }
   0xa   : > { %p198_p6 = scmp.lt.s32.totalorder (!%p157_p3), %s1669_s12, 3 }
   0xe   : > { %v1623_v0 = vld [vmem:[%s1907_s1 + $0x8] sm:$0xff]   ;;  %v1687_v1 = vmov 0.0   ;;  %v1624_v2 = vld [vmem:[%s1907_s1] sm:$0xff]   ;;  %vm1688_vm0 = vmmov 0   ;;  %s1921_s13 = smov (!%p191_p5, %s1673_s13), 1  ;;  %v1625_v3 = vld [vmem:[%s1907_s1 + $0x10] sm:$0xff]  }
   0xf   : > { %1484 = vmatprep.subr.bf16.mxu0 %v1687_v1  ;;  %1490 = vmatprep.subr.bf16.mxu1 %v1687_v1  ;;  %s1580_s23 = smul.u32 80, %s1921_s13  ;;  %vm231_vm1 = vcmask 130048   ;;  %v1626_v4 = vld [vmem:[%s1907_s1 + $0x18] sm:$0xff]   ;;  %v1629_v15 = vld [vmem:[%s1907_s1 + $0x20] sm:$0xff]   ;;  %v1630_v17 = vld [vmem:[%s1907_s1 + $0x28] sm:$0xff]   ;;  %s1923_s12 = smov (!%p198_p6, %s1669_s12), 3 }
  0x10   : > { %1485 = vmatpush3.bf16.msra.mxu0 %v1623_v0  ;;  %1486 = vmatprep.mubr.msk.bf16.mxu0 %vm1688_vm0, %v1687_v1  ;;  %v1631_v21 = vld [vmem:[%s1907_s1 + $0x30] sm:$0xff]   ;;  %v1632_v24 = vld [vmem:[%s1907_s1 + $0x38] sm:$0xff]   ;;  %v1635_v33 = vld [vmem:[%s1907_s1 + $0x40] sm:$0xff]   ;;  %vm1178_vm2 = vcmask 1043456   ;;  %vm1194_vm3 = vcmask 1040384  }
  0x11   : > { %1491 = vmatpush3.bf16.msra.mxu1 %v1624_v2  ;;  %1492 = vmatprep.mubr.msk.bf16.mxu1 %vm1688_vm0, %v1687_v1  ;;  %s195_s29 = scalar_lea.vmem %s1906_s0, %s1580_s23  ;;  %v1636_v34 = vld [vmem:[%s1907_s1 + $0x48] sm:$0xff]   ;;  %v1637_v39 = vld [vmem:[%s1907_s1 + $0x50] sm:$0xff]   ;;  %v1638_v42 = vld [vmem:[%s1907_s1 + $0x58] sm:$0xff]  }
  0x12   : > { %1496 = vmatprep.subr.bf16.mxu0 %v1687_v1  ;;  %1502 = vmatprep.subr.bf16.mxu1 %v1687_v1  ;;  %s1768_s5 = scalar_lea.vmem %s195_s29, %s1358_s24  ;;  %v1641_v49 = vld [vmem:[%s1907_s1 + $0x60] sm:$0xff]   ;;  %v1642_v50 = vld [vmem:[%s1907_s1 + $0x68] sm:$0xff]   ;;  %v1643_v55 = vld [vmem:[%s1907_s1 + $0x70] sm:$0xff]  }
  0x13   : > { %v1360_v5 = vld [vmem:[%s1768_s5 + $0x14] sm:$0x3]  ;;  %v215_v6 = vld [vmem:[%s1768_s5] sm:$0x3]  ;;  %v1379_v23 = vld [vmem:[%s1768_s5 + $0x28] sm:$0x3] }
  0x14   : > { %1487 = vmatmul.mubr.msk.bf16.vlgmr.msra.gmra.mxu0 %vm231_vm1, %v1360_v5  ;;  %1493 = vmatmul.mubr.msk.bf16.vlgmr.msra.gmra.mxu1 %vm231_vm1, %v215_v6  ;;  %v1627_v7 = vld [vmem:[%s1768_s5] ss:$0 sps:$4 sm:$0x77]   ;;  %v1628_v8 = vld [vmem:[%s1768_s5 + $0x14] ss:$0 sps:$4 sm:$0x77]  }
  0x15   : > { %1497 = vmatpush3.bf16.msra.mxu0 %v1625_v3  ;;  %1503 = vmatpush3.bf16.msra.mxu1 %v1626_v4  ;;  %v332_v9 = vshrl.u32 %v1627_v7, 16  ;;  %v334_v10 = vshll.u32 %v1627_v7, 16  ;;  %v396_v11 = vshrl.u32 %v1628_v8, 16  ;;  %v398_v12 = vshll.u32 %v1628_v8, 16  ;;  %v1385_v26 = vld [vmem:[%s1768_s5 + $0x3c] sm:$0x3] }
  0x16   : > { %1498 = vmatprep.mubr.msk.bf16.mxu0 %vm1688_vm0, %v1687_v1  ;;  %1504 = vmatprep.mubr.msk.bf16.mxu1 %vm1688_vm0, %v1687_v1  ;;  %v1633_v18 = vld [vmem:[%s1768_s5 + $0x28] ss:$0 sps:$4 sm:$0x77]   ;;  %v1634_v20 = vld [vmem:[%s1768_s5 + $0x3c] ss:$0 sps:$4 sm:$0x77]  }
  0x17   : > { %1508 = vmatprep.subr.bf16.mxu0 %v1687_v1  ;;  %1514 = vmatprep.subr.bf16.mxu1 %v1687_v1  ;;  %v336_v13 = vrot.slane %v334_v10, 1  ;;  %v400_v14 = vrot.slane %v398_v12, 1  ;;  %v576_v22 = vshll.u32 %v1633_v18, 16  ;;  %v640_v25 = vshll.u32 %v1634_v20, 16  ;;  %v1403_v38 = vld [vmem:[%s1768_s5 + $0x4] sm:$0x3] }
  0x18   : > { %v574_v27 = vshrl.u32 %v1633_v18, 16  ;;  %v638_v29 = vshrl.u32 %v1634_v20, 16  ;;  %v1639_v35 = vld [vmem:[%s1768_s5 + $0x4] ss:$0 sps:$4 sm:$0x77]   ;;  %v1644_v58 = vld [vmem:[%s1907_s1 + $0x78] sm:$0xff]  }
  0x19   : > { %v337_v16 = vor.u32 %v336_v13, %v332_v9  ;;  %v401_v19 = vor.u32 %v400_v14, %v396_v11  ;;  %v578_v28 = vrot.slane %v576_v22, 1  ;;  %v642_v30 = vrot.slane %v640_v25, 1  ;;  %v1640_v36 = vld [vmem:[%s1768_s5 + $0x18] ss:$0 sps:$4 sm:$0x77]  }
  0x1a   : > { %v818_v37 = vshll.u32 %v1639_v35, 16  ;;  %v882_v40 = vshll.u32 %v1640_v36, 16  ;;  %v1409_v41 = vld [vmem:[%s1768_s5 + $0x18] sm:$0x3]  ;;  %v816_v43 = vshrl.u32 %v1639_v35, 16  ;;  %v880_v45 = vshrl.u32 %v1640_v36, 16 }
  0x1b   : > { %v579_v31 = vor.u32 %v578_v28, %v574_v27  ;;  %v643_v32 = vor.u32 %v642_v30, %v638_v29  ;;  %v1645_v51 = vld [vmem:[%s1768_s5 + $0x2c] ss:$0 sps:$4 sm:$0x77]   ;;  %v1646_v52 = vld [vmem:[%s1768_s5 + $0x40] ss:$0 sps:$4 sm:$0x77]  }
  0x1c   : > { %1499 = vmatmul.mubr.msk.bf16.vlgmr.msra.gmra.mxu0 %vm231_vm1, %v337_v16  ;;  %1505 = vmatmul.mubr.msk.bf16.vlgmr.msra.gmra.mxu1 %vm231_vm1, %v401_v19  ;;  %v820_v44 = vrot.slane %v818_v37, 1  ;;  %v884_v46 = vrot.slane %v882_v40, 1  ;;  %v1060_v53 = vshll.u32 %v1645_v51, 16  ;;  %v1427_v54 = vld [vmem:[%s1768_s5 + $0x2c] sm:$0x3]  ;;  %v1124_v56 = vshll.u32 %v1646_v52, 16 }
  0x1d   : > { %1509 = vmatpush3.bf16.msra.mxu0 %v1629_v15  ;;  %1515 = vmatpush3.bf16.msra.mxu1 %v1630_v17  ;;  %v1433_v57 = vld [vmem:[%s1768_s5 + $0x40] sm:$0x3]  ;;  %v1058_v59 = vshrl.u32 %v1645_v51, 16  ;;  %v1122_v61 = vshrl.u32 %v1646_v52, 16  ;;  %s1354_s5 = sshll.u32 %s1921_s13, 2 }
  0x1e   : > { %1510 = vmatprep.mubr.msk.bf16.mxu0 %vm1688_vm0, %v1687_v1  ;;  %1516 = vmatprep.mubr.msk.bf16.mxu1 %vm1688_vm0, %v1687_v1  ;;  %v821_v47 = vor.u32 %v820_v44, %v816_v43  ;;  %v885_v48 = vor.u32 %v884_v46, %v880_v45  ;;  %v1062_v60 = vrot.slane %v1060_v53, 1  ;;  %v1126_v62 = vrot.slane %v1124_v56, 1  ;;  %s1881_s11 = sadd.s32 %s1354_s5, %s1923_s12 }
  0x1f   : > { %1520 = vmatprep.subr.bf16.mxu0 %v1687_v1  ;;  %1526 = vmatprep.subr.bf16.mxu1 %v1687_v1  ;;  %s1355_s19 = sshll.u32 %s1881_s11, 2  ;;  %s1357_s12 = sshll.u32 %s1881_s11, 1 }
  0x20   : > { %v1063_v63 = vor.u32 %v1062_v60, %v1058_v59  ;;  %v1127_v0 = vor.u32 %v1126_v62, %v1122_v61  ;;  %s203_s22 = scalar_lea.vmem %s1908_s2, %s1355_s19  ;;  %s211_s24 = scalar_lea.vmem %s1909_s3, %s1357_s12 }
  0x24   : > { %1511 = vmatmul.mubr.msk.bf16.vlgmr.msra.gmra.mxu0 %vm231_vm1, %v1379_v23  ;;  %1517 = vmatmul.mubr.msk.bf16.vlgmr.msra.gmra.mxu1 %vm231_vm1, %v1385_v26 }
  0x25   : > { %1521 = vmatpush3.bf16.msra.mxu0 %v1631_v21  ;;  %1527 = vmatpush3.bf16.msra.mxu1 %v1632_v24 }
  0x26   : > { %1522 = vmatprep.mubr.msk.bf16.mxu0 %vm1688_vm0, %v1687_v1  ;;  %1528 = vmatprep.mubr.msk.bf16.mxu1 %vm1688_vm0, %v1687_v1 }
  0x27   : > { %1532 = vmatprep.subr.bf16.mxu0 %v1687_v1  ;;  %1538 = vmatprep.subr.bf16.mxu1 %v1687_v1 }
  0x2c   : > { %1523 = vmatmul.mubr.msk.bf16.vlgmr.msra.gmra.mxu0 %vm231_vm1, %v579_v31  ;;  %1529 = vmatmul.mubr.msk.bf16.vlgmr.msra.gmra.mxu1 %vm231_vm1, %v643_v32 }
  0x2d   : > { %1533 = vmatpush3.bf16.msra.mxu0 %v1635_v33  ;;  %1539 = vmatpush3.bf16.msra.mxu1 %v1636_v34 }
  0x2e   : > { %1534 = vmatprep.mubr.msk.bf16.mxu0 %vm1688_vm0, %v1687_v1  ;;  %1540 = vmatprep.mubr.msk.bf16.mxu1 %vm1688_vm0, %v1687_v1 }
  0x2f   : > { %1544 = vmatprep.subr.bf16.mxu0 %v1687_v1  ;;  %1550 = vmatprep.subr.bf16.mxu1 %v1687_v1 }
  0x34   : > { %1535 = vmatmul.mubr.msk.bf16.vlgmr.msra.gmra.mxu0 %vm231_vm1, %v1403_v38  ;;  %1541 = vmatmul.mubr.msk.bf16.vlgmr.msra.gmra.mxu1 %vm231_vm1, %v1409_v41 }
  0x35   : > { %1545 = vmatpush3.bf16.msra.mxu0 %v1637_v39  ;;  %1551 = vmatpush3.bf16.msra.mxu1 %v1638_v42 }
  0x36   : > { %1546 = vmatprep.mubr.msk.bf16.mxu0 %vm1688_vm0, %v1687_v1  ;;  %1552 = vmatprep.mubr.msk.bf16.mxu1 %vm1688_vm0, %v1687_v1 }
  0x37   : > { %1556 = vmatprep.subr.bf16.mxu0 %v1687_v1  ;;  %1562 = vmatprep.subr.bf16.mxu1 %v1687_v1 }
  0x3c   : > { %1547 = vmatmul.mubr.msk.bf16.vlgmr.msra.gmra.mxu0 %vm231_vm1, %v821_v47  ;;  %1553 = vmatmul.mubr.msk.bf16.vlgmr.msra.gmra.mxu1 %vm231_vm1, %v885_v48 }
  0x3d   : > { %1557 = vmatpush3.bf16.msra.mxu0 %v1641_v49  ;;  %1563 = vmatpush3.bf16.msra.mxu1 %v1642_v50 }
  0x3e   : > { %1558 = vmatprep.mubr.msk.bf16.mxu0 %vm1688_vm0, %v1687_v1  ;;  %1564 = vmatprep.mubr.msk.bf16.mxu1 %vm1688_vm0, %v1687_v1 }
  0x3f   : > { %1568 = vmatprep.subr.bf16.mxu0 %v1687_v1  ;;  %1574 = vmatprep.subr.bf16.mxu1 %v1687_v1 }
  0x44   : > { %1559 = vmatmul.mubr.msk.bf16.vlgmr.msra.gmra.mxu0 %vm231_vm1, %v1427_v54  ;;  %1565 = vmatmul.mubr.msk.bf16.vlgmr.msra.gmra.mxu1 %vm231_vm1, %v1433_v57 }
  0x45   : > { %1569 = vmatpush3.bf16.msra.mxu0 %v1643_v55  ;;  %1575 = vmatpush3.bf16.msra.mxu1 %v1644_v58 }
  0x46   : > { %1570 = vmatprep.mubr.msk.bf16.mxu0 %vm1688_vm0, %v1687_v1  ;;  %1576 = vmatprep.mubr.msk.bf16.mxu1 %vm1688_vm0, %v1687_v1 }
  0x4c   : > { %1571 = vmatmul.mubr.msk.bf16.vlgmr.msra.gmra.mxu0 %vm231_vm1, %v1063_v63  ;;  %1577 = vmatmul.mubr.msk.bf16.vlgmr.msra.gmra.mxu1 %vm231_vm1, %v1127_v0 }
  0xd4   : > { %v269_v2 = vpop.f32.mrf.mxu0  ;;  %v318_v3 = vpop.f32.mrf.mxu1 }
  0xd5   : > { %v319_v20 = vadd.f32 %v318_v3, %v269_v2 }
  0xd6   : > { %v1488_v4 = vpop.f32.mrf.mxu0  ;;  %v1494_v5 = vpop.f32.mrf.mxu1 }
  0xd8   : > { %v272_v6 = vpop.f32.mrf.mxu0  ;;  %v321_v7 = vpop.f32.mrf.mxu1 }
  0xda   : > { %v1489_v8 = vpop.f32.mrf.mxu0  ;;  %v1495_v9 = vpop.f32.mrf.mxu1 }
  0xdc   : > { %v381_v10 = vpop.f32.mrf.mxu0  ;;  %v445_v11 = vpop.f32.mrf.mxu1 }
  0xdd   : > { %v387_v23 = vadd.f32 %v381_v10, %v319_v20 }
  0xde   : > { %v1500_v12 = vpop.f32.mrf.mxu0  ;;  %v1506_v13 = vpop.f32.mrf.mxu1 }
  0xdf   : > { %v451_v28 = vadd.f32 %v445_v11, %v387_v23 }
  0xe0   : > { %v384_v14 = vpop.f32.mrf.mxu0  ;;  %v448_v1 = vpop.f32.mrf.mxu1 }
  0xe2   : > { %v1501_v15 = vpop.f32.mrf.mxu0  ;;  %v1507_v16 = vpop.f32.mrf.mxu1 }
  0xe4   : > { %v502_v17 = vpop.f32.mrf.mxu0  ;;  %v559_v18 = vpop.f32.mrf.mxu1 }
  0xe5   : > { %v508_v31 = vadd.f32 %v502_v17, %v451_v28 }
  0xe6   : > { %v1512_v19 = vpop.f32.mrf.mxu0  ;;  %v1518_v21 = vpop.f32.mrf.mxu1 }
  0xe7   : > { %v565_v36 = vadd.f32 %v559_v18, %v508_v31 }
  0xe8   : > { %v505_v22 = vpop.f32.mrf.mxu0  ;;  %v562_v24 = vpop.f32.mrf.mxu1 }
  0xea   : > { %v1513_v25 = vpop.f32.mrf.mxu0  ;;  %v1519_v26 = vpop.f32.mrf.mxu1 }
  0xec   : > { %v623_v27 = vpop.f32.mrf.mxu0  ;;  %v687_v29 = vpop.f32.mrf.mxu1 }
  0xed   : > { %v629_v39 = vadd.f32 %v623_v27, %v565_v36 }
  0xee   : > { %v1524_v30 = vpop.f32.mrf.mxu0  ;;  %v1530_v32 = vpop.f32.mrf.mxu1 }
  0xef   : > { %v693_v44 = vadd.f32 %v687_v29, %v629_v39 }
  0xf0   : > { %v626_v33 = vpop.f32.mrf.mxu0  ;;  %v690_v34 = vpop.f32.mrf.mxu1 }
  0xf2   : > { %v1525_v35 = vpop.f32.mrf.mxu0  ;;  %v1531_v37 = vpop.f32.mrf.mxu1 }
  0xf4   : > { %v744_v38 = vpop.f32.mrf.mxu0  ;;  %v801_v40 = vpop.f32.mrf.mxu1 }
  0xf5   : > { %v750_v47 = vadd.f32 %v744_v38, %v693_v44 }
  0xf6   : > { %v1536_v41 = vpop.f32.mrf.mxu0  ;;  %v1542_v42 = vpop.f32.mrf.mxu1 }
  0xf7   : > { %v807_v52 = vadd.f32 %v801_v40, %v750_v47 }
  0xf8   : > { %v747_v43 = vpop.f32.mrf.mxu0  ;;  %v804_v45 = vpop.f32.mrf.mxu1 }
  0xfa   : > { %v1537_v46 = vpop.f32.mrf.mxu0  ;;  %v1543_v48 = vpop.f32.mrf.mxu1 }
  0xfc   : > { %v865_v49 = vpop.f32.mrf.mxu0  ;;  %v929_v50 = vpop.f32.mrf.mxu1 }
  0xfd   : > { %v871_v55 = vadd.f32 %v865_v49, %v807_v52 }
  0xfe   : > { %v1548_v51 = vpop.f32.mrf.mxu0  ;;  %v1554_v53 = vpop.f32.mrf.mxu1 }
  0xff   : > { %v935_v60 = vadd.f32 %v929_v50, %v871_v55 }
 0x100   : > { %v868_v54 = vpop.f32.mrf.mxu0  ;;  %v932_v56 = vpop.f32.mrf.mxu1 }
 0x102   : > { %v1549_v57 = vpop.f32.mrf.mxu0  ;;  %v1555_v58 = vpop.f32.mrf.mxu1 }
 0x104   : > { %v986_v59 = vpop.f32.mrf.mxu0  ;;  %v1043_v61 = vpop.f32.mrf.mxu1 }
 0x105   : > { %v992_v63 = vadd.f32 %v986_v59, %v935_v60 }
 0x106   : > { %v1560_v62 = vpop.f32.mrf.mxu0  ;;  %v1566_v0 = vpop.f32.mrf.mxu1 }
 0x107   : > { %v1049_v5 = vadd.f32 %v1043_v61, %v992_v63 }
 0x108   : > { %v989_v2 = vpop.f32.mrf.mxu0  ;;  %v1046_v3 = vpop.f32.mrf.mxu1 }
 0x10a   : > { %v1561_v4 = vpop.f32.mrf.mxu0  ;;  %v1567_v6 = vpop.f32.mrf.mxu1 }
 0x10c   : > { %v1107_v7 = vpop.f32.mrf.mxu0  ;;  %v1171_v9 = vpop.f32.mrf.mxu1 }
 0x10d   : > { %v1113_v8 = vadd.f32 %v1107_v7, %v1049_v5 }
 0x10e   : > { %v1572_v10 = vpop.f32.mrf.mxu0  ;;  %v1578_v12 = vpop.f32.mrf.mxu1 }
 0x10f   : > { %v1177_v11 = vadd.f32 %v1171_v9, %v1113_v8 }
 0x110   : > { %v1110_v13 = vpop.f32.mrf.mxu0  ;;  %v1174_v15 = vpop.f32.mrf.mxu1 }
 0x111   : > { %v1179_v14 = vsel %vm1178_vm2, %v1177_v11, 0.0  ;;  %v1186_v1 = vmul.f32 %v1177_v11, %v1177_v11  ;;  %1197 = vst [vmem:[%s203_s22] sm:$0xf] %v1177_v11 }
 0x112   : > { %v1180_v16 = vrot.slane %v1179_v14, 4  ;;  %v1573_v17 = vpop.f32.mrf.mxu0  ;;  %v1579_v19 = vpop.f32.mrf.mxu1 }
 0x113   : > { %v1187_v18 = vsel %vm1178_vm2, %v1186_v1, 0.0 }
 0x114   : > { %v1181_v20 = vadd.f32 %v1180_v16, %v1179_v14  ;;  %v1188_v21 = vrot.slane %v1187_v18, 4 }
 0x116   : > { %v1182_v22 = vrot.slane %v1181_v20, 2  ;;  %v1189_v23 = vadd.f32 %v1188_v21, %v1187_v18 }
 0x118   : > { %v1183_v24 = vadd.f32 %v1182_v22, %v1181_v20  ;;  %v1190_v25 = vrot.slane %v1189_v23, 2 }
 0x11a   : > { %v1184_v26 = vrot.slane %v1183_v24, 1  ;;  %v1191_v27 = vadd.f32 %v1190_v25, %v1189_v23 }
 0x11c   : > { %v1192_v28 = vrot.slane %v1191_v27, 1  ;;  %v1185_v29 = vadd.f32 %v1184_v26, %v1183_v24 }
 0x11e   : > { %v1193_v30 = vadd.f32 %v1192_v28, %v1191_v27 }
 0x120   : > { %v1195_v31 = vsel %vm1194_vm3, %v1185_v29, %v1193_v30 }
 0x121   : > { %1196 = vst [vmem:[%s211_s24] sm:$0x3] %v1195_v31 }
 0x122 PF: > { %s14_s16 = sadd.s32 1, %s1685_s16   ;;  %s1910_s12 = smov %s1677_s14 }
 0x123   : > { %p11_p7 = scmp.ge.s32.totalorder %s14_s16, 10   ;;  %s1911_s13 = smov %s1681_s15 }
 0x124   : > { %s1912_s14 = smov %s1915_s17  ;;  %s1913_s15 = smov %s1919_s18 }
 0x125   :  { %13 = sbr.rel (!%p11_p7) target bundleno = 3 (0x3), region = 93 }

// kernel: forward.14
= control target key start
LH: loop header
LB: loop body
LE: loop exit
PB: predicated region body
PF: predicated region fallthrough
CT: control target
= control target key end

     0   :  { %s425_s12 = smov 0   ;;  %s427_s13 = smov 0   ;;  %s464_s0 = inlined_call_operand.vmem [shape: f32[2,3,3,128], index: 0, kind: input, shape index: {}]   ;;  %s465_s1 = inlined_call_operand.vmem [shape: f32[1,1,1,128], index: 1, kind: input, shape index: {}]   ;;  %s466_s2 = inlined_call_operand.vmem [shape: f32[1,1,1,128], index: 2, kind: input, shape index: {}]   ;;  %s467_s3 = inlined_call_operand.vmem [shape: bf16[2,3,3,128], index: 3, kind: output, shape index: {}]  }
   0x1   :  { %s429_s14 = smov 0  }
   0x2 LB: > { %s25_s15 = sadd.s32 1, %s399_s13  ;;  %p348_p0 = scmp.ge.s32.totalorder %s403_s14, 1  ;;  %s403_s14 = sphi %s429_s14, %s13_s14   ;;  %s399_s13 = sphi %s427_s13, %s469_s13   ;;  %s395_s12 = sphi %s425_s12, %s468_s12  }
   0x3   : > { %p27_p1 = scmp.ge.s32.totalorder %s25_s15, 2  ;;  %p158_p2 = scmp.lt.s32.totalorder %s403_s14, 3 }
   0x5   : > { %s471_s15 = smov (%p27_p1, %s25_s15), 0  ;;  %p159_p3 = pnand %p348_p0, %p158_p2 }
   0x6   : > { %p191_p4 = scmp.lt.s32.totalorder (!%p159_p3), %s395_s12, 1 }
   0x7   : > { %162 = sbr.rel (%p159_p3) target bundleno = 29 (0x1d), region = 32 }
   0xc   : > { %s473_s12 = smov (!%p191_p4, %s395_s12), 1  ;;  %v351_v0 = vld [vmem:[%s465_s1] ss:$0 sm:$0xff]  ;;  %vm245_vm0 = vcmask 1041408   ;;  %vm246_vm1 = vsmask.f32 1280 }
   0xd   : > { %s355_s16 = smul.u32 12, %s473_s12  ;;  %v352_v1 = vld [vmem:[%s466_s2] ss:$0 sm:$0xff]  ;;  %vm247_vm5 = vmand %vm245_vm0, %vm246_vm1 }
   0xe   : > { %s356_s22 = smul.u32 6, %s473_s12 }
   0xf   : > { %s198_s21 = scalar_lea.vmem %s464_s0, %s355_s16 }
  0x10   : > { %v210_v2 = vld [vmem:[%s198_s21] sm:$0x7]  ;;  %v211_v3 = vld [vmem:[%s198_s21 + $0x4] sm:$0x7]  ;;  %v212_v4 = vld [vmem:[%s198_s21 + $0x8] sm:$0x7]  ;;  %s208_s27 = scalar_lea.vmem %s467_s3, %s356_s22 }
  0x11   : > { %v220_v5 = vmul.f32 %v351_v0, %v210_v2  ;;  %v221_v6 = vmul.f32 %v351_v0, %v211_v3  ;;  %v222_v7 = vmul.f32 %v351_v0, %v212_v4  ;;  %v248_v15 = vld [vmem:[%s208_s27] sm:$0x3]  ;;  %v251_v17 = vld [vmem:[%s208_s27 + $0x2] sm:$0x3]  ;;  %v254_v21 = vld [vmem:[%s208_s27 + $0x4] sm:$0x3] }
  0x13   : > { %v230_v8 = vadd.f32 %v352_v1, %v220_v5  ;;  %v231_v9 = vadd.f32 %v352_v1, %v221_v6  ;;  %v232_v10 = vadd.f32 %v352_v1, %v222_v7 }
  0x15   : > { %vm233_vm2 = vcmp.gt.f32.partialorder %v230_v8, 0.0  ;;  %v236_v11 = vmul.f32 0.2, %v230_v8  ;;  %vm234_vm3 = vcmp.gt.f32.partialorder %v231_v9, 0.0  ;;  %v237_v12 = vmul.f32 0.2, %v231_v9 }
  0x16   : > { %vm235_vm4 = vcmp.gt.f32.partialorder %v232_v10, 0.0  ;;  %v238_v13 = vmul.f32 0.2, %v232_v10 }
  0x17   : > { %v239_v14 = vsel %vm233_vm2, %v230_v8, %v236_v11  ;;  %v240_v16 = vsel %vm234_vm3, %v231_v9, %v237_v12 }
  0x18   : > { %v242_v18 = vpack.c.bf16 %v239_v14, %v239_v14  ;;  %v243_v19 = vpack.c.bf16 %v240_v16, %v240_v16  ;;  %v241_v20 = vsel %vm235_vm4, %v232_v10, %v238_v13 }
  0x19   : > { %v244_v22 = vpack.c.bf16 %v241_v20, %v241_v20 }
  0x1a   : > { %v249_v23 = vsel %vm247_vm5, %v242_v18, %v248_v15  ;;  %v252_v24 = vsel %vm247_vm5, %v243_v19, %v251_v17 }
  0x1b   : > { %250 = vst [vmem:[%s208_s27] sm:$0x3] %v249_v23  ;;  %253 = vst [vmem:[%s208_s27 + $0x2] sm:$0x3] %v252_v24  ;;  %v255_v25 = vsel %vm247_vm5, %v244_v22, %v254_v21 }
  0x1c   : > { %256 = vst [vmem:[%s208_s27 + $0x4] sm:$0x3] %v255_v25 }
  0x1d PF: > { %s13_s14 = sadd.s32 1, %s403_s14   ;;  %s468_s12 = smov %s399_s13 }
  0x1e   : > { %p10_p5 = scmp.ge.s32.totalorder %s13_s14, 4   ;;  %s469_s13 = smov %s471_s15 }
  0x20   :  { %12 = sbr.rel (!%p10_p5) target bundleno = 2 (0x2), region = 62 }

// kernel: forward.13
= control target key start
LH: loop header
LB: loop body
LE: loop exit
PB: predicated region body
PF: predicated region fallthrough
CT: control target
= control target key end

     0   :  { %s1910_s12 = smov 0   ;;  %s1912_s13 = smov 0   ;;  %s2183_s0 = inlined_call_operand.vmem [shape: bf16[2,1,6,6,32], index: 0, kind: input, shape index: {}]   ;;  %s2184_s1 = inlined_call_operand.vmem [shape: bf16[16,32,128], index: 1, kind: input, shape index: {}]   ;;  %s2185_s2 = inlined_call_operand.vmem [shape: f32[2,3,3,128], index: 2, kind: output, shape index: {0}]   ;;  %s2186_s3 = inlined_call_operand.vmem [shape: f32[2,3,2,128], index: 3, kind: output, shape index: {1}]  }
   0x1   :  { %s1914_s14 = smov 0   ;;  %s1916_s15 = smov 0  }
   0x2   :  { %s1918_s16 = smov 0  }
   0x3 LB: > { %s23_s17 = sadd.s32 1, %s1878_s14  ;;  %s26_s18 = sadd.s32 1, %s1882_s15  ;;  %s1886_s16 = sphi %s1918_s16, %s14_s16   ;;  %s1882_s15 = sphi %s1916_s15, %s2190_s15   ;;  %s1878_s14 = sphi %s1914_s14, %s2189_s14   ;;  %s1874_s13 = sphi %s1912_s13, %s2188_s13   ;;  %s1870_s12 = sphi %s1910_s12, %s2187_s12  }
   0x4   : > { %p24_p0 = scmp.ge.s32.totalorder %s23_s17, 3  ;;  %p1456_p1 = scmp.ge.s32.totalorder %s1886_s16, 1 }
   0x5   : > { %p156_p2 = scmp.lt.s32.totalorder %s1886_s16, 7 }
   0x6   : > { %s2192_s17 = smov (%p24_p0, %s23_s17), 0  ;;  %s2194_s18 = smov (!%p24_p0, %s26_s18), %s1882_s15 }
   0x7   : > { %p157_p3 = pnand %p1456_p1, %p156_p2  ;;  %p28_p4 = scmp.ge.s32.totalorder %s2194_s18, 2 }
   0x8   : > { %p191_p5 = scmp.lt.s32.totalorder (!%p157_p3), %s1874_s13, 1  ;;  %s1460_s28 = sshll.u32 (!%p157_p3), %s1870_s12, 2 }
   0x9   : > { %s2196_s18 = smov (%p28_p4, %s2194_s18), 0  ;;  %160 = sbr.rel (%p157_p3) target bundleno = 298 (0x12a), region = 28 }
   0xa   : > { %p198_p6 = scmp.lt.s32.totalorder (!%p157_p3), %s1870_s12, 2 }
   0xe   : > { %v1808_v0 = vld [vmem:[%s2184_s1 + $0x8] sm:$0xff]   ;;  %v1888_v1 = vmov 0.0   ;;  %v1809_v2 = vld [vmem:[%s2184_s1 + $0x18] sm:$0xff]   ;;  %v1810_v3 = vld [vmem:[%s2184_s1] sm:$0xff]   ;;  %vm1889_vm0 = vmmov 0   ;;  %s2198_s13 = smov (!%p191_p5, %s1874_s13), 1 }
   0xf   : > { %1644 = vmatprep.subr.bf16.mxu1 %v1888_v1  ;;  %1636 = vmatprep.subr.bf16.mxu0 %v1888_v1  ;;  %v1811_v4 = vld [vmem:[%s2184_s1 + $0x10] sm:$0xff]   ;;  %s1764_s27 = smul.u32 24, %s2198_s13  ;;  %vm247_vm1 = vcmask 261120   ;;  %v1813_v5 = vld [vmem:[%s2184_s1 + $0x38] sm:$0xff]   ;;  %v1814_v14 = vld [vmem:[%s2184_s1 + $0x28] sm:$0xff]   ;;  %s2200_s12 = smov (!%p198_p6, %s1870_s12), 2 }
  0x10   : > { %1645 = vmatpush3.bf16.msra.mxu1 %v1808_v0  ;;  %1648 = vmatprep.mubr.msk.bf16.mxu1 %vm1889_vm0, %v1888_v1  ;;  %v1815_v8 = vld [vmem:[%s2184_s1 + $0x30] sm:$0xff]   ;;  %v1818_v19 = vld [vmem:[%s2184_s1 + $0x58] sm:$0xff]   ;;  %v1816_v24 = vld [vmem:[%s2184_s1 + $0x20] sm:$0xff]   ;;  %s1765_s30 = smul.u32 3, %s2198_s13  ;;  %vm1294_vm2 = vcmask 1042432   ;;  %vm1310_vm3 = vcmask 1040384  }
  0x11   : > { %1637 = vmatpush3.bf16.msra.mxu0 %v1809_v2  ;;  %1646 = vmatprep.subr.bf16.mxu1 %v1888_v1  ;;  %s195_s4 = scalar_lea.vmem %s2183_s0, %s1764_s27  ;;  %v1820_v28 = vld [vmem:[%s2184_s1 + $0x50] sm:$0xff]   ;;  %v1819_v30 = vld [vmem:[%s2184_s1 + $0x48] sm:$0xff]   ;;  %v1823_v34 = vld [vmem:[%s2184_s1 + $0x78] sm:$0xff]  }
  0x12   : > { %1638 = vmatprep.subr.bf16.mxu0 %v1888_v1  ;;  %1640 = vmatprep.mubr.msk.bf16.mxu0 %vm1889_vm0, %v1888_v1  ;;  %s1974_s7 = scalar_lea.vmem %s195_s4, %s1460_s28  ;;  %v1821_v36 = vld [vmem:[%s2184_s1 + $0x40] sm:$0xff]   ;;  %v1825_v37 = vld [vmem:[%s2184_s1 + $0x70] sm:$0xff]   ;;  %v1824_v41 = vld [vmem:[%s2184_s1 + $0x68] sm:$0xff]   ;;  %s2158_s4 = sadd.s32 %s1765_s30, %s2200_s12 }
  0x13   : > { %v215_v6 = vld [vmem:[%s1974_s7] sm:$0x3]  ;;  %v1488_v15 = vld [vmem:[%s1974_s7 + $0x4] sm:$0x3]  ;;  %v2019_v35 = vld [vmem:[%s1974_s7 + $0x8] sm:$0x3] }
  0x14   : > { %1647 = vmatpush3.bf16.msra.mxu1 %v1810_v3  ;;  %v1465_v7 = vcombine.low %v215_v6, %v215_v6  ;;  %v1817_v9 = vld [vmem:[%s1974_s7] ss:$0 sps:$4 sm:$0x66]   ;;  %v1500_v20 = vcombine.low %v1488_v15, %v1488_v15  ;;  %v1999_v27 = vld [vmem:[%s1974_s7 + $0x4] ss:$0 sps:$4 sm:$0x66]   ;;  %v1533_v40 = vcombine.low %v2019_v35, %v2019_v35 }
  0x15   : > { %1639 = vmatpush3.bf16.msra.mxu0 %v1811_v4  ;;  %1660 = vmatprep.subr.bf16.mxu1 %v1888_v1  ;;  %v418_v12 = vshrl.u32 %v1817_v9, 16  ;;  %v421_v13 = vshll.u32 %v1817_v9, 16  ;;  %v355_v29 = vrot.slane %v1817_v9, 1  ;;  %v689_v32 = vshrl.u32 %v1999_v27, 16  ;;  %v1828_v44 = vld [vmem:[%s2184_s1 + $0x98] sm:$0xff]   ;;  %v1826_v45 = vld [vmem:[%s2184_s1 + $0x60] sm:$0xff]  }
  0x16   : > { %1652 = vmatprep.subr.bf16.mxu0 %v1888_v1  ;;  %v229_v10 = vshrl.u32 %v1465_v7, 16  ;;  %v231_v11 = vshll.u32 %v1465_v7, 16  ;;  %v557_v23 = vshll.u32 %v1500_v20, 16  ;;  %v555_v25 = vshrl.u32 %v1500_v20, 16  ;;  %v1830_v49 = vld [vmem:[%s2184_s1 + $0x90] sm:$0xff]   ;;  %v1829_v54 = vld [vmem:[%s2184_s1 + $0x88] sm:$0xff]  }
  0x17   : > { %1649 = vmatmul.mubr.msk.bf16.vlgmr.msra.gmra.mxu1 %vm247_vm1, %v215_v6  ;;  %v420_v17 = vrot.slane %v418_v12, 1  ;;  %v423_v18 = vrot.slane %v421_v13, 2  ;;  %v692_v33 = vshll.u32 %v1999_v27, 16  ;;  %v691_v38 = vrot.slane %v689_v32, 1  ;;  %v1833_v55 = vld [vmem:[%s2184_s1 + $0xb8] sm:$0xff]   ;;  %v1831_v60 = vld [vmem:[%s2184_s1 + $0x80] sm:$0xff]  }
  0x18   : > { %1661 = vmatpush3.bf16.msra.mxu1 %v1813_v5  ;;  %1664 = vmatprep.mubr.msk.bf16.mxu1 %vm1889_vm0, %v1888_v1  ;;  %v233_v16 = vrot.slane %v231_v11, 1  ;;  %v559_v26 = vrot.slane %v557_v23, 1  ;;  %v828_v43 = vshll.u32 %v1533_v40, 16  ;;  %v2051_v46 = vld [vmem:[%s1974_s7 + $0x8] ss:$0 sps:$4 sm:$0x66]  }
  0x19   : > { %1662 = vmatprep.subr.bf16.mxu1 %v1888_v1  ;;  %v424_v22 = vor.u32 %v423_v18, %v420_v17  ;;  %v694_v39 = vrot.slane %v692_v33, 2  ;;  %v826_v47 = vshrl.u32 %v1533_v40, 16  ;;  %v626_v50 = vrot.slane %v1999_v27, 1  ;;  %v2074_v56 = vld [vmem:[%s1974_s7 + $0xc] sm:$0x3]  ;;  %v1835_v61 = vld [vmem:[%s2184_s1 + $0xb0] sm:$0xff]  }
  0x1a   : > { %v234_v21 = vor.u32 %v233_v16, %v229_v10  ;;  %v560_v31 = vor.u32 %v559_v26, %v555_v25  ;;  %v830_v48 = vrot.slane %v828_v43, 1  ;;  %v960_v52 = vshrl.u32 %v2051_v46, 16  ;;  %v1834_v0 = vld [vmem:[%s2184_s1 + $0xa8] sm:$0xff]   ;;  %v1838_v2 = vld [vmem:[%s2184_s1 + $0xd8] sm:$0xff]   ;;  %v1836_v6 = vld [vmem:[%s2184_s1 + $0xa0] sm:$0xff]   ;;  %s1458_s5 = sshll.u32 %s2158_s4, 2 }
  0x1b   : > { %v695_v42 = vor.u32 %v694_v39, %v691_v38  ;;  %v963_v53 = vshll.u32 %v2051_v46, 16  ;;  %v1566_v59 = vcombine.low %v2074_v56, %v2074_v56  ;;  %v1847_v5 = vld [vmem:[%s1974_s7 + $0xc] ss:$0 sps:$4 sm:$0x66]   ;;  %v1840_v7 = vld [vmem:[%s2184_s1 + $0xd0] sm:$0xff]   ;;  %v1843_v13 = vld [vmem:[%s2184_s1 + $0xf8] sm:$0xff]   ;;  %s203_s8 = scalar_lea.vmem %s2185_s2, %s1458_s5 }
  0x1c   : > { %1663 = vmatpush3.bf16.msra.mxu1 %v1815_v8  ;;  %1641 = vmatmul.mubr.msk.bf16.vlgmr.msra.gmra.mxu0 %vm247_vm1, %v234_v21  ;;  %v831_v51 = vor.u32 %v830_v48, %v826_v47  ;;  %v962_v57 = vrot.slane %v960_v52, 1  ;;  %v897_v8 = vrot.slane %v2051_v46, 1  ;;  %v1231_v10 = vshrl.u32 %v1847_v5, 16  ;;  %v1839_v12 = vld [vmem:[%s2184_s1 + $0xc8] sm:$0xff]   ;;  %v1841_v16 = vld [vmem:[%s2184_s1 + $0xc0] sm:$0xff]   ;;  %v1845_v17 = vld [vmem:[%s2184_s1 + $0xf0] sm:$0xff]  }
  0x1d   : > { %1676 = vmatprep.subr.bf16.mxu1 %v1888_v1  ;;  %1653 = vmatpush3.bf16.msra.mxu0 %v1814_v14  ;;  %v965_v58 = vrot.slane %v963_v53, 2  ;;  %v1099_v63 = vshll.u32 %v1566_v59, 16  ;;  %v1097_v3 = vshrl.u32 %v1566_v59, 16  ;;  %v1234_v11 = vshll.u32 %v1847_v5, 16  ;;  %v1846_v20 = vld [vmem:[%s2184_s1 + $0xe0] sm:$0xff]   ;;  %s1459_s12 = sshll.u32 %s2158_s4, 1 }
  0x1e   : > { %1654 = vmatprep.subr.bf16.mxu0 %v1888_v1  ;;  %1656 = vmatprep.mubr.msk.bf16.mxu0 %vm1889_vm0, %v1888_v1  ;;  %v1233_v14 = vrot.slane %v1231_v10, 1  ;;  %v1168_v21 = vrot.slane %v1847_v5, 1  ;;  %s211_s11 = scalar_lea.vmem %s2186_s3, %s1459_s12 }
  0x1f   : > { %1665 = vmatmul.mubr.msk.bf16.vlgmr.msra.gmra.mxu1 %vm247_vm1, %v424_v22  ;;  %v966_v62 = vor.u32 %v965_v58, %v962_v57  ;;  %v1101_v4 = vrot.slane %v1099_v63, 1 }
  0x20   : > { %1677 = vmatpush3.bf16.msra.mxu1 %v1818_v19  ;;  %1680 = vmatprep.mubr.msk.bf16.mxu1 %vm1889_vm0, %v1888_v1  ;;  %v1844_v19 = vld [vmem:[%s2184_s1 + $0xe8] sm:$0xff]  }
  0x21   : > { %1678 = vmatprep.subr.bf16.mxu1 %v1888_v1  ;;  %1655 = vmatpush3.bf16.msra.mxu0 %v1816_v24  ;;  %v1102_v9 = vor.u32 %v1101_v4, %v1097_v3 }
  0x22   : > { %1668 = vmatprep.subr.bf16.mxu0 %v1888_v1 }
  0x24   : > { %1679 = vmatpush3.bf16.msra.mxu1 %v1820_v28  ;;  %1657 = vmatmul.mubr.msk.bf16.vlgmr.msra.gmra.mxu0 %vm247_vm1, %v355_v29 }
  0x25   : > { %1692 = vmatprep.subr.bf16.mxu1 %v1888_v1  ;;  %1669 = vmatpush3.bf16.msra.mxu0 %v1819_v30 }
  0x26   : > { %1670 = vmatprep.subr.bf16.mxu0 %v1888_v1  ;;  %1672 = vmatprep.mubr.msk.bf16.mxu0 %vm1889_vm0, %v1888_v1 }
  0x27   : > { %1681 = vmatmul.mubr.msk.bf16.vlgmr.msra.gmra.mxu1 %vm247_vm1, %v560_v31 }
  0x28   : > { %1693 = vmatpush3.bf16.msra.mxu1 %v1823_v34  ;;  %1696 = vmatprep.mubr.msk.bf16.mxu1 %vm1889_vm0, %v1888_v1 }
  0x29   : > { %1694 = vmatprep.subr.bf16.mxu1 %v1888_v1  ;;  %1671 = vmatpush3.bf16.msra.mxu0 %v1821_v36 }
  0x2a   : > { %1684 = vmatprep.subr.bf16.mxu0 %v1888_v1 }
  0x2c   : > { %1695 = vmatpush3.bf16.msra.mxu1 %v1825_v37  ;;  %1673 = vmatmul.mubr.msk.bf16.vlgmr.msra.gmra.mxu0 %vm247_vm1, %v1488_v15  ;;  %v1236_v15 = vrot.slane %v1234_v11, 2 }
  0x2d   : > { %1708 = vmatprep.subr.bf16.mxu1 %v1888_v1  ;;  %1685 = vmatpush3.bf16.msra.mxu0 %v1824_v41 }
  0x2e   : > { %1686 = vmatprep.subr.bf16.mxu0 %v1888_v1  ;;  %1688 = vmatprep.mubr.msk.bf16.mxu0 %vm1889_vm0, %v1888_v1  ;;  %v1237_v18 = vor.u32 %v1236_v15, %v1233_v14 }
  0x2f   : > { %1697 = vmatmul.mubr.msk.bf16.vlgmr.msra.gmra.mxu1 %vm247_vm1, %v695_v42 }
  0x30   : > { %1709 = vmatpush3.bf16.msra.mxu1 %v1828_v44  ;;  %1712 = vmatprep.mubr.msk.bf16.mxu1 %vm1889_vm0, %v1888_v1 }
  0x31   : > { %1710 = vmatprep.subr.bf16.mxu1 %v1888_v1  ;;  %1687 = vmatpush3.bf16.msra.mxu0 %v1826_v45 }
  0x32   : > { %1700 = vmatprep.subr.bf16.mxu0 %v1888_v1 }
  0x34   : > { %1711 = vmatpush3.bf16.msra.mxu1 %v1830_v49  ;;  %1689 = vmatmul.mubr.msk.bf16.vlgmr.msra.gmra.mxu0 %vm247_vm1, %v626_v50 }
  0x35   : > { %1724 = vmatprep.subr.bf16.mxu1 %v1888_v1  ;;  %1701 = vmatpush3.bf16.msra.mxu0 %v1829_v54 }
  0x36   : > { %1702 = vmatprep.subr.bf16.mxu0 %v1888_v1  ;;  %1704 = vmatprep.mubr.msk.bf16.mxu0 %vm1889_vm0, %v1888_v1 }
  0x37   : > { %1713 = vmatmul.mubr.msk.bf16.vlgmr.msra.gmra.mxu1 %vm247_vm1, %v831_v51 }
  0x38   : > { %1725 = vmatpush3.bf16.msra.mxu1 %v1833_v55  ;;  %1728 = vmatprep.mubr.msk.bf16.mxu1 %vm1889_vm0, %v1888_v1 }
  0x39   : > { %1726 = vmatprep.subr.bf16.mxu1 %v1888_v1  ;;  %1703 = vmatpush3.bf16.msra.mxu0 %v1831_v60 }
  0x3a   : > { %1716 = vmatprep.subr.bf16.mxu0 %v1888_v1 }
  0x3c   : > { %1727 = vmatpush3.bf16.msra.mxu1 %v1835_v61  ;;  %1705 = vmatmul.mubr.msk.bf16.vlgmr.msra.gmra.mxu0 %vm247_vm1, %v2019_v35 }
  0x3d   : > { %1740 = vmatprep.subr.bf16.mxu1 %v1888_v1  ;;  %1717 = vmatpush3.bf16.msra.mxu0 %v1834_v0 }
  0x3e   : > { %1718 = vmatprep.subr.bf16.mxu0 %v1888_v1  ;;  %1720 = vmatprep.mubr.msk.bf16.mxu0 %vm1889_vm0, %v1888_v1 }
  0x3f   : > { %1729 = vmatmul.mubr.msk.bf16.vlgmr.msra.gmra.mxu1 %vm247_vm1, %v966_v62 }
  0x40   : > { %1741 = vmatpush3.bf16.msra.mxu1 %v1838_v2  ;;  %1744 = vmatprep.mubr.msk.bf16.mxu1 %vm1889_vm0, %v1888_v1 }
  0x41   : > { %1742 = vmatprep.subr.bf16.mxu1 %v1888_v1  ;;  %1719 = vmatpush3.bf16.msra.mxu0 %v1836_v6 }
  0x42   : > { %1732 = vmatprep.subr.bf16.mxu0 %v1888_v1 }
  0x44   : > { %1743 = vmatpush3.bf16.msra.mxu1 %v1840_v7  ;;  %1721 = vmatmul.mubr.msk.bf16.vlgmr.msra.gmra.mxu0 %vm247_vm1, %v897_v8 }
  0x45   : > { %1756 = vmatprep.subr.bf16.mxu1 %v1888_v1  ;;  %1733 = vmatpush3.bf16.msra.mxu0 %v1839_v12 }
  0x46   : > { %1734 = vmatprep.subr.bf16.mxu0 %v1888_v1  ;;  %1736 = vmatprep.mubr.msk.bf16.mxu0 %vm1889_vm0, %v1888_v1 }
  0x47   : > { %1745 = vmatmul.mubr.msk.bf16.vlgmr.msra.gmra.mxu1 %vm247_vm1, %v1102_v9 }
  0x48   : > { %1757 = vmatpush3.bf16.msra.mxu1 %v1843_v13  ;;  %1760 = vmatprep.mubr.msk.bf16.mxu1 %vm1889_vm0, %v1888_v1 }
  0x49   : > { %1758 = vmatprep.subr.bf16.mxu1 %v1888_v1  ;;  %1735 = vmatpush3.bf16.msra.mxu0 %v1841_v16 }
  0x4a   : > { %1748 = vmatprep.subr.bf16.mxu0 %v1888_v1 }
  0x4c   : > { %1759 = vmatpush3.bf16.msra.mxu1 %v1845_v17  ;;  %1737 = vmatmul.mubr.msk.bf16.vlgmr.msra.gmra.mxu0 %vm247_vm1, %v2074_v56 }
  0x4d   : > { %1749 = vmatpush3.bf16.msra.mxu0 %v1844_v19  ;;  %1752 = vmatprep.mubr.msk.bf16.mxu0 %vm1889_vm0, %v1888_v1 }
  0x4e   : > { %1750 = vmatprep.subr.bf16.mxu0 %v1888_v1 }
  0x4f   : > { %1761 = vmatmul.mubr.msk.bf16.vlgmr.msra.gmra.mxu1 %vm247_vm1, %v1237_v18 }
  0x51   : > { %1751 = vmatpush3.bf16.msra.mxu0 %v1846_v20 }
  0x54   : > { %1753 = vmatmul.mubr.msk.bf16.vlgmr.msra.gmra.mxu0 %vm247_vm1, %v1168_v21 }
  0xd7   : > { %v340_v22 = vpop.f32.mrf.mxu1 }
  0xd9   : > { %v1650_v23 = vpop.f32.mrf.mxu1 }
  0xdb   : > { %v343_v24 = vpop.f32.mrf.mxu1 }
  0xdc   : > { %v285_v26 = vpop.f32.mrf.mxu0 }
  0xdd   : > { %v1651_v25 = vpop.f32.mrf.mxu1  ;;  %v341_v45 = vadd.f32 %v340_v22, %v285_v26 }
  0xde   : > { %v1642_v28 = vpop.f32.mrf.mxu0 }
  0xdf   : > { %v474_v27 = vpop.f32.mrf.mxu1 }
  0xe0   : > { %v288_v30 = vpop.f32.mrf.mxu0 }
  0xe1   : > { %v1666_v29 = vpop.f32.mrf.mxu1 }
  0xe2   : > { %v1643_v32 = vpop.f32.mrf.mxu0 }
  0xe3   : > { %v477_v31 = vpop.f32.mrf.mxu1 }
  0xe4   : > { %v405_v34 = vpop.f32.mrf.mxu0 }
  0xe5   : > { %v1667_v33 = vpop.f32.mrf.mxu1  ;;  %v411_v48 = vadd.f32 %v405_v34, %v341_v45 }
  0xe6   : > { %v1658_v36 = vpop.f32.mrf.mxu0 }
  0xe7   : > { %v610_v35 = vpop.f32.mrf.mxu1  ;;  %v480_v53 = vadd.f32 %v474_v27, %v411_v48 }
  0xe8   : > { %v408_v37 = vpop.f32.mrf.mxu0 }
  0xe9   : > { %v1682_v1 = vpop.f32.mrf.mxu1 }
  0xea   : > { %v1659_v39 = vpop.f32.mrf.mxu0 }
  0xeb   : > { %v613_v38 = vpop.f32.mrf.mxu1 }
  0xec   : > { %v539_v41 = vpop.f32.mrf.mxu0 }
  0xed   : > { %v1683_v40 = vpop.f32.mrf.mxu1  ;;  %v545_v56 = vadd.f32 %v539_v41, %v480_v53 }
  0xee   : > { %v1674_v43 = vpop.f32.mrf.mxu0 }
  0xef   : > { %v745_v42 = vpop.f32.mrf.mxu1  ;;  %v616_v61 = vadd.f32 %v610_v35, %v545_v56 }
  0xf0   : > { %v542_v46 = vpop.f32.mrf.mxu0 }
  0xf1   : > { %v1698_v44 = vpop.f32.mrf.mxu1 }
  0xf2   : > { %v1675_v49 = vpop.f32.mrf.mxu0 }
  0xf3   : > { %v748_v47 = vpop.f32.mrf.mxu1 }
  0xf4   : > { %v676_v51 = vpop.f32.mrf.mxu0 }
  0xf5   : > { %v1699_v50 = vpop.f32.mrf.mxu1  ;;  %v682_v0 = vadd.f32 %v676_v51, %v616_v61 }
  0xf6   : > { %v1690_v54 = vpop.f32.mrf.mxu0 }
  0xf7   : > { %v881_v52 = vpop.f32.mrf.mxu1  ;;  %v751_v6 = vadd.f32 %v745_v42, %v682_v0 }
  0xf8   : > { %v679_v57 = vpop.f32.mrf.mxu0 }
  0xf9   : > { %v1714_v55 = vpop.f32.mrf.mxu1 }
  0xfa   : > { %v1691_v59 = vpop.f32.mrf.mxu0 }
  0xfb   : > { %v884_v58 = vpop.f32.mrf.mxu1 }
  0xfc   : > { %v810_v62 = vpop.f32.mrf.mxu0 }
  0xfd   : > { %v1715_v60 = vpop.f32.mrf.mxu1  ;;  %v816_v9 = vadd.f32 %v810_v62, %v751_v6 }
  0xfe   : > { %v1706_v2 = vpop.f32.mrf.mxu0 }
  0xff   : > { %v1016_v63 = vpop.f32.mrf.mxu1  ;;  %v887_v14 = vadd.f32 %v881_v52, %v816_v9 }
 0x100   : > { %v813_v4 = vpop.f32.mrf.mxu0 }
 0x101   : > { %v1730_v3 = vpop.f32.mrf.mxu1 }
 0x102   : > { %v1707_v7 = vpop.f32.mrf.mxu0 }
 0x103   : > { %v1019_v5 = vpop.f32.mrf.mxu1 }
 0x104   : > { %v947_v10 = vpop.f32.mrf.mxu0 }
 0x105   : > { %v1731_v8 = vpop.f32.mrf.mxu1  ;;  %v953_v17 = vadd.f32 %v947_v10, %v887_v14 }
 0x106   : > { %v1722_v12 = vpop.f32.mrf.mxu0 }
 0x107   : > { %v1152_v11 = vpop.f32.mrf.mxu1  ;;  %v1022_v22 = vadd.f32 %v1016_v63, %v953_v17 }
 0x108   : > { %v950_v15 = vpop.f32.mrf.mxu0 }
 0x109   : > { %v1746_v13 = vpop.f32.mrf.mxu1 }
 0x10a   : > { %v1723_v18 = vpop.f32.mrf.mxu0 }
 0x10b   : > { %v1155_v16 = vpop.f32.mrf.mxu1 }
 0x10c   : > { %v1081_v20 = vpop.f32.mrf.mxu0 }
 0x10d   : > { %v1747_v19 = vpop.f32.mrf.mxu1  ;;  %v1087_v25 = vadd.f32 %v1081_v20, %v1022_v22 }
 0x10e   : > { %v1738_v23 = vpop.f32.mrf.mxu0 }
 0x10f   : > { %v1287_v21 = vpop.f32.mrf.mxu1  ;;  %v1158_v30 = vadd.f32 %v1152_v11, %v1087_v25 }
 0x110   : > { %v1084_v26 = vpop.f32.mrf.mxu0 }
 0x111   : > { %v1762_v24 = vpop.f32.mrf.mxu1 }
 0x112   : > { %v1739_v28 = vpop.f32.mrf.mxu0 }
 0x113   : > { %v1290_v27 = vpop.f32.mrf.mxu1 }
 0x114   : > { %v1218_v31 = vpop.f32.mrf.mxu0 }
 0x115   : > { %v1763_v29 = vpop.f32.mrf.mxu1  ;;  %v1224_v32 = vadd.f32 %v1218_v31, %v1158_v30 }
 0x116   : > { %v1754_v33 = vpop.f32.mrf.mxu0 }
 0x117   : > { %v1293_v34 = vadd.f32 %v1287_v21, %v1224_v32 }
 0x118   : > { %v1221_v35 = vpop.f32.mrf.mxu0 }
 0x119   : > { %v1295_v36 = vsel %vm1294_vm2, %v1293_v34, 0.0  ;;  %v1302_v1 = vmul.f32 %v1293_v34, %v1293_v34  ;;  %1313 = vst [vmem:[%s203_s8] sm:$0x7] %v1293_v34 }
 0x11a   : > { %v1296_v37 = vrot.slane %v1295_v36, 4  ;;  %v1755_v38 = vpop.f32.mrf.mxu0 }
 0x11b   : > { %v1303_v39 = vsel %vm1294_vm2, %v1302_v1, 0.0 }
 0x11c   : > { %v1297_v40 = vadd.f32 %v1296_v37, %v1295_v36  ;;  %v1304_v41 = vrot.slane %v1303_v39, 4 }
 0x11e   : > { %v1298_v42 = vrot.slane %v1297_v40, 2  ;;  %v1305_v43 = vadd.f32 %v1304_v41, %v1303_v39 }
 0x120   : > { %v1299_v44 = vadd.f32 %v1298_v42, %v1297_v40  ;;  %v1306_v45 = vrot.slane %v1305_v43, 2 }
 0x122   : > { %v1300_v46 = vrot.slane %v1299_v44, 1  ;;  %v1307_v47 = vadd.f32 %v1306_v45, %v1305_v43 }
 0x124   : > { %v1308_v48 = vrot.slane %v1307_v47, 1  ;;  %v1301_v49 = vadd.f32 %v1300_v46, %v1299_v44 }
 0x126   : > { %v1309_v50 = vadd.f32 %v1308_v48, %v1307_v47 }
 0x128   : > { %v1311_v51 = vsel %vm1310_vm3, %v1301_v49, %v1309_v50 }
 0x129   : > { %1312 = vst [vmem:[%s211_s11] sm:$0x3] %v1311_v51 }
 0x12a PF: > { %s14_s16 = sadd.s32 1, %s1886_s16   ;;  %s2187_s12 = smov %s1878_s14 }
 0x12b   : > { %p11_p7 = scmp.ge.s32.totalorder %s14_s16, 8   ;;  %s2188_s13 = smov %s1882_s15 }
 0x12c   : > { %s2189_s14 = smov %s2192_s17  ;;  %s2190_s15 = smov %s2196_s18 }
 0x12d   :  { %13 = sbr.rel (!%p11_p7) target bundleno = 3 (0x3), region = 89 }

// kernel: forward.15
= control target key start
LH: loop header
LB: loop body
LE: loop exit
PB: predicated region body
PF: predicated region fallthrough
CT: control target
= control target key end

     0   :  { %s2341_s12 = smov 0   ;;  %s2343_s13 = smov 0   ;;  %s2730_s0 = inlined_call_operand.vmem [shape: bf16[2,1,5,5,64], index: 0, kind: input, shape index: {}]   ;;  %s2731_s1 = inlined_call_operand.vmem [shape: bf16[16,64,128], index: 1, kind: input, shape index: {}]   ;;  %s2732_s2 = inlined_call_operand.vmem [shape: f32[1,128], index: 2, kind: input, shape index: {}]   ;;  %s2733_s3 = inlined_call_operand.vmem [shape: f32[2,2,2,128], index: 3, kind: output, shape index: {}]  }
   0x1   :  { %s2345_s14 = smov 0   ;;  %s2347_s15 = smov 0  }
   0x2   :  { %s2349_s16 = smov 0  }
   0x3 LB: > { %s22_s17 = sadd.s32 1, %s2309_s14  ;;  %s25_s18 = sadd.s32 1, %s2313_s15  ;;  %s2317_s16 = sphi %s2349_s16, %s13_s16   ;;  %s2313_s15 = sphi %s2347_s15, %s2737_s15   ;;  %s2309_s14 = sphi %s2345_s14, %s2736_s14   ;;  %s2305_s13 = sphi %s2343_s13, %s2735_s13   ;;  %s2301_s12 = sphi %s2341_s12, %s2734_s12  }
   0x4   : > { %p23_p0 = scmp.ge.s32.totalorder %s22_s17, 2  ;;  %p1653_p1 = scmp.ge.s32.totalorder %s2317_s16, 1 }
   0x5   : > { %p151_p2 = scmp.lt.s32.totalorder %s2317_s16, 5 }
   0x6   : > { %s2739_s17 = smov (%p23_p0, %s22_s17), 0  ;;  %s2741_s18 = smov (!%p23_p0, %s25_s18), %s2313_s15 }
   0x7   : > { %p152_p3 = pnand %p1653_p1, %p151_p2  ;;  %p27_p4 = scmp.ge.s32.totalorder %s2741_s18, 2 }
   0x8   : > { %p178_p5 = scmp.lt.s32.totalorder (!%p152_p3), %s2305_s13, 1  ;;  %s1657_s27 = sshll.u32 (!%p152_p3), %s2301_s12, 2 }
   0x9   : > { %s2743_s18 = smov (%p27_p4, %s2741_s18), 0  ;;  %155 = sbr.rel (%p152_p3) target bundleno = 343 (0x157), region = 32 }
   0xa   : > { %p185_p6 = scmp.lt.s32.totalorder (!%p152_p3), %s2301_s12, 1 }
   0xe   : > { %v2203_v0 = vld [vmem:[%s2731_s1 + $0x38] sm:$0xff]   ;;  %v2319_v1 = vmov 0.0   ;;  %v2205_v3 = vld [vmem:[%s2731_s1 + $0x30] sm:$0xff]   ;;  %vm2320_vm0 = vmmov 0   ;;  %s2745_s13 = smov (!%p178_p5, %s2305_s13), 1  ;;  %v2207_v5 = vld [vmem:[%s2731_s1 + $0x28] sm:$0xff]  }
   0xf   : > { %1968 = vmatprep.subr.bf16.mxu0 %v2319_v1  ;;  %1980 = vmatprep.subr.bf16.mxu1 %v2319_v1  ;;  %v2204_v2 = vld [vmem:[%s2731_s1 + $0x18] sm:$0xff]   ;;  %v2206_v4 = vld [vmem:[%s2731_s1 + $0x10] sm:$0xff]   ;;  %s2160_s30 = smul.u32 20, %s2745_s13  ;;  %v2208_v6 = vld [vmem:[%s2731_s1 + $0x8] sm:$0xff]   ;;  %vm247_vm1 = vcmask 523264   ;;  %s2747_s12 = smov (!%p185_p6, %s2301_s12), 1 }
  0x10   : > { %1969 = vmatpush3.bf16.msra.mxu0 %v2203_v0  ;;  %1976 = vmatprep.mubr.msk.bf16.mxu0 %vm2320_vm0, %v2319_v1  ;;  %v2209_v7 = vld [vmem:[%s2731_s1 + $0x20] sm:$0xff]   ;;  %v2212_v12 = vld [vmem:[%s2731_s1 + $0x58] sm:$0xff]   ;;  %v2214_v17 = vld [vmem:[%s2731_s1 + $0x50] sm:$0xff]  }
  0x11   : > { %1981 = vmatpush3.bf16.msra.mxu1 %v2204_v2  ;;  %1970 = vmatprep.subr.bf16.mxu0 %v2319_v1  ;;  %s182_s8 = scalar_lea.vmem %s2730_s0, %s2160_s30  ;;  %v2210_v9 = vld [vmem:[%s2731_s1] sm:$0xff]   ;;  %v2213_v14 = vld [vmem:[%s2731_s1 + $0x78] sm:$0xff]   ;;  %v2215_v19 = vld [vmem:[%s2731_s1 + $0x70] sm:$0xff]  }
  0x12   : > { %1982 = vmatprep.subr.bf16.mxu1 %v2319_v1  ;;  %1988 = vmatprep.mubr.msk.bf16.mxu1 %vm2320_vm0, %v2319_v1  ;;  %s2412_s9 = scalar_lea.vmem %s182_s8, %s1657_s27  ;;  %v2216_v20 = vld [vmem:[%s2731_s1 + $0x48] sm:$0xff]   ;;  %v2218_v27 = vld [vmem:[%s2731_s1 + $0x40] sm:$0xff]   ;;  %v2222_v31 = vld [vmem:[%s2731_s1 + $0x98] sm:$0xff]  }
  0x13   : > { %v2211_v8 = vld [vmem:[%s2412_s9] ss:$0 sps:$4 sm:$0x33]   ;;  %v2217_v23 = vld [vmem:[%s2731_s1 + $0x68] sm:$0xff]   ;;  %v2223_v32 = vld [vmem:[%s2731_s1 + $0xb8] sm:$0xff]  }
  0x14   : > { %1971 = vmatpush3.bf16.msra.mxu0 %v2205_v3  ;;  %v217_v10 = vshrl.u32 %v2211_v8, 16  ;;  %v219_v11 = vshll.u32 %v2211_v8, 16  ;;  %v194_v15 = vld [vmem:[%s2412_s9] sm:$0x1]  ;;  %v2224_v34 = vld [vmem:[%s2731_s1 + $0x90] sm:$0xff]   ;;  %v2226_v36 = vld [vmem:[%s2731_s1 + $0x88] sm:$0xff]  }
  0x15   : > { %1983 = vmatpush3.bf16.msra.mxu1 %v2206_v4  ;;  %1972 = vmatprep.subr.bf16.mxu0 %v2319_v1  ;;  %v2221_v18 = vld [vmem:[%s2412_s9] ss:$0 sps:$4 sm:$0x66]   ;;  %v2230_v33 = vld [vmem:[%s2412_s9 + $0x4] ss:$0 sps:$4 sm:$0x33]  }
  0x16   : > { %1984 = vmatprep.subr.bf16.mxu1 %v2319_v1  ;;  %v221_v13 = vrot.slane %v219_v11, 1  ;;  %v454_v21 = vshrl.u32 %v2221_v18, 16  ;;  %v457_v22 = vshll.u32 %v2221_v18, 16  ;;  %v2220_v24 = vld [vmem:[%s2412_s9] ss:$0 sps:$4 sm:$0x22]  }
  0x17   : > { %v2219_v28 = vld [vmem:[%s2731_s1 + $0x60] sm:$0xff]   ;;  %v371_v29 = vrot.slane %v2220_v24, 1  ;;  %v2225_v35 = vld [vmem:[%s2731_s1 + $0xb0] sm:$0xff]   ;;  %v626_v37 = vshll.u32 %v2230_v33, 16  ;;  %v2227_v38 = vld [vmem:[%s2731_s1 + $0xa8] sm:$0xff]   ;;  %v624_v40 = vshrl.u32 %v2230_v33, 16 }
  0x18   : > { %1973 = vmatpush3.bf16.msra.mxu0 %v2207_v5  ;;  %v222_v16 = vor.u32 %v221_v13, %v217_v10  ;;  %v456_v25 = vrot.slane %v454_v21, 1  ;;  %v459_v26 = vrot.slane %v457_v22, 2  ;;  %v2228_v39 = vld [vmem:[%s2731_s1 + $0x80] sm:$0xff]   ;;  %v2231_v45 = vld [vmem:[%s2731_s1 + $0xd8] sm:$0xff]   ;;  %v2233_v47 = vld [vmem:[%s2731_s1 + $0xd0] sm:$0xff]  }
  0x19   : > { %1985 = vmatpush3.bf16.msra.mxu1 %v2208_v6  ;;  %1974 = vmatprep.subr.bf16.mxu0 %v2319_v1  ;;  %v628_v41 = vrot.slane %v626_v37, 1  ;;  %v2229_v42 = vld [vmem:[%s2731_s1 + $0xa0] sm:$0xff]   ;;  %v2232_v46 = vld [vmem:[%s2731_s1 + $0xf8] sm:$0xff]   ;;  %v2234_v49 = vld [vmem:[%s2731_s1 + $0xf0] sm:$0xff]  }
  0x1a   : > { %1986 = vmatprep.subr.bf16.mxu1 %v2319_v1  ;;  %v460_v30 = vor.u32 %v459_v26, %v456_v25  ;;  %v1706_v43 = vld [vmem:[%s2412_s9 + $0x4] sm:$0x1]  ;;  %v2235_v52 = vld [vmem:[%s2731_s1 + $0xc8] sm:$0xff]   ;;  %v2241_v61 = vld [vmem:[%s2731_s1 + $0x118] sm:$0xff]  }
  0x1b   : > { %v629_v44 = vor.u32 %v628_v41, %v624_v40  ;;  %v2240_v48 = vld [vmem:[%s2412_s9 + $0x4] ss:$0 sps:$4 sm:$0x66]   ;;  %v2236_v53 = vld [vmem:[%s2731_s1 + $0xe8] sm:$0xff]   ;;  %v2242_v62 = vld [vmem:[%s2731_s1 + $0x138] sm:$0xff]  }
  0x1c   : > { %1975 = vmatpush3.bf16.msra.mxu0 %v2209_v7  ;;  %v794_v50 = vshrl.u32 %v2240_v48, 16  ;;  %v797_v51 = vshll.u32 %v2240_v48, 16  ;;  %v2239_v54 = vld [vmem:[%s2412_s9 + $0x4] ss:$0 sps:$4 sm:$0x22]   ;;  %v2243_v63 = vld [vmem:[%s2731_s1 + $0x110] sm:$0xff]  }
  0x1d   : > { %1987 = vmatpush3.bf16.msra.mxu1 %v2210_v9  ;;  %1992 = vmatprep.subr.bf16.mxu0 %v2319_v1  ;;  %v2237_v55 = vld [vmem:[%s2731_s1 + $0xc0] sm:$0xff]   ;;  %v711_v59 = vrot.slane %v2239_v54, 1  ;;  %v2244_v0 = vld [vmem:[%s2731_s1 + $0x130] sm:$0xff]   ;;  %v2249_v2 = vld [vmem:[%s2412_s9 + $0x8] ss:$0 sps:$4 sm:$0x33]  }
  0x1e   : > { %2004 = vmatprep.subr.bf16.mxu1 %v2319_v1  ;;  %v796_v56 = vrot.slane %v794_v50, 1  ;;  %v799_v57 = vrot.slane %v797_v51, 2  ;;  %v2238_v58 = vld [vmem:[%s2731_s1 + $0xe0] sm:$0xff]   ;;  %v2245_v3 = vld [vmem:[%s2731_s1 + $0x108] sm:$0xff]   ;;  %v966_v4 = vshll.u32 %v2249_v2, 16  ;;  %v964_v6 = vshrl.u32 %v2249_v2, 16 }
  0x1f   : > { %1977 = vmatmul.mubr.msk.bf16.vlgmr.msra.gmra.mxu0 %vm247_vm1, %v222_v16  ;;  %v2246_v5 = vld [vmem:[%s2731_s1 + $0x128] sm:$0xff]   ;;  %v2247_v8 = vld [vmem:[%s2731_s1 + $0x100] sm:$0xff]   ;;  %v2251_v13 = vld [vmem:[%s2731_s1 + $0x178] sm:$0xff]  }
  0x20   : > { %1989 = vmatmul.mubr.msk.bf16.vlgmr.msra.gmra.mxu1 %vm247_vm1, %v194_v15  ;;  %1993 = vmatpush3.bf16.msra.mxu0 %v2212_v12  ;;  %v800_v60 = vor.u32 %v799_v57, %v796_v56  ;;  %v968_v7 = vrot.slane %v966_v4, 1  ;;  %v2248_v9 = vld [vmem:[%s2731_s1 + $0x120] sm:$0xff]   ;;  %v1766_v11 = vld [vmem:[%s2412_s9 + $0x8] sm:$0x1]  ;;  %v2250_v12 = vld [vmem:[%s2731_s1 + $0x158] sm:$0xff]  }
  0x21   : > { %2005 = vmatpush3.bf16.msra.mxu1 %v2213_v14  ;;  %1994 = vmatprep.subr.bf16.mxu0 %v2319_v1  ;;  %v2259_v14 = vld [vmem:[%s2412_s9 + $0x8] ss:$0 sps:$4 sm:$0x66]   ;;  %v2252_v15 = vld [vmem:[%s2731_s1 + $0x150] sm:$0xff]   ;;  %v2256_v24 = vld [vmem:[%s2731_s1 + $0x140] sm:$0xff]  }
  0x22   : > { %2006 = vmatprep.subr.bf16.mxu1 %v2319_v1  ;;  %2000 = vmatprep.mubr.msk.bf16.mxu0 %vm2320_vm0, %v2319_v1  ;;  %v969_v10 = vor.u32 %v968_v7, %v964_v6  ;;  %v2253_v16 = vld [vmem:[%s2731_s1 + $0x170] sm:$0xff]   ;;  %v1137_v18 = vshll.u32 %v2259_v14, 16  ;;  %v2258_v21 = vld [vmem:[%s2412_s9 + $0x8] ss:$0 sps:$4 sm:$0x22]   ;;  %v2257_v25 = vld [vmem:[%s2731_s1 + $0x160] sm:$0xff]  }
  0x23   : > { %2012 = vmatprep.mubr.msk.bf16.mxu1 %vm2320_vm0, %v2319_v1  ;;  %v1051_v26 = vrot.slane %v2258_v21, 1  ;;  %v1826_v41 = vld [vmem:[%s2412_s9 + $0xc] sm:$0x1]  ;;  %v2275_v54 = vld [vmem:[%s2731_s1 + $0x1c0] sm:$0xff]  }
  0x24   : > { %1995 = vmatpush3.bf16.msra.mxu0 %v2214_v17  ;;  %v1134_v17 = vshrl.u32 %v2259_v14, 16  ;;  %v2274_v50 = vld [vmem:[%s2731_s1 + $0x1e8] sm:$0xff]  }
  0x25   : > { %2007 = vmatpush3.bf16.msra.mxu1 %v2215_v19  ;;  %1996 = vmatprep.subr.bf16.mxu0 %v2319_v1  ;;  %v2254_v19 = vld [vmem:[%s2731_s1 + $0x148] sm:$0xff]  }
  0x26   : > { %2008 = vmatprep.subr.bf16.mxu1 %v2319_v1  ;;  %v1136_v22 = vrot.slane %v1134_v17, 1  ;;  %v2277_v51 = vld [vmem:[%s2412_s9 + $0xc] ss:$0 sps:$4 sm:$0x22]  }
  0x27   : > { %v1391_v56 = vrot.slane %v2277_v51, 1 }
  0x28   : > { %1997 = vmatpush3.bf16.msra.mxu0 %v2216_v20  ;;  %v2255_v20 = vld [vmem:[%s2731_s1 + $0x168] sm:$0xff]  }
  0x29   : > { %2009 = vmatpush3.bf16.msra.mxu1 %v2217_v23  ;;  %1998 = vmatprep.subr.bf16.mxu0 %v2319_v1  ;;  %v1139_v23 = vrot.slane %v1137_v18, 2 }
  0x2a   : > { %2010 = vmatprep.subr.bf16.mxu1 %v2319_v1 }
  0x2c   : > { %1999 = vmatpush3.bf16.msra.mxu0 %v2218_v27  ;;  %v1140_v27 = vor.u32 %v1139_v23, %v1136_v22 }
  0x2d   : > { %2011 = vmatpush3.bf16.msra.mxu1 %v2219_v28  ;;  %2016 = vmatprep.subr.bf16.mxu0 %v2319_v1  ;;  %v2260_v28 = vld [vmem:[%s2731_s1 + $0x198] sm:$0xff]  }
  0x2e   : > { %2028 = vmatprep.subr.bf16.mxu1 %v2319_v1 }
  0x2f   : > { %2001 = vmatmul.mubr.msk.bf16.vlgmr.msra.gmra.mxu0 %vm247_vm1, %v371_v29  ;;  %v2261_v29 = vld [vmem:[%s2731_s1 + $0x1b8] sm:$0xff]  }
  0x30   : > { %2013 = vmatmul.mubr.msk.bf16.vlgmr.msra.gmra.mxu1 %vm247_vm1, %v460_v30  ;;  %2017 = vmatpush3.bf16.msra.mxu0 %v2222_v31  ;;  %v2268_v30 = vld [vmem:[%s2412_s9 + $0xc] ss:$0 sps:$4 sm:$0x33]   ;;  %v2262_v31 = vld [vmem:[%s2731_s1 + $0x190] sm:$0xff]  }
  0x31   : > { %2029 = vmatpush3.bf16.msra.mxu1 %v2223_v32  ;;  %2018 = vmatprep.subr.bf16.mxu0 %v2319_v1  ;;  %v2263_v32 = vld [vmem:[%s2731_s1 + $0x1b0] sm:$0xff]   ;;  %v1306_v33 = vshll.u32 %v2268_v30, 16 }
  0x32   : > { %2030 = vmatprep.subr.bf16.mxu1 %v2319_v1  ;;  %2024 = vmatprep.mubr.msk.bf16.mxu0 %vm2320_vm0, %v2319_v1 }
  0x33   : > { %2036 = vmatprep.mubr.msk.bf16.mxu1 %vm2320_vm0, %v2319_v1  ;;  %v1308_v37 = vrot.slane %v1306_v33, 1 }
  0x34   : > { %2019 = vmatpush3.bf16.msra.mxu0 %v2224_v34  ;;  %v2264_v34 = vld [vmem:[%s2731_s1 + $0x188] sm:$0xff]  }
  0x35   : > { %2031 = vmatpush3.bf16.msra.mxu1 %v2225_v35  ;;  %2020 = vmatprep.subr.bf16.mxu0 %v2319_v1  ;;  %v2265_v35 = vld [vmem:[%s2731_s1 + $0x1a8] sm:$0xff]  }
  0x36   : > { %2032 = vmatprep.subr.bf16.mxu1 %v2319_v1 }
  0x38   : > { %2021 = vmatpush3.bf16.msra.mxu0 %v2226_v36  ;;  %v1304_v36 = vshrl.u32 %v2268_v30, 16 }
  0x39   : > { %2033 = vmatpush3.bf16.msra.mxu1 %v2227_v38  ;;  %2022 = vmatprep.subr.bf16.mxu0 %v2319_v1  ;;  %v2266_v38 = vld [vmem:[%s2731_s1 + $0x180] sm:$0xff]  }
  0x3a   : > { %2034 = vmatprep.subr.bf16.mxu1 %v2319_v1  ;;  %v1309_v40 = vor.u32 %v1308_v37, %v1304_v36 }
  0x3c   : > { %2023 = vmatpush3.bf16.msra.mxu0 %v2228_v39  ;;  %v2267_v39 = vld [vmem:[%s2731_s1 + $0x1a0] sm:$0xff]  }
  0x3d   : > { %2035 = vmatpush3.bf16.msra.mxu1 %v2229_v42  ;;  %2040 = vmatprep.subr.bf16.mxu0 %v2319_v1  ;;  %v2269_v42 = vld [vmem:[%s2731_s1 + $0x1d8] sm:$0xff]  }
  0x3e   : > { %2052 = vmatprep.subr.bf16.mxu1 %v2319_v1 }
  0x3f   : > { %2025 = vmatmul.mubr.msk.bf16.vlgmr.msra.gmra.mxu0 %vm247_vm1, %v1706_v43  ;;  %v2270_v43 = vld [vmem:[%s2731_s1 + $0x1f8] sm:$0xff]  }
  0x40   : > { %2037 = vmatmul.mubr.msk.bf16.vlgmr.msra.gmra.mxu1 %vm247_vm1, %v629_v44  ;;  %2041 = vmatpush3.bf16.msra.mxu0 %v2231_v45  ;;  %v2278_v44 = vld [vmem:[%s2412_s9 + $0xc] ss:$0 sps:$4 sm:$0x66]   ;;  %v2271_v45 = vld [vmem:[%s2731_s1 + $0x1d0] sm:$0xff]   ;;  %s1655_s9 = sshll.u32 %s2745_s13, 1 }
  0x41   : > { %2053 = vmatpush3.bf16.msra.mxu1 %v2232_v46  ;;  %2042 = vmatprep.subr.bf16.mxu0 %v2319_v1  ;;  %v2272_v46 = vld [vmem:[%s2731_s1 + $0x1f0] sm:$0xff]   ;;  %v1477_v48 = vshll.u32 %v2278_v44, 16  ;;  %s188_s19 = sadd.s32 %s1655_s9, %s2747_s12 }
  0x42   : > { %2054 = vmatprep.subr.bf16.mxu1 %v2319_v1  ;;  %2048 = vmatprep.mubr.msk.bf16.mxu0 %vm2320_vm0, %v2319_v1  ;;  %s1656_s20 = sshll.u32 %s188_s19, 1 }
  0x43   : > { %2060 = vmatprep.mubr.msk.bf16.mxu1 %vm2320_vm0, %v2319_v1  ;;  %s190_s25 = scalar_lea.vmem %s2733_s3, %s1656_s20 }
  0x44   : > { %2043 = vmatpush3.bf16.msra.mxu0 %v2233_v47  ;;  %v1474_v47 = vshrl.u32 %v2278_v44, 16 }
  0x45   : > { %2055 = vmatpush3.bf16.msra.mxu1 %v2234_v49  ;;  %2044 = vmatprep.subr.bf16.mxu0 %v2319_v1  ;;  %v2273_v49 = vld [vmem:[%s2731_s1 + $0x1c8] sm:$0xff]  }
  0x46   : > { %2056 = vmatprep.subr.bf16.mxu1 %v2319_v1 }
  0x48   : > { %2045 = vmatpush3.bf16.msra.mxu0 %v2235_v52  ;;  %v1476_v52 = vrot.slane %v1474_v47, 1 }
  0x49   : > { %2057 = vmatpush3.bf16.msra.mxu1 %v2236_v53  ;;  %2046 = vmatprep.subr.bf16.mxu0 %v2319_v1  ;;  %v1479_v53 = vrot.slane %v1477_v48, 2 }
  0x4a   : > { %2058 = vmatprep.subr.bf16.mxu1 %v2319_v1 }
  0x4b   : > { %v1480_v57 = vor.u32 %v1479_v53, %v1476_v52 }
  0x4c   : > { %2047 = vmatpush3.bf16.msra.mxu0 %v2237_v55  ;;  %v2276_v55 = vld [vmem:[%s2731_s1 + $0x1e0] sm:$0xff]  }
  0x4d   : > { %2059 = vmatpush3.bf16.msra.mxu1 %v2238_v58  ;;  %2064 = vmatprep.subr.bf16.mxu0 %v2319_v1 }
  0x4e   : > { %2076 = vmatprep.subr.bf16.mxu1 %v2319_v1 }
  0x4f   : > { %2049 = vmatmul.mubr.msk.bf16.vlgmr.msra.gmra.mxu0 %vm247_vm1, %v711_v59 }
  0x50   : > { %2061 = vmatmul.mubr.msk.bf16.vlgmr.msra.gmra.mxu1 %vm247_vm1, %v800_v60  ;;  %2065 = vmatpush3.bf16.msra.mxu0 %v2241_v61 }
  0x51   : > { %2077 = vmatpush3.bf16.msra.mxu1 %v2242_v62  ;;  %2066 = vmatprep.subr.bf16.mxu0 %v2319_v1 }
  0x52   : > { %2078 = vmatprep.subr.bf16.mxu1 %v2319_v1  ;;  %2072 = vmatprep.mubr.msk.bf16.mxu0 %vm2320_vm0, %v2319_v1 }
  0x53   : > { %2084 = vmatprep.mubr.msk.bf16.mxu1 %vm2320_vm0, %v2319_v1 }
  0x54   : > { %2067 = vmatpush3.bf16.msra.mxu0 %v2243_v63 }
  0x55   : > { %2079 = vmatpush3.bf16.msra.mxu1 %v2244_v0  ;;  %2068 = vmatprep.subr.bf16.mxu0 %v2319_v1 }
  0x56   : > { %2080 = vmatprep.subr.bf16.mxu1 %v2319_v1 }
  0x58   : > { %2069 = vmatpush3.bf16.msra.mxu0 %v2245_v3 }
  0x59   : > { %2081 = vmatpush3.bf16.msra.mxu1 %v2246_v5  ;;  %2070 = vmatprep.subr.bf16.mxu0 %v2319_v1 }
  0x5a   : > { %2082 = vmatprep.subr.bf16.mxu1 %v2319_v1 }
  0x5c   : > { %2071 = vmatpush3.bf16.msra.mxu0 %v2247_v8 }
  0x5d   : > { %2083 = vmatpush3.bf16.msra.mxu1 %v2248_v9  ;;  %2088 = vmatprep.subr.bf16.mxu0 %v2319_v1 }
  0x5e   : > { %2100 = vmatprep.subr.bf16.mxu1 %v2319_v1 }
  0x5f   : > { %2073 = vmatmul.mubr.msk.bf16.vlgmr.msra.gmra.mxu0 %vm247_vm1, %v1766_v11 }
  0x60   : > { %2085 = vmatmul.mubr.msk.bf16.vlgmr.msra.gmra.mxu1 %vm247_vm1, %v969_v10  ;;  %2089 = vmatpush3.bf16.msra.mxu0 %v2250_v12 }
  0x61   : > { %2101 = vmatpush3.bf16.msra.mxu1 %v2251_v13  ;;  %2090 = vmatprep.subr.bf16.mxu0 %v2319_v1 }
  0x62   : > { %2102 = vmatprep.subr.bf16.mxu1 %v2319_v1  ;;  %2096 = vmatprep.mubr.msk.bf16.mxu0 %vm2320_vm0, %v2319_v1 }
  0x63   : > { %2108 = vmatprep.mubr.msk.bf16.mxu1 %vm2320_vm0, %v2319_v1 }
  0x64   : > { %2091 = vmatpush3.bf16.msra.mxu0 %v2252_v15 }
  0x65   : > { %2103 = vmatpush3.bf16.msra.mxu1 %v2253_v16  ;;  %2092 = vmatprep.subr.bf16.mxu0 %v2319_v1 }
  0x66   : > { %2104 = vmatprep.subr.bf16.mxu1 %v2319_v1 }
  0x68   : > { %2093 = vmatpush3.bf16.msra.mxu0 %v2254_v19 }
  0x69   : > { %2105 = vmatpush3.bf16.msra.mxu1 %v2255_v20  ;;  %2094 = vmatprep.subr.bf16.mxu0 %v2319_v1 }
  0x6a   : > { %2106 = vmatprep.subr.bf16.mxu1 %v2319_v1 }
  0x6c   : > { %2095 = vmatpush3.bf16.msra.mxu0 %v2256_v24 }
  0x6d   : > { %2107 = vmatpush3.bf16.msra.mxu1 %v2257_v25  ;;  %2112 = vmatprep.subr.bf16.mxu0 %v2319_v1 }
  0x6e   : > { %2124 = vmatprep.subr.bf16.mxu1 %v2319_v1 }
  0x6f   : > { %2097 = vmatmul.mubr.msk.bf16.vlgmr.msra.gmra.mxu0 %vm247_vm1, %v1051_v26 }
  0x70   : > { %2109 = vmatmul.mubr.msk.bf16.vlgmr.msra.gmra.mxu1 %vm247_vm1, %v1140_v27  ;;  %2113 = vmatpush3.bf16.msra.mxu0 %v2260_v28 }
  0x71   : > { %2125 = vmatpush3.bf16.msra.mxu1 %v2261_v29  ;;  %2114 = vmatprep.subr.bf16.mxu0 %v2319_v1 }
  0x72   : > { %2126 = vmatprep.subr.bf16.mxu1 %v2319_v1  ;;  %2120 = vmatprep.mubr.msk.bf16.mxu0 %vm2320_vm0, %v2319_v1 }
  0x73   : > { %2132 = vmatprep.mubr.msk.bf16.mxu1 %vm2320_vm0, %v2319_v1 }
  0x74   : > { %2115 = vmatpush3.bf16.msra.mxu0 %v2262_v31 }
  0x75   : > { %2127 = vmatpush3.bf16.msra.mxu1 %v2263_v32  ;;  %2116 = vmatprep.subr.bf16.mxu0 %v2319_v1 }
  0x76   : > { %2128 = vmatprep.subr.bf16.mxu1 %v2319_v1 }
  0x78   : > { %2117 = vmatpush3.bf16.msra.mxu0 %v2264_v34 }
  0x79   : > { %2129 = vmatpush3.bf16.msra.mxu1 %v2265_v35  ;;  %2118 = vmatprep.subr.bf16.mxu0 %v2319_v1 }
  0x7a   : > { %2130 = vmatprep.subr.bf16.mxu1 %v2319_v1 }
  0x7c   : > { %2119 = vmatpush3.bf16.msra.mxu0 %v2266_v38 }
  0x7d   : > { %2131 = vmatpush3.bf16.msra.mxu1 %v2267_v39  ;;  %2136 = vmatprep.subr.bf16.mxu0 %v2319_v1 }
  0x7e   : > { %2148 = vmatprep.subr.bf16.mxu1 %v2319_v1 }
  0x7f   : > { %2121 = vmatmul.mubr.msk.bf16.vlgmr.msra.gmra.mxu0 %vm247_vm1, %v1826_v41 }
  0x80   : > { %2133 = vmatmul.mubr.msk.bf16.vlgmr.msra.gmra.mxu1 %vm247_vm1, %v1309_v40  ;;  %2137 = vmatpush3.bf16.msra.mxu0 %v2269_v42 }
  0x81   : > { %2149 = vmatpush3.bf16.msra.mxu1 %v2270_v43  ;;  %2138 = vmatprep.subr.bf16.mxu0 %v2319_v1 }
  0x82   : > { %2150 = vmatprep.subr.bf16.mxu1 %v2319_v1  ;;  %2144 = vmatprep.mubr.msk.bf16.mxu0 %vm2320_vm0, %v2319_v1 }
  0x83   : > { %2156 = vmatprep.mubr.msk.bf16.mxu1 %vm2320_vm0, %v2319_v1 }
  0x84   : > { %2139 = vmatpush3.bf16.msra.mxu0 %v2271_v45 }
  0x85   : > { %2151 = vmatpush3.bf16.msra.mxu1 %v2272_v46  ;;  %2140 = vmatprep.subr.bf16.mxu0 %v2319_v1 }
  0x86   : > { %2152 = vmatprep.subr.bf16.mxu1 %v2319_v1 }
  0x88   : > { %2141 = vmatpush3.bf16.msra.mxu0 %v2273_v49 }
  0x89   : > { %2153 = vmatpush3.bf16.msra.mxu1 %v2274_v50  ;;  %2142 = vmatprep.subr.bf16.mxu0 %v2319_v1 }
  0x8a   : > { %2154 = vmatprep.subr.bf16.mxu1 %v2319_v1 }
  0x8c   : > { %2143 = vmatpush3.bf16.msra.mxu0 %v2275_v54 }
  0x8d   : > { %2155 = vmatpush3.bf16.msra.mxu1 %v2276_v55 }
  0x8f   : > { %2145 = vmatmul.mubr.msk.bf16.vlgmr.msra.gmra.mxu0 %vm247_vm1, %v1391_v56 }
  0x90   : > { %2157 = vmatmul.mubr.msk.bf16.vlgmr.msra.gmra.mxu1 %vm247_vm1, %v1480_v57 }
  0xdf   : > { %v285_v58 = vpop.f32.mrf.mxu0 }
  0xe0   : > { %v352_v59 = vpop.f32.mrf.mxu1 }
  0xe1   : > { %v353_v60 = vadd.f32 %v352_v59, %v285_v58  ;;  %v1978_v61 = vpop.f32.mrf.mxu0 }
  0xe2   : > { %v1990_v62 = vpop.f32.mrf.mxu1 }
  0xe3   : > { %v288_v63 = vpop.f32.mrf.mxu0 }
  0xe4   : > { %v355_v0 = vpop.f32.mrf.mxu1 }
  0xe5   : > { %v1979_v2 = vpop.f32.mrf.mxu0 }
  0xe6   : > { %v1991_v3 = vpop.f32.mrf.mxu1 }
  0xe7   : > { %v1885_v3 = vld [vmem:[%s2732_s2] ss:$0 sm:$0xff] }
  0xef   : > { %v433_v4 = vpop.f32.mrf.mxu0 }
  0xf0   : > { %v522_v5 = vpop.f32.mrf.mxu1  ;;  %v439_v1 = vadd.f32 %v433_v4, %v353_v60 }
  0xf1   : > { %v2002_v6 = vpop.f32.mrf.mxu0 }
  0xf2   : > { %v2014_v7 = vpop.f32.mrf.mxu1  ;;  %v528_v8 = vadd.f32 %v522_v5, %v439_v1 }
  0xf3   : > { %v436_v9 = vpop.f32.mrf.mxu0 }
  0xf4   : > { %v525_v10 = vpop.f32.mrf.mxu1 }
  0xf5   : > { %v2003_v11 = vpop.f32.mrf.mxu0 }
  0xf6   : > { %v2015_v12 = vpop.f32.mrf.mxu1 }
  0xff   : > { %v603_v13 = vpop.f32.mrf.mxu0 }
 0x100   : > { %v691_v14 = vpop.f32.mrf.mxu1  ;;  %v609_v41 = vadd.f32 %v603_v13, %v528_v8 }
 0x101   : > { %v2026_v15 = vpop.f32.mrf.mxu0 }
 0x102   : > { %v2038_v16 = vpop.f32.mrf.mxu1  ;;  %v697_v46 = vadd.f32 %v691_v14, %v609_v41 }
 0x103   : > { %v606_v17 = vpop.f32.mrf.mxu0 }
 0x104   : > { %v694_v18 = vpop.f32.mrf.mxu1 }
 0x105   : > { %v2027_v19 = vpop.f32.mrf.mxu0 }
 0x106   : > { %v2039_v20 = vpop.f32.mrf.mxu1 }
 0x10f   : > { %v773_v21 = vpop.f32.mrf.mxu0 }
 0x110   : > { %v862_v22 = vpop.f32.mrf.mxu1  ;;  %v779_v47 = vadd.f32 %v773_v21, %v697_v46 }
 0x111   : > { %v2050_v23 = vpop.f32.mrf.mxu0 }
 0x112   : > { %v2062_v24 = vpop.f32.mrf.mxu1  ;;  %v868_v48 = vadd.f32 %v862_v22, %v779_v47 }
 0x113   : > { %v776_v25 = vpop.f32.mrf.mxu0 }
 0x114   : > { %v865_v26 = vpop.f32.mrf.mxu1 }
 0x115   : > { %v2051_v27 = vpop.f32.mrf.mxu0 }
 0x116   : > { %v2063_v28 = vpop.f32.mrf.mxu1 }
 0x11f   : > { %v943_v29 = vpop.f32.mrf.mxu0 }
 0x120   : > { %v1031_v30 = vpop.f32.mrf.mxu1  ;;  %v949_v49 = vadd.f32 %v943_v29, %v868_v48 }
 0x121   : > { %v2074_v31 = vpop.f32.mrf.mxu0 }
 0x122   : > { %v2086_v32 = vpop.f32.mrf.mxu1  ;;  %v1037_v54 = vadd.f32 %v1031_v30, %v949_v49 }
 0x123   : > { %v946_v33 = vpop.f32.mrf.mxu0 }
 0x124   : > { %v1034_v34 = vpop.f32.mrf.mxu1 }
 0x125   : > { %v2075_v35 = vpop.f32.mrf.mxu0 }
 0x126   : > { %v2087_v36 = vpop.f32.mrf.mxu1 }
 0x12f   : > { %v1113_v37 = vpop.f32.mrf.mxu0 }
 0x130   : > { %v1202_v38 = vpop.f32.mrf.mxu1  ;;  %v1119_v57 = vadd.f32 %v1113_v37, %v1037_v54 }
 0x131   : > { %v2098_v39 = vpop.f32.mrf.mxu0 }
 0x132   : > { %v2110_v40 = vpop.f32.mrf.mxu1  ;;  %v1208_v60 = vadd.f32 %v1202_v38, %v1119_v57 }
 0x133   : > { %v1116_v42 = vpop.f32.mrf.mxu0 }
 0x134   : > { %v1205_v43 = vpop.f32.mrf.mxu1 }
 0x135   : > { %v2099_v44 = vpop.f32.mrf.mxu0 }
 0x136   : > { %v2111_v45 = vpop.f32.mrf.mxu1 }
 0x13f   : > { %v1283_v50 = vpop.f32.mrf.mxu0 }
 0x140   : > { %v1371_v51 = vpop.f32.mrf.mxu1  ;;  %v1289_v61 = vadd.f32 %v1283_v50, %v1208_v60 }
 0x141   : > { %v2122_v52 = vpop.f32.mrf.mxu0 }
 0x142   : > { %v2134_v53 = vpop.f32.mrf.mxu1  ;;  %v1377_v62 = vadd.f32 %v1371_v51, %v1289_v61 }
 0x143   : > { %v1286_v55 = vpop.f32.mrf.mxu0 }
 0x144   : > { %v1374_v56 = vpop.f32.mrf.mxu1 }
 0x145   : > { %v2123_v58 = vpop.f32.mrf.mxu0 }
 0x146   : > { %v2135_v59 = vpop.f32.mrf.mxu1 }
 0x14f   : > { %v1453_v63 = vpop.f32.mrf.mxu0 }
 0x150   : > { %v1542_v0 = vpop.f32.mrf.mxu1  ;;  %v1459_v2 = vadd.f32 %v1453_v63, %v1377_v62 }
 0x151   : > { %v2146_v4 = vpop.f32.mrf.mxu0 }
 0x152   : > { %v2158_v5 = vpop.f32.mrf.mxu1  ;;  %v1548_v1 = vadd.f32 %v1542_v0, %v1459_v2 }
 0x153   : > { %v1456_v6 = vpop.f32.mrf.mxu0 }
 0x154   : > { %v1545_v7 = vpop.f32.mrf.mxu1  ;;  %v1556_v8 = vadd.f32 %v1885_v3, %v1548_v1 }
 0x155   : > { %v2147_v9 = vpop.f32.mrf.mxu0 }
 0x156   : > { %v2159_v10 = vpop.f32.mrf.mxu1  ;;  %1557 = vst [vmem:[%s190_s25] sm:$0x3] %v1556_v8 }
 0x157 PF: > { %s13_s16 = sadd.s32 1, %s2317_s16   ;;  %s2734_s12 = smov %s2309_s14 }
 0x158   : > { %p10_p7 = scmp.ge.s32.totalorder %s13_s16, 6   ;;  %s2735_s13 = smov %s2313_s15 }
 0x159   : > { %s2736_s14 = smov %s2739_s17  ;;  %s2737_s15 = smov %s2743_s18 }
 0x15a   :  { %12 = sbr.rel (!%p10_p7) target bundleno = 3 (0x3), region = 81 }

</bundles_post_ra>
